<compile_context>
chip_gen: v5e
topology: v5e:2x2
jax: 0.10.0
libtpu: 0.0.40
codegen_flags: <defaults>
</compile_context>

<pallas_src>
import functools

import jax
import jax.numpy as jnp
from jax.experimental import pallas as pl
from jax.experimental.pallas import tpu as pltpu


# ----------------------------------------------------------------------------
# Fused Resblock kernel (one grid step == one image, everything stays in VMEM)
# ----------------------------------------------------------------------------
def _resblock_kernel(x_ref, w1_ref, b1_ref, w2_ref, b2_ref, w3_ref, b3_ref,
                     wds_ref, bds_ref, o_ref, xp_ref,
                     *, H, W, Ho, Wo, stride, dilation):
    Cin = x_ref.shape[-1]
    Cmid = w1_ref.shape[-1]
    pad = dilation

    # --- conv1: 1x1, stride 1 — bf16 MXU matmul, f32 accumulate, bias + ReLU ----------------
    x3d = x_ref[...]                                     # (H, W, Cin) bf16
    x2d = x3d.reshape(H * W, Cin)
    a1 = jnp.dot(x2d, w1_ref[...], preferred_element_type=jnp.float32)
    a1 = jnp.maximum(a1 + b1_ref[...], 0.0)              # BN scale already folded into w1

    # --- stage conv1 output into a zero-padded VMEM scratch (in-VMEM "im2col") --------------
    xp_ref[...] = jnp.zeros_like(xp_ref)
    xp_ref[pad:pad + H, pad:pad + W, :] = a1.reshape(H, W, Cmid)

    # --- conv2: 3x3 (stride / dilation) as 9 shifted matmuls, f32 accumulator ---------------
    acc = jnp.zeros((Ho * Wo, Cmid), jnp.float32)
    for kh in range(3):
        for kw in range(3):
            h0 = kh * dilation
            w0 = kw * dilation
            if stride == 1:
                win = xp_ref[h0:h0 + Ho, w0:w0 + Wo, :]
            else:
                win = xp_ref[pl.ds(h0, Ho, stride=stride),
                             pl.ds(w0, Wo, stride=stride), :]
            acc = acc + jnp.dot(win.reshape(Ho * Wo, Cmid).astype(jnp.bfloat16),
                                w2_ref[kh * 3 + kw],
                                preferred_element_type=jnp.float32)
    out2 = jnp.maximum(acc + b2_ref[...], 0.0).astype(jnp.bfloat16)

    # --- conv3 (1x1, no ReLU) + fused downsample identity + residual add + ReLU -------------
    a3 = jnp.dot(out2, w3_ref[...], preferred_element_type=jnp.float32) + b3_ref[...]
    if stride == 1:
        xds2d = x2d                                      # identity taps every pixel
    else:
        xds = x_ref[pl.ds(0, Ho, stride=stride), pl.ds(0, Wo, stride=stride), :]
        xds2d = xds.reshape(Ho * Wo, Cin)
    ident = jnp.dot(xds2d, wds_ref[...], preferred_element_type=jnp.float32) + bds_ref[...]
    o_ref[...] = jnp.maximum(a3 + ident, 0.0).astype(o_ref.dtype)


# ----------------------------------------------------------------------------
# JAX glue: BN folding, weight packing, pallas_call wrapper
# ----------------------------------------------------------------------------
def _fold_bn(bn_params, eps=1e-5):
    gamma, beta, mean, var = bn_params
    scale = gamma / jnp.sqrt(var + eps)
    bias = beta - mean * scale
    return scale, bias


def _pack_1x1(w):   # (Cout, Cin, 1, 1) -> (Cin, Cout)
    return jnp.transpose(w[:, :, 0, 0], (1, 0))


def _pack_3x3(w):   # (Cout, Cin, 3, 3) -> (9, Cin, Cout), tap index = kh*3 + kw
    return jnp.transpose(w, (2, 3, 1, 0)).reshape(9, w.shape[1], w.shape[0])


def _fold_into_weight(w_packed, bn_params):
    """Fold eval-mode BN scale into the packed weight (cast to bf16); return (1, C) f32 bias."""
    scale, bias = _fold_bn(bn_params)
    w = (w_packed * scale).astype(jnp.bfloat16)           # scale broadcasts over Cout (last dim)
    return w, bias.reshape(1, -1).astype(jnp.float32)


def _compiler_params():
    kwargs = dict(dimension_semantics=("parallel",))       # shard batch over TCs (v7x: 2 TCs)
    try:  # size the scoped VMEM limit per chip generation (v7x has half of v5e/v6e)
        cap = int(pltpu.get_tpu_info().vmem_capacity_bytes)
        kwargs["vmem_limit_bytes"] = min(cap // 2, 96 * 1024 * 1024)
    except Exception:
        pass
    return pltpu.CompilerParams(**kwargs)


def resblock_forward(x_nchw, params, *, stride, dilation):
    """Resblock.first forward (eval-mode BN): relu(conv3(conv2(conv1(x))) + downsample(x))."""
    N, Cin, H, W = x_nchw.shape
    Cmid = params["w1"].shape[0]
    Cout = params["w3"].shape[0]
    pad = dilation
    Ho = (H - 1) // stride + 1
    Wo = (W - 1) // stride + 1
    Hp, Wp = H + 2 * pad, W + 2 * pad

    # Channels-last + bf16 so channels sit on the 128-wide lane axis and feed the MXU.
    # (Public API stays NCHW to match the PyTorch module; the transposes are XLA glue.)
    x = jnp.transpose(x_nchw, (0, 2, 3, 1)).astype(jnp.bfloat16)

    w1, b1 = _fold_into_weight(_pack_1x1(params["w1"]), params["bn1"])
    w2, b2 = _fold_into_weight(_pack_3x3(params["w2"]), params["bn2"])
    w3, b3 = _fold_into_weight(_pack_1x1(params["w3"]), params["bn3"])
    wds, bds = _fold_into_weight(_pack_1x1(params["w_ds"]), params["bn_ds"])

    kernel = functools.partial(_resblock_kernel, H=H, W=W, Ho=Ho, Wo=Wo,
                               stride=stride, dilation=dilation)

    const2 = lambda n: (0, 0)          # weights/biases: constant block -> VMEM-resident
    const3 = lambda n: (0, 0, 0)

    y = pl.pallas_call(
        kernel,
        out_shape=jax.ShapeDtypeStruct((N, Ho * Wo, Cout), jnp.float32),
        grid=(N,),
        in_specs=[
            pl.BlockSpec((None, H, W, Cin), lambda n: (n, 0, 0, 0)),   # x, one image per step
            pl.BlockSpec((Cin, Cmid), const2),                         # w1  (BN scale folded)
            pl.BlockSpec((1, Cmid), const2),                           # b1
            pl.BlockSpec((9, Cmid, Cmid), const3),                     # w2  (BN scale folded)
            pl.BlockSpec((1, Cmid), const2),                           # b2
            pl.BlockSpec((Cmid, Cout), const2),                        # w3  (BN scale folded)
            pl.BlockSpec((1, Cout), const2),                           # b3
            pl.BlockSpec((Cin, Cout), const2),                         # w_ds (BN scale folded)
            pl.BlockSpec((1, Cout), const2),                           # b_ds
        ],
        out_specs=pl.BlockSpec((None, Ho * Wo, Cout), lambda n: (n, 0, 0)),  # lane-dense slab
        scratch_shapes=[pltpu.VMEM((Hp, Wp, Cmid), jnp.float32)],      # padded conv1 output
        compiler_params=_compiler_params(),
    )(x, w1, b1, w2, b2, w3, b3, wds, bds)

    return jnp.transpose(y.reshape(N, Ho, Wo, Cout), (0, 3, 1, 2))     # back to NCHW


# ----------------------------------------------------------------------------
# Deterministic parameter init + pure-JAX reference for correctness check
# ----------------------------------------------------------------------------
def init_params(key, in_channels, channels, dtype=jnp.float32):
    c4 = channels * 4
    keys = jax.random.split(key, 8)

    def conv_w(k, cout, cin, kh, kw):
        return 0.1 * jax.random.normal(k, (cout, cin, kh, kw), dtype)

    def bn_params(k, c):
        k1, k2, k3, k4 = jax.random.split(k, 4)
        gamma = 1.0 + 0.1 * jax.random.normal(k1, (c,), dtype)
        beta = 0.1 * jax.random.normal(k2, (c,), dtype)
        rmean = 0.1 * jax.random.normal(k3, (c,), dtype)
        rvar = jax.random.uniform(k4, (c,), dtype, 0.5, 1.5)
        return (gamma, beta, rmean, rvar)

    return {
        "w1": conv_w(keys[0], channels, in_channels, 1, 1),
        "bn1": bn_params(keys[1], channels),
        "w2": conv_w(keys[2], channels, channels, 3, 3),
        "bn2": bn_params(keys[3], channels),
        "w3": conv_w(keys[4], c4, channels, 1, 1),
        "bn3": bn_params(keys[5], c4),
        "w_ds": conv_w(keys[6], c4, in_channels, 1, 1),
        "bn_ds": bn_params(keys[7], c4),
    }


def resblock_reference(x, params, *, stride, dilation):
    """Pure-JAX (lax.conv) reference, eval-mode BN, f32 everywhere."""
    def conv(x, w, stride=1, dilation=1, padding=0):
        return jax.lax.conv_general_dilated(
            x, w, window_strides=(stride, stride),
            padding=[(padding, padding), (padding, padding)],
            rhs_dilation=(dilation, dilation),
            dimension_numbers=("NCHW", "OIHW", "NCHW"))

    def bn(x, p):
        gamma, beta, rmean, rvar = p
        sc = gamma / jnp.sqrt(rvar + 1e-5)
        return x * sc[None, :, None, None] + (beta - rmean * sc)[None, :, None, None]

    out = jax.nn.relu(bn(conv(x, params["w1"]), params["bn1"]))
    out = jax.nn.relu(bn(conv(out, params["w2"], stride, dilation, dilation), params["bn2"]))
    out = bn(conv(out, params["w3"]), params["bn3"])
    ident = bn(conv(x, params["w_ds"], stride), params["bn_ds"])
    return jax.nn.relu(out + ident)


if __name__ == "__main__":
    key = jax.random.PRNGKey(0)
    k_x, k_p = jax.random.split(key)

    N, Cin, H, W = 2, 32, 16, 16
    channels = 16
    stride, dilation = 1, 1

    x = jax.random.normal(k_x, (N, Cin, H, W), jnp.float32)
    params = init_params(k_p, Cin, channels)

    y = jax.block_until_ready(
        resblock_forward(x, params, stride=stride, dilation=dilation))
    y_ref = jax.block_until_ready(
        resblock_reference(x, params, stride=stride, dilation=dilation))

    assert y.shape == (N, channels * 4, H // stride, W // stride)
    max_err = float(jnp.max(jnp.abs(y - y_ref)))
    # bf16 matmuls (f32 accumulation) vs the f32 lax.conv reference.
    assert jnp.allclose(y, y_ref, rtol=5e-2, atol=5e-2), \
        f"mismatch vs reference (max abs err = {max_err})"

    print("KERNEL_OK")
</pallas_src>

<mosaic_0001>
module attributes {stable_mosaic.version = 11 : i64} {
  func.func @_resblock_kernel(%arg0: i32, %arg1: memref<1x16x16x32xbf16, #tpu.memory_space<vmem>>, %arg2: memref<32x16xbf16, #tpu.memory_space<vmem>>, %arg3: memref<1x16xf32, #tpu.memory_space<vmem>>, %arg4: memref<9x16x16xbf16, #tpu.memory_space<vmem>>, %arg5: memref<1x16xf32, #tpu.memory_space<vmem>>, %arg6: memref<16x64xbf16, #tpu.memory_space<vmem>>, %arg7: memref<1x64xf32, #tpu.memory_space<vmem>>, %arg8: memref<32x64xbf16, #tpu.memory_space<vmem>>, %arg9: memref<1x64xf32, #tpu.memory_space<vmem>>, %arg10: memref<1x256x64xf32, #tpu.memory_space<vmem>>, %arg11: memref<18x18x16xf32, #tpu.memory_space<vmem>>) attributes {dimension_semantics = [#tpu.dimension_semantics<parallel>], iteration_bounds = array<i64: 2>, scalar_prefetch = 0 : i64, scratch_operands = 1 : i64, tpu.core_type = #tpu.core_type<tc>, window_params = [{transform_indices = @transform_0, window_bounds = array<i64: 1, 16, 16, 32>}, {pipeline_mode = #tpu.pipeline_mode<synchronous>, transform_indices = @transform_1, window_bounds = array<i64: 32, 16>}, {pipeline_mode = #tpu.pipeline_mode<synchronous>, transform_indices = @transform_2, window_bounds = array<i64: 1, 16>}, {pipeline_mode = #tpu.pipeline_mode<synchronous>, transform_indices = @transform_3, window_bounds = array<i64: 9, 16, 16>}, {pipeline_mode = #tpu.pipeline_mode<synchronous>, transform_indices = @transform_4, window_bounds = array<i64: 1, 16>}, {pipeline_mode = #tpu.pipeline_mode<synchronous>, transform_indices = @transform_5, window_bounds = array<i64: 16, 64>}, {pipeline_mode = #tpu.pipeline_mode<synchronous>, transform_indices = @transform_6, window_bounds = array<i64: 1, 64>}, {pipeline_mode = #tpu.pipeline_mode<synchronous>, transform_indices = @transform_7, window_bounds = array<i64: 32, 64>}, {pipeline_mode = #tpu.pipeline_mode<synchronous>, transform_indices = @transform_8, window_bounds = array<i64: 1, 64>}, {transform_indices = @transform_9, window_bounds = array<i64: 1, 256, 64>}]} {
    %c0 = arith.constant 0 : index
    %c0_0 = arith.constant 0 : index
    %c0_1 = arith.constant 0 : index
    %c0_2 = arith.constant 0 : index
    %0 = vector.load %arg1[%c0, %c0_0, %c0_1, %c0_2] : memref<1x16x16x32xbf16, #tpu.memory_space<vmem>>, vector<1x16x16x32xbf16>
    %1 = vector.shape_cast %0 : vector<1x16x16x32xbf16> to vector<16x16x32xbf16>
    %2 = vector.shape_cast %1 : vector<16x16x32xbf16> to vector<256x32xbf16>
    %c0_3 = arith.constant 0 : index
    %c0_4 = arith.constant 0 : index
    %3 = vector.load %arg2[%c0_3, %c0_4] : memref<32x16xbf16, #tpu.memory_space<vmem>>, vector<32x16xbf16>
    %cst = arith.constant dense<0.000000e+00> : vector<256x16xf32>
    %4 = tpu.matmul %2, %3, %cst {dimension_numbers = #tpu.dot_dimension_numbers<[1], [0], [0], [1], [0, 0, 1, 1], [], []>} : vector<256x32xbf16>, vector<32x16xbf16>, vector<256x16xf32> -> vector<256x16xf32>
    %c0_5 = arith.constant 0 : index
    %c0_6 = arith.constant 0 : index
    %5 = vector.load %arg3[%c0_5, %c0_6] : memref<1x16xf32, #tpu.memory_space<vmem>>, vector<1x16xf32>
    %6 = vector.broadcast %5 : vector<1x16xf32> to vector<256x16xf32>
    %7 = arith.addf %4, %6 : vector<256x16xf32>
    %cst_7 = arith.constant 0.000000e+00 : f32
    %8 = vector.broadcast %cst_7 : f32 to vector<256x16xf32>
    %9 = arith.maximumf %7, %8 : vector<256x16xf32>
    %cst_8 = arith.constant 0.000000e+00 : f32
    %10 = vector.broadcast %cst_8 : f32 to vector<18x18x16xf32>
    %c0_9 = arith.constant 0 : index
    %c0_10 = arith.constant 0 : index
    %c0_11 = arith.constant 0 : index
    %11 = vector.load %arg11[%c0_9, %c0_10, %c0_11] : memref<18x18x16xf32, #tpu.memory_space<vmem>>, vector<18x18x16xf32>
    tpu.vector_store %arg11[%c0_9, %c0_10, %c0_11], %10 {strides = array<i32>} : memref<18x18x16xf32, #tpu.memory_space<vmem>>, vector<18x18x16xf32>,
    %12 = vector.shape_cast %9 : vector<256x16xf32> to vector<16x16x16xf32>
    %c1 = arith.constant 1 : index
    %c1_12 = arith.constant 1 : index
    %c0_13 = arith.constant 0 : index
    %13 = vector.load %arg11[%c1, %c1_12, %c0_13] : memref<18x18x16xf32, #tpu.memory_space<vmem>>, vector<16x16x16xf32>
    tpu.vector_store %arg11[%c1, %c1_12, %c0_13], %12 {strides = array<i32>} : memref<18x18x16xf32, #tpu.memory_space<vmem>>, vector<16x16x16xf32>,
    %cst_14 = arith.constant 0.000000e+00 : f32
    %14 = vector.broadcast %cst_14 : f32 to vector<256x16xf32>
    %c0_15 = arith.constant 0 : index
    %c0_16 = arith.constant 0 : index
    %c0_17 = arith.constant 0 : index
    %15 = vector.load %arg11[%c0_15, %c0_16, %c0_17] : memref<18x18x16xf32, #tpu.memory_space<vmem>>, vector<16x16x16xf32>
    %16 = vector.shape_cast %15 : vector<16x16x16xf32> to vector<256x16xf32>
    %17 = arith.truncf %16 : vector<256x16xf32> to vector<256x16xbf16>
    %c0_18 = arith.constant 0 : index
    %c0_19 = arith.constant 0 : index
    %c0_20 = arith.constant 0 : index
    %18 = vector.load %arg4[%c0_18, %c0_19, %c0_20] : memref<9x16x16xbf16, #tpu.memory_space<vmem>>, vector<1x16x16xbf16>
    %19 = vector.shape_cast %18 : vector<1x16x16xbf16> to vector<16x16xbf16>
    %cst_21 = arith.constant dense<0.000000e+00> : vector<256x16xf32>
    %20 = tpu.matmul %17, %19, %cst_21 {dimension_numbers = #tpu.dot_dimension_numbers<[1], [0], [0], [1], [0, 0, 1, 1], [], []>} : vector<256x16xbf16>, vector<16x16xbf16>, vector<256x16xf32> -> vector<256x16xf32>
    %21 = arith.addf %14, %20 : vector<256x16xf32>
    %c0_22 = arith.constant 0 : index
    %c1_23 = arith.constant 1 : index
    %c0_24 = arith.constant 0 : index
    %22 = vector.load %arg11[%c0_22, %c1_23, %c0_24] : memref<18x18x16xf32, #tpu.memory_space<vmem>>, vector<16x16x16xf32>
    %23 = vector.shape_cast %22 : vector<16x16x16xf32> to vector<256x16xf32>
    %24 = arith.truncf %23 : vector<256x16xf32> to vector<256x16xbf16>
    %c1_25 = arith.constant 1 : index
    %c0_26 = arith.constant 0 : index
    %c0_27 = arith.constant 0 : index
    %25 = vector.load %arg4[%c1_25, %c0_26, %c0_27] : memref<9x16x16xbf16, #tpu.memory_space<vmem>>, vector<1x16x16xbf16>
    %26 = vector.shape_cast %25 : vector<1x16x16xbf16> to vector<16x16xbf16>
    %cst_28 = arith.constant dense<0.000000e+00> : vector<256x16xf32>
    %27 = tpu.matmul %24, %26, %cst_28 {dimension_numbers = #tpu.dot_dimension_numbers<[1], [0], [0], [1], [0, 0, 1, 1], [], []>} : vector<256x16xbf16>, vector<16x16xbf16>, vector<256x16xf32> -> vector<256x16xf32>
    %28 = arith.addf %21, %27 : vector<256x16xf32>
    %c0_29 = arith.constant 0 : index
    %c2 = arith.constant 2 : index
    %c0_30 = arith.constant 0 : index
    %29 = vector.load %arg11[%c0_29, %c2, %c0_30] : memref<18x18x16xf32, #tpu.memory_space<vmem>>, vector<16x16x16xf32>
    %30 = vector.shape_cast %29 : vector<16x16x16xf32> to vector<256x16xf32>
    %31 = arith.truncf %30 : vector<256x16xf32> to vector<256x16xbf16>
    %c2_31 = arith.constant 2 : index
    %c0_32 = arith.constant 0 : index
    %c0_33 = arith.constant 0 : index
    %32 = vector.load %arg4[%c2_31, %c0_32, %c0_33] : memref<9x16x16xbf16, #tpu.memory_space<vmem>>, vector<1x16x16xbf16>
    %33 = vector.shape_cast %32 : vector<1x16x16xbf16> to vector<16x16xbf16>
    %cst_34 = arith.constant dense<0.000000e+00> : vector<256x16xf32>
    %34 = tpu.matmul %31, %33, %cst_34 {dimension_numbers = #tpu.dot_dimension_numbers<[1], [0], [0], [1], [0, 0, 1, 1], [], []>} : vector<256x16xbf16>, vector<16x16xbf16>, vector<256x16xf32> -> vector<256x16xf32>
    %35 = arith.addf %28, %34 : vector<256x16xf32>
    %c1_35 = arith.constant 1 : index
    %c0_36 = arith.constant 0 : index
    %c0_37 = arith.constant 0 : index
    %36 = vector.load %arg11[%c1_35, %c0_36, %c0_37] : memref<18x18x16xf32, #tpu.memory_space<vmem>>, vector<16x16x16xf32>
    %37 = vector.shape_cast %36 : vector<16x16x16xf32> to vector<256x16xf32>
    %38 = arith.truncf %37 : vector<256x16xf32> to vector<256x16xbf16>
    %c3 = arith.constant 3 : index
    %c0_38 = arith.constant 0 : index
    %c0_39 = arith.constant 0 : index
    %39 = vector.load %arg4[%c3, %c0_38, %c0_39] : memref<9x16x16xbf16, #tpu.memory_space<vmem>>, vector<1x16x16xbf16>
    %40 = vector.shape_cast %39 : vector<1x16x16xbf16> to vector<16x16xbf16>
    %cst_40 = arith.constant dense<0.000000e+00> : vector<256x16xf32>
    %41 = tpu.matmul %38, %40, %cst_40 {dimension_numbers = #tpu.dot_dimension_numbers<[1], [0], [0], [1], [0, 0, 1, 1], [], []>} : vector<256x16xbf16>, vector<16x16xbf16>, vector<256x16xf32> -> vector<256x16xf32>
    %42 = arith.addf %35, %41 : vector<256x16xf32>
    %c1_41 = arith.constant 1 : index
    %c1_42 = arith.constant 1 : index
    %c0_43 = arith.constant 0 : index
    %43 = vector.load %arg11[%c1_41, %c1_42, %c0_43] : memref<18x18x16xf32, #tpu.memory_space<vmem>>, vector<16x16x16xf32>
    %44 = vector.shape_cast %43 : vector<16x16x16xf32> to vector<256x16xf32>
    %45 = arith.truncf %44 : vector<256x16xf32> to vector<256x16xbf16>
    %c4 = arith.constant 4 : index
    %c0_44 = arith.constant 0 : index
    %c0_45 = arith.constant 0 : index
    %46 = vector.load %arg4[%c4, %c0_44, %c0_45] : memref<9x16x16xbf16, #tpu.memory_space<vmem>>, vector<1x16x16xbf16>
    %47 = vector.shape_cast %46 : vector<1x16x16xbf16> to vector<16x16xbf16>
    %cst_46 = arith.constant dense<0.000000e+00> : vector<256x16xf32>
    %48 = tpu.matmul %45, %47, %cst_46 {dimension_numbers = #tpu.dot_dimension_numbers<[1], [0], [0], [1], [0, 0, 1, 1], [], []>} : vector<256x16xbf16>, vector<16x16xbf16>, vector<256x16xf32> -> vector<256x16xf32>
    %49 = arith.addf %42, %48 : vector<256x16xf32>
    %c1_47 = arith.constant 1 : index
    %c2_48 = arith.constant 2 : index
    %c0_49 = arith.constant 0 : index
    %50 = vector.load %arg11[%c1_47, %c2_48, %c0_49] : memref<18x18x16xf32, #tpu.memory_space<vmem>>, vector<16x16x16xf32>
    %51 = vector.shape_cast %50 : vector<16x16x16xf32> to vector<256x16xf32>
    %52 = arith.truncf %51 : vector<256x16xf32> to vector<256x16xbf16>
    %c5 = arith.constant 5 : index
    %c0_50 = arith.constant 0 : index
    %c0_51 = arith.constant 0 : index
    %53 = vector.load %arg4[%c5, %c0_50, %c0_51] : memref<9x16x16xbf16, #tpu.memory_space<vmem>>, vector<1x16x16xbf16>
    %54 = vector.shape_cast %53 : vector<1x16x16xbf16> to vector<16x16xbf16>
    %cst_52 = arith.constant dense<0.000000e+00> : vector<256x16xf32>
    %55 = tpu.matmul %52, %54, %cst_52 {dimension_numbers = #tpu.dot_dimension_numbers<[1], [0], [0], [1], [0, 0, 1, 1], [], []>} : vector<256x16xbf16>, vector<16x16xbf16>, vector<256x16xf32> -> vector<256x16xf32>
    %56 = arith.addf %49, %55 : vector<256x16xf32>
    %c2_53 = arith.constant 2 : index
    %c0_54 = arith.constant 0 : index
    %c0_55 = arith.constant 0 : index
    %57 = vector.load %arg11[%c2_53, %c0_54, %c0_55] : memref<18x18x16xf32, #tpu.memory_space<vmem>>, vector<16x16x16xf32>
    %58 = vector.shape_cast %57 : vector<16x16x16xf32> to vector<256x16xf32>
    %59 = arith.truncf %58 : vector<256x16xf32> to vector<256x16xbf16>
    %c6 = arith.constant 6 : index
    %c0_56 = arith.constant 0 : index
    %c0_57 = arith.constant 0 : index
    %60 = vector.load %arg4[%c6, %c0_56, %c0_57] : memref<9x16x16xbf16, #tpu.memory_space<vmem>>, vector<1x16x16xbf16>
    %61 = vector.shape_cast %60 : vector<1x16x16xbf16> to vector<16x16xbf16>
    %cst_58 = arith.constant dense<0.000000e+00> : vector<256x16xf32>
    %62 = tpu.matmul %59, %61, %cst_58 {dimension_numbers = #tpu.dot_dimension_numbers<[1], [0], [0], [1], [0, 0, 1, 1], [], []>} : vector<256x16xbf16>, vector<16x16xbf16>, vector<256x16xf32> -> vector<256x16xf32>
    %63 = arith.addf %56, %62 : vector<256x16xf32>
    %c2_59 = arith.constant 2 : index
    %c1_60 = arith.constant 1 : index
    %c0_61 = arith.constant 0 : index
    %64 = vector.load %arg11[%c2_59, %c1_60, %c0_61] : memref<18x18x16xf32, #tpu.memory_space<vmem>>, vector<16x16x16xf32>
    %65 = vector.shape_cast %64 : vector<16x16x16xf32> to vector<256x16xf32>
    %66 = arith.truncf %65 : vector<256x16xf32> to vector<256x16xbf16>
    %c7 = arith.constant 7 : index
    %c0_62 = arith.constant 0 : index
    %c0_63 = arith.constant 0 : index
    %67 = vector.load %arg4[%c7, %c0_62, %c0_63] : memref<9x16x16xbf16, #tpu.memory_space<vmem>>, vector<1x16x16xbf16>
    %68 = vector.shape_cast %67 : vector<1x16x16xbf16> to vector<16x16xbf16>
    %cst_64 = arith.constant dense<0.000000e+00> : vector<256x16xf32>
    %69 = tpu.matmul %66, %68, %cst_64 {dimension_numbers = #tpu.dot_dimension_numbers<[1], [0], [0], [1], [0, 0, 1, 1], [], []>} : vector<256x16xbf16>, vector<16x16xbf16>, vector<256x16xf32> -> vector<256x16xf32>
    %70 = arith.addf %63, %69 : vector<256x16xf32>
    %c2_65 = arith.constant 2 : index
    %c2_66 = arith.constant 2 : index
    %c0_67 = arith.constant 0 : index
    %71 = vector.load %arg11[%c2_65, %c2_66, %c0_67] : memref<18x18x16xf32, #tpu.memory_space<vmem>>, vector<16x16x16xf32>
    %72 = vector.shape_cast %71 : vector<16x16x16xf32> to vector<256x16xf32>
    %73 = arith.truncf %72 : vector<256x16xf32> to vector<256x16xbf16>
    %c8 = arith.constant 8 : index
    %c0_68 = arith.constant 0 : index
    %c0_69 = arith.constant 0 : index
    %74 = vector.load %arg4[%c8, %c0_68, %c0_69] : memref<9x16x16xbf16, #tpu.memory_space<vmem>>, vector<1x16x16xbf16>
    %75 = vector.shape_cast %74 : vector<1x16x16xbf16> to vector<16x16xbf16>
    %cst_70 = arith.constant dense<0.000000e+00> : vector<256x16xf32>
    %76 = tpu.matmul %73, %75, %cst_70 {dimension_numbers = #tpu.dot_dimension_numbers<[1], [0], [0], [1], [0, 0, 1, 1], [], []>} : vector<256x16xbf16>, vector<16x16xbf16>, vector<256x16xf32> -> vector<256x16xf32>
    %77 = arith.addf %70, %76 : vector<256x16xf32>
    %c0_71 = arith.constant 0 : index
    %c0_72 = arith.constant 0 : index
    %78 = vector.load %arg5[%c0_71, %c0_72] : memref<1x16xf32, #tpu.memory_space<vmem>>, vector<1x16xf32>
    %79 = vector.broadcast %78 : vector<1x16xf32> to vector<256x16xf32>
    %80 = arith.addf %77, %79 : vector<256x16xf32>
    %cst_73 = arith.constant 0.000000e+00 : f32
    %81 = vector.broadcast %cst_73 : f32 to vector<256x16xf32>
    %82 = arith.maximumf %80, %81 : vector<256x16xf32>
    %83 = arith.truncf %82 : vector<256x16xf32> to vector<256x16xbf16>
    %c0_74 = arith.constant 0 : index
    %c0_75 = arith.constant 0 : index
    %84 = vector.load %arg6[%c0_74, %c0_75] : memref<16x64xbf16, #tpu.memory_space<vmem>>, vector<16x64xbf16>
    %cst_76 = arith.constant dense<0.000000e+00> : vector<256x64xf32>
    %85 = tpu.matmul %83, %84, %cst_76 {dimension_numbers = #tpu.dot_dimension_numbers<[1], [0], [0], [1], [0, 0, 1, 1], [], []>} : vector<256x16xbf16>, vector<16x64xbf16>, vector<256x64xf32> -> vector<256x64xf32>
    %c0_77 = arith.constant 0 : index
    %c0_78 = arith.constant 0 : index
    %86 = vector.load %arg7[%c0_77, %c0_78] : memref<1x64xf32, #tpu.memory_space<vmem>>, vector<1x64xf32>
    %87 = vector.broadcast %86 : vector<1x64xf32> to vector<256x64xf32>
    %88 = arith.addf %85, %87 : vector<256x64xf32>
    %c0_79 = arith.constant 0 : index
    %c0_80 = arith.constant 0 : index
    %89 = vector.load %arg8[%c0_79, %c0_80] : memref<32x64xbf16, #tpu.memory_space<vmem>>, vector<32x64xbf16>
    %cst_81 = arith.constant dense<0.000000e+00> : vector<256x64xf32>
    %90 = tpu.matmul %2, %89, %cst_81 {dimension_numbers = #tpu.dot_dimension_numbers<[1], [0], [0], [1], [0, 0, 1, 1], [], []>} : vector<256x32xbf16>, vector<32x64xbf16>, vector<256x64xf32> -> vector<256x64xf32>
    %c0_82 = arith.constant 0 : index
    %c0_83 = arith.constant 0 : index
    %91 = vector.load %arg9[%c0_82, %c0_83] : memref<1x64xf32, #tpu.memory_space<vmem>>, vector<1x64xf32>
    %92 = vector.broadcast %91 : vector<1x64xf32> to vector<256x64xf32>
    %93 = arith.addf %90, %92 : vector<256x64xf32>
    %94 = arith.addf %88, %93 : vector<256x64xf32>
    %cst_84 = arith.constant 0.000000e+00 : f32
    %95 = vector.broadcast %cst_84 : f32 to vector<256x64xf32>
    %96 = arith.maximumf %94, %95 : vector<256x64xf32>
    %c0_85 = arith.constant 0 : index
    %c0_86 = arith.constant 0 : index
    %c0_87 = arith.constant 0 : index
    %97 = vector.load %arg10[%c0_85, %c0_86, %c0_87] : memref<1x256x64xf32, #tpu.memory_space<vmem>>, vector<1x256x64xf32>
    %98 = vector.shape_cast %97 : vector<1x256x64xf32> to vector<256x64xf32>
    %99 = vector.shape_cast %96 : vector<256x64xf32> to vector<1x256x64xf32>
    tpu.vector_store %arg10[%c0_85, %c0_86, %c0_87], %99 {strides = array<i32>} : memref<1x256x64xf32, #tpu.memory_space<vmem>>, vector<1x256x64xf32>,
    return
  }
  func.func @transform_0(%arg0: i32) -> (i32, i32, i32, i32) {
    %c0_i32 = arith.constant 0 : i32
    %c0_i32_0 = arith.constant 0 : i32
    %c0_i32_1 = arith.constant 0 : i32
    %c0_i32_2 = arith.constant 0 : i32
    return %arg0, %c0_i32, %c0_i32_0, %c0_i32_1 : i32, i32, i32, i32
  }
  func.func @transform_1(%arg0: i32) -> (i32, i32) {
    %c0_i32 = arith.constant 0 : i32
    %c0_i32_0 = arith.constant 0 : i32
    %c0_i32_1 = arith.constant 0 : i32
    return %c0_i32, %c0_i32_0 : i32, i32
  }
  func.func @transform_2(%arg0: i32) -> (i32, i32) {
    %c0_i32 = arith.constant 0 : i32
    %c0_i32_0 = arith.constant 0 : i32
    %c0_i32_1 = arith.constant 0 : i32
    return %c0_i32, %c0_i32_0 : i32, i32
  }
  func.func @transform_3(%arg0: i32) -> (i32, i32, i32) {
    %c0_i32 = arith.constant 0 : i32
    %c0_i32_0 = arith.constant 0 : i32
    %c0_i32_1 = arith.constant 0 : i32
    %c0_i32_2 = arith.constant 0 : i32
    return %c0_i32, %c0_i32_0, %c0_i32_1 : i32, i32, i32
  }
  func.func @transform_4(%arg0: i32) -> (i32, i32) {
    %c0_i32 = arith.constant 0 : i32
    %c0_i32_0 = arith.constant 0 : i32
    %c0_i32_1 = arith.constant 0 : i32
    return %c0_i32, %c0_i32_0 : i32, i32
  }
  func.func @transform_5(%arg0: i32) -> (i32, i32) {
    %c0_i32 = arith.constant 0 : i32
    %c0_i32_0 = arith.constant 0 : i32
    %c0_i32_1 = arith.constant 0 : i32
    return %c0_i32, %c0_i32_0 : i32, i32
  }
  func.func @transform_6(%arg0: i32) -> (i32, i32) {
    %c0_i32 = arith.constant 0 : i32
    %c0_i32_0 = arith.constant 0 : i32
    %c0_i32_1 = arith.constant 0 : i32
    return %c0_i32, %c0_i32_0 : i32, i32
  }
  func.func @transform_7(%arg0: i32) -> (i32, i32) {
    %c0_i32 = arith.constant 0 : i32
    %c0_i32_0 = arith.constant 0 : i32
    %c0_i32_1 = arith.constant 0 : i32
    return %c0_i32, %c0_i32_0 : i32, i32
  }
  func.func @transform_8(%arg0: i32) -> (i32, i32) {
    %c0_i32 = arith.constant 0 : i32
    %c0_i32_0 = arith.constant 0 : i32
    %c0_i32_1 = arith.constant 0 : i32
    return %c0_i32, %c0_i32_0 : i32, i32
  }
  func.func @transform_9(%arg0: i32) -> (i32, i32, i32) {
    %c0_i32 = arith.constant 0 : i32
    %c0_i32_0 = arith.constant 0 : i32
    %c0_i32_1 = arith.constant 0 : i32
    return %arg0, %c0_i32, %c0_i32_0 : i32, i32, i32
  }
}

</mosaic_0001>

<bundles_post_ra>
// kernel: tpu_custom_call.1
= control target key start
LH: loop header
LB: loop body
LE: loop exit
PB: predicated region body
PF: predicated region fallthrough
CT: control target
= control target key end

     0   :  { %s5098_s0 = inlined_call_operand.hbm [shape: bf16[2,16,16,32], index: 0, kind: input, shape index: {}]   ;;  %s5099_s1 = inlined_call_operand.vmem [shape: bf16[32,16], index: 1, kind: input, shape index: {}]   ;;  %s5100_s2 = inlined_call_operand.vmem [shape: f32[1,16], index: 2, kind: input, shape index: {}]   ;;  %s5101_s3 = inlined_call_operand.hbm [shape: bf16[9,16,16], index: 3, kind: input, shape index: {}]   ;;  %s5102_s4 = inlined_call_operand.vmem [shape: f32[1,16], index: 4, kind: input, shape index: {}]   ;;  %s5103_s5 = inlined_call_operand.vmem [shape: bf16[16,64], index: 5, kind: input, shape index: {}]   ;;  %s5104_s6 = inlined_call_operand.vmem [shape: f32[1,64], index: 6, kind: input, shape index: {}]   ;;  %s5105_s7 = inlined_call_operand.vmem [shape: bf16[32,64], index: 7, kind: input, shape index: {}]   ;;  %s5106_s8 = inlined_call_operand.vmem [shape: f32[1,64], index: 8, kind: input, shape index: {}]   ;;  %s5107_s9 = inlined_call_operand.vmem [shape: f32[2,256,64], index: 9, kind: output, shape index: {}]  }
   0x1   :  { %5113 = sst [smem:[#allocation37_spill]] %s5101_s3 }
   0x2   :  { %5114 = sst [smem:[#allocation38_spill]] %s5107_s9 }
   0x3   :  { %14 = vsyncpa [#allocation4], 0 }
   0x4   :  { %16 = vsyncpa [#allocation4 + $0x1], 0 }
   0x5   :  { %17 = vsyncpa [#allocation6], 0  ;;  %s3835_s30 = smov 0   ;;  %s3837_s10 = smov 0  }
   0x6   :  { %s3839_s11 = smov 0   ;;  %s3841_s12 = smov 0  }
   0x7 LB: > { %s3854_s13 = sadd.s32 4294967295, %s3779_s12   ;;  %p43_p0 = scmp.ne.s32.totalorder %s3771_s10, %s3767_s30  ;;  %s3779_s12 = sphi %s3841_s12, %s5199_s12   ;;  %s3775_s11 = sphi %s3839_s11, %s5198_s11   ;;  %s3771_s10 = sphi %s3837_s10, %s5197_s10   ;;  %s3767_s30 = sphi %s3835_s30, %s5196_s30  }
   0x8   : > { %p44_p1 = scmp.eq.s32.totalorder %s3854_s13, 0  ;;  %p3251_p2 = scmp.ge.s32.totalorder %s3779_s12, 1 }
   0x9   : > { %p248_p3 = scmp.lt.s32.totalorder %s3779_s12, 3  ;;  %s5116_s3 = sld [smem:[#allocation37_spill]] }
   0xa   : > { %p3862_p4 = por %p44_p1, %p43_p0  ;;  %s3781_s19 = smov [#allocation5]  }
   0xb   : > { %p3869_p5 = pnand %p3251_p2, %p248_p3  ;;  %s267_s20 = sshll.u32 %s3781_s19, 4  ;;  %s268_s20 = int_to_ptr.vmem [resolvable:$true] %s267_s20 }
   0xc   : > { %s3878_s21 = sadd.s32 1, %s3779_s12   ;;  %s3782_s22 = smov 64  }
   0xd   : > { %p3614_p6 = pneg %p3869_p5  ;;  %s3783_s23 = smov 4  }
   0xe   : > { %s27_s24 = ssub.s32 %s3779_s12, %s3878_s21  ;;  %s30_s25 = sadd.s32 1, %s3775_s11 }
   0xf   : > { %s265_s17 = sshll.u32 %s5116_s3, 4  ;;  %p3615_p7 = pnand %p3614_p6, %p44_p1  ;;  %s266_s17 = int_to_ptr.hbm [resolvable:$true] %s265_s17 }
  0x10   : > { %p28_p8 = scmp.eq.s32.totalorder %s27_s24, 0  ;;  %p37_p9 = scmp.ne.s32.totalorder %s3775_s11, %s3771_s10 }
  0x11   : > { %3617 = dma.hbm_to_vmem [thread:$0]  (!%p3615_p7), %s266_s17, 1152, %s268_s20, [#allocation6], %s3782_s22, %s3782_s22, %s3783_s23  }
  0x12   : > { %p38_p10 = scmp.eq.s32.totalorder %s3779_s12, 0  ;;  %p3623_p11 = scmp.lt.s32.totalorder %s3779_s12, 2 }
  0x13   : > { %s3891_s26 = scalar_select %p28_p8, %s3775_s11, %s30_s25  }
  0x14   : > { %p39_p12 = por %p38_p10, %p37_p9  ;;  %s296_s27 = sand.u32 1, %s3775_s11  }
  0x15   : > { %s3254_s28 = sshll.u32 %s296_s27, 7  ;;  %s3576_s29 = sshll.u32 %s3779_s12, 7 }
  0x16   : > { %s305_s16 = scalar_lea.hbm %s5098_s0, %s3576_s29  ;;  %s300_s19 = scalar_lea.vmem [#allocation3], %s3254_s28 }
  0x17   : > { %s308_s3 = sshll.u32 %s300_s19, 4  ;;  %s306_s9 = sshll.u32 %s305_s16, 4  ;;  %s309_s3 = int_to_ptr.vmem [resolvable:$true] %s308_s3  ;;  %s307_s9 = int_to_ptr.hbm [resolvable:$true] %s306_s9 }
  0x18   : > { %p3898_p13 = pnand %p3623_p11, %p39_p12  ;;  %s297_s20 = scalar_lea.sflag [#allocation4], %s296_s27 }
  0x19   : > { %s3711_s24 = sshra.s32 %s307_s9, 4  ;;  %s3718_s29 = scalar_lea.hbm %s5098_s0, 256  ;;  %s3712_s24 = int_to_ptr.hbm [resolvable:$true] %s3711_s24 }
  0x1a   : > { %s3713_s25 = scalar_lea.hbm %s3712_s24, 128  ;;  %p3715_p2 = pneg %p3898_p13 }
  0x1b   : > { %p3714_p0 = scmp.ne.s32.totalorder %s3712_s24, %s3713_s25  ;;  %p3719_p7 = scmp.lt.s32.totalorder %s3712_s24, %s5098_s0 }
  0x1c   : > { %p3720_p8 = scmp.lt.s32.totalorder %s3718_s29, %s3713_s25 }
  0x1d   : > { %p3716_p3 = pnand %p3715_p2, %p3714_p0 }
  0x1e   : > { %p3721_p9 = por %p3720_p8, %p3719_p7 }
  0x1f   : > { %p3717_p6 = pneg %p3716_p3 }
  0x21   : > { %p3722_p10 = pnand %p3721_p9, %p3717_p6 }
  0x23   : > { %3725 = shalt.err (!%p3722_p10)
}
  0x24   : > { %3621 = dma.hbm_to_vmem [thread:$0]  (!%p3898_p13), %s307_s9, 2048, %s309_s3, %s297_s20, %s3782_s22, %s3782_s22, %s3783_s23  }
  0x25   : > { %320 = sbr.rel (%p3869_p5) target bundleno = 1236 (0x4d4), region = 56 }
  0x2a   : > { %s322_s27 = sand.u32 1, %s3771_s10  }
  0x2b   : > { %s3258_s16 = sshll.u32 %s322_s27, 7  ;;  %s323_s19 = scalar_lea.sflag [#allocation4], %s322_s27 }
  0x2c   : > { %s3918_s12 = scalar_lea.vmem [#allocation3], %s3258_s16 }
  0x2d   : > { %3758 = dma.done.wait (%p3862_p4), %s323_s19, 2048  }
  0x2e   : > { %3760 = vsyncadd (%p3862_p4), %s323_s19, 4294965248 }
  0x2f   : > { %3762 = dma.done.wait (%p44_p1), [#allocation6], 1152  }
  0x30   : > { %3764 = vsyncadd (%p44_p1), [#allocation6], 4294966144  ;;  %v3595_v0 = vld [vmem:[%s5099_s1 + $0x8] sm:$0xff]  ;;  %v3594_v1 = vld [vmem:[%s5099_s1] sm:$0xff]  ;;  %vm505_vm0 = vcmask 261120   ;;  %vm675_vm1 = vcmask 130048  }
  0x31   : > { %560 = vmatpush.bf16.msra.mxu0 %v3595_v0  ;;  %v3578_v2 = vld [vmem:[%s3918_s12] sm:$0xff]  ;;  %v3579_v3 = vld [vmem:[%s3918_s12 + $0x8] sm:$0xff]  ;;  %v3580_v4 = vld [vmem:[%s3918_s12 + $0x10] sm:$0xff]  ;;  %v3784_v10 = vmov 0.0   ;;  %vm678_vm2 = vcmask 123904   ;;  %p367_p1 = scmp.lt.s32.totalorder %s3854_s13, 1 }
  0x32   : > { %v3581_v5 = vld [vmem:[%s3918_s12 + $0x18] sm:$0xff]  ;;  %v3582_v6 = vld [vmem:[%s3918_s12 + $0x20] sm:$0xff]  ;;  %v3583_v7 = vld [vmem:[%s3918_s12 + $0x28] sm:$0xff]  ;;  %676 = vst.msk [vmem:[#allocation2] sm:$0xff] %vm675_vm1, %v3784_v10  ;;  %s5180_s14 = sld [smem:[#allocation38_spill]]  ;;  %vm3140_vm3 = vcmask 523264  }
  0x33   : > { %v3596_v8 = vld [vmem:[#allocation5] sm:$0xff]  ;;  %v3598_v9 = vld [vmem:[#allocation5 + $0x10] sm:$0xff]  ;;  %677 = vst.msk [vmem:[#allocation2 + $0x8] sm:$0xff] %vm675_vm1, %v3784_v10  ;;  %v3597_v15 = vld [vmem:[#allocation5 + $0x8] sm:$0xff]  ;;  %s5201_s13 = smov (!%p367_p1, %s3854_s13), 1 }
  0x34   : > { %1069 = vmatpush.bf16.msra.mxu2 %v3596_v8  ;;  %1263 = vmatpush.bf16.msra.mxu3 %v3598_v9  ;;  %680 = vst.msk [vmem:[#allocation2 + $0x18] sm:$0xff] %vm675_vm1, %v3784_v10  ;;  %v3584_v14 = vld [vmem:[%s3918_s12 + $0x30] sm:$0xff]  ;;  %v3600_v16 = vld [vmem:[#allocation5 + $0x20] sm:$0xff]  ;;  %v3599_v17 = vld [vmem:[#allocation5 + $0x18] sm:$0xff]  ;;  %s3577_s9 = sshll.u32 %s5201_s13, 8 }
  0x35   : > { %561 = vmatpush.bf16.msra.mxu0 %v3594_v1  ;;  %681 = vst.msk [vmem:[#allocation2 + $0x20] sm:$0xff] %vm675_vm1, %v3784_v10  ;;  %926 = vmatpush.bf16.msra.mxu1 %v3597_v15  ;;  %v3585_v18 = vld [vmem:[%s3918_s12 + $0x38] sm:$0xff]  ;;  %v4040_v21 = vld [vmem:[%s5100_s2] ss:$0 sm:$0xff]  ;;  %v3586_v25 = vld [vmem:[%s3918_s12 + $0x40] sm:$0xff] }
  0x36   : > { %683 = vst.msk [vmem:[#allocation2 + $0x30] sm:$0xff] %vm675_vm1, %v3784_v10  ;;  %v3587_v33 = vld [vmem:[%s3918_s12 + $0x48] sm:$0xff]  ;;  %v3588_v49 = vld [vmem:[%s3918_s12 + $0x50] sm:$0xff]  ;;  %v3589_v1 = vld [vmem:[%s3918_s12 + $0x58] sm:$0xff] }
  0x37   : > { %684 = vst.msk [vmem:[#allocation2 + $0x38] sm:$0xff] %vm675_vm1, %v3784_v10 }
  0x38   : > { %3334 = vmatmul.msk.bf16.vlgmr.msra.gmra.mxu0 %vm505_vm0, %v3578_v2  ;;  %686 = vst.msk [vmem:[#allocation2 + $0x48] sm:$0xff] %vm675_vm1, %v3784_v10  ;;  %1715 = vmatpush.bf16.msrb.mxu2 %v3600_v16  ;;  %s4873_s23 = scalar_lea.vmem %s5180_s14, %s3577_s9 }
  0x39   : > { %v764_v11 = vld [vmem:[#allocation2] sm:$0xff]  ;;  %687 = vst.msk [vmem:[#allocation2 + $0x50] sm:$0xff] %vm675_vm1, %v3784_v10  ;;  %1489 = vmatpush.bf16.msrb.mxu1 %v3599_v17  ;;  %v3590_v17 = vld [vmem:[%s3918_s12 + $0x60] sm:$0xff] }
  0x3a   : > { %v765_v12 = vld [vmem:[#allocation2 + $0x8] sm:$0xff]  ;;  %689 = vst.msk [vmem:[#allocation2 + $0x60] sm:$0xff] %vm675_vm1, %v3784_v10 }
  0x3b   : > { %v796_v13 = vpack.c.bf16 %v765_v12, %v764_v11  ;;  %690 = vst.msk [vmem:[#allocation2 + $0x68] sm:$0xff] %vm675_vm1, %v3784_v10  ;;  %v1151_v19 = vld [vmem:[#allocation2 + $0x2] sm:$0xff] }
  0x3c   : > { %692 = vst.msk [vmem:[#allocation2 + $0x78] sm:$0xff] %vm675_vm1, %v3784_v10  ;;  %v814_v20 = vld [vmem:[#allocation2 + $0x1] sm:$0xff] }
  0x3d   : > { %3374 = vmatmul.msk.bf16.vlgmr.msra.gmra.mxu2 %vm675_vm1, %v796_v13  ;;  %693 = vst.msk [vmem:[#allocation2 + $0x80] sm:$0xff] %vm675_vm1, %v3784_v10 }
  0x3e   : > { %695 = vst.msk [vmem:[#allocation2 + $0x90] sm:$0xff] %vm675_vm1, %v3784_v10 }
  0x3f   : > { %696 = vst.msk [vmem:[#allocation2 + $0x98] sm:$0xff] %vm675_vm1, %v3784_v10 }
  0x40   : > { %698 = vst.msk [vmem:[#allocation2 + $0xa8] sm:$0xff] %vm675_vm1, %v3784_v10 }
  0x41   : > { %699 = vst.msk [vmem:[#allocation2 + $0xb0] sm:$0xff] %vm675_vm1, %v3784_v10 }
  0x42   : > { %701 = vst.msk [vmem:[#allocation2 + $0xc0] sm:$0xff] %vm675_vm1, %v3784_v10 }
  0x43   : > { %702 = vst.msk [vmem:[#allocation2 + $0xc8] sm:$0xff] %vm675_vm1, %v3784_v10 }
  0x44   : > { %704 = vst.msk [vmem:[#allocation2 + $0xd8] sm:$0xff] %vm675_vm1, %v3784_v10 }
  0x45   : > { %705 = vst.msk [vmem:[#allocation2 + $0xe0] sm:$0xff] %vm675_vm1, %v3784_v10 }
  0x46   : > { %707 = vst.msk [vmem:[#allocation2 + $0xf0] sm:$0xff] %vm675_vm1, %v3784_v10 }
  0x47   : > { %708 = vst.msk [vmem:[#allocation2 + $0xf8] sm:$0xff] %vm675_vm1, %v3784_v10 }
  0x48   : > { %3335 = vmatmul.msk.bf16.gmra.mxu0 %vm505_vm0, %v3579_v3  ;;  %710 = vst.msk [vmem:[#allocation2 + $0x108] sm:$0xff] %vm675_vm1, %v3784_v10 }
  0x49   : > { %711 = vst.msk [vmem:[#allocation2 + $0x110] sm:$0xff] %vm675_vm1, %v3784_v10 }
  0x4a   : > { %713 = vst.msk [vmem:[#allocation2 + $0x120] sm:$0xff] %vm675_vm1, %v3784_v10 }
  0x4b   : > { %714 = vst.msk [vmem:[#allocation2 + $0x128] sm:$0xff] %vm675_vm1, %v3784_v10 }
  0x4c   : > { %716 = vst.msk [vmem:[#allocation2 + $0x138] sm:$0xff] %vm675_vm1, %v3784_v10 }
  0x4d   : > { %717 = vst.msk [vmem:[#allocation2 + $0x140] sm:$0xff] %vm675_vm1, %v3784_v10 }
  0x4e   : > { %719 = vst.msk [vmem:[#allocation2 + $0x150] sm:$0xff] %vm675_vm1, %v3784_v10 }
  0x4f   : > { %720 = vst.msk [vmem:[#allocation2 + $0x158] sm:$0xff] %vm675_vm1, %v3784_v10 }
  0x50   : > { %722 = vst.msk [vmem:[#allocation2 + $0x168] sm:$0xff] %vm675_vm1, %v3784_v10 }
  0x51   : > { %723 = vst.msk [vmem:[#allocation2 + $0x170] sm:$0xff] %vm675_vm1, %v3784_v10 }
  0x52   : > { %725 = vst.msk [vmem:[#allocation2 + $0x180] sm:$0xff] %vm675_vm1, %v3784_v10 }
  0x53   : > { %726 = vst.msk [vmem:[#allocation2 + $0x188] sm:$0xff] %vm675_vm1, %v3784_v10 }
  0x54   : > { %728 = vst.msk [vmem:[#allocation2 + $0x198] sm:$0xff] %vm675_vm1, %v3784_v10 }
  0x55   : > { %729 = vst.msk [vmem:[#allocation2 + $0x1a0] sm:$0xff] %vm675_vm1, %v3784_v10 }
  0x56   : > { %679 = vst.msk [vmem:[#allocation2 + $0x10] sm:$0x3] %vm678_vm2, %v3784_v10 }
  0x57   : > { %682 = vst.msk [vmem:[#allocation2 + $0x28] sm:$0x3] %vm678_vm2, %v3784_v10 }
  0x58   : > { %3336 = vmatmul.msk.bf16.gmra.mxu0 %vm505_vm0, %v3580_v4  ;;  %685 = vst.msk [vmem:[#allocation2 + $0x40] sm:$0x3] %vm678_vm2, %v3784_v10 }
  0x59   : > { %688 = vst.msk [vmem:[#allocation2 + $0x58] sm:$0x3] %vm678_vm2, %v3784_v10 }
  0x5a   : > { %691 = vst.msk [vmem:[#allocation2 + $0x70] sm:$0x3] %vm678_vm2, %v3784_v10 }
  0x5b   : > { %694 = vst.msk [vmem:[#allocation2 + $0x88] sm:$0x3] %vm678_vm2, %v3784_v10 }
  0x5c   : > { %697 = vst.msk [vmem:[#allocation2 + $0xa0] sm:$0x3] %vm678_vm2, %v3784_v10 }
  0x5d   : > { %v1152_v22 = vld [vmem:[#allocation2 + $0xa] sm:$0xff]  ;;  %700 = vst.msk [vmem:[#allocation2 + $0xb8] sm:$0x3] %vm678_vm2, %v3784_v10 }
  0x5e   : > { %v815_v23 = vld [vmem:[#allocation2 + $0x9] sm:$0xff]  ;;  %v1183_v24 = vpack.c.bf16 %v1152_v22, %v1151_v19  ;;  %703 = vst.msk [vmem:[#allocation2 + $0xd0] sm:$0x3] %vm678_vm2, %v3784_v10 }
  0x5f   : > { %v846_v26 = vpack.c.bf16 %v815_v23, %v814_v20  ;;  %706 = vst.msk [vmem:[#allocation2 + $0xe8] sm:$0x3] %vm678_vm2, %v3784_v10 }
  0x60   : > { %3394 = vmatmul.msk.bf16.vlgmr.msra.gmra.mxu3 %vm675_vm1, %v1183_v24  ;;  %709 = vst.msk [vmem:[#allocation2 + $0x100] sm:$0x3] %vm678_vm2, %v3784_v10 }
  0x61   : > { %3354 = vmatmul.msk.bf16.vlgmr.msra.gmra.mxu1 %vm675_vm1, %v846_v26  ;;  %712 = vst.msk [vmem:[#allocation2 + $0x118] sm:$0x3] %vm678_vm2, %v3784_v10 }
  0x62   : > { %715 = vst.msk [vmem:[#allocation2 + $0x130] sm:$0x3] %vm678_vm2, %v3784_v10 }
  0x63   : > { %718 = vst.msk [vmem:[#allocation2 + $0x148] sm:$0x3] %vm678_vm2, %v3784_v10 }
  0x64   : > { %721 = vst.msk [vmem:[#allocation2 + $0x160] sm:$0x3] %vm678_vm2, %v3784_v10 }
  0x65   : > { %724 = vst.msk [vmem:[#allocation2 + $0x178] sm:$0x3] %vm678_vm2, %v3784_v10 }
  0x66   : > { %727 = vst.msk [vmem:[#allocation2 + $0x190] sm:$0x3] %vm678_vm2, %v3784_v10 }
  0x67   : > { %730 = vst.msk [vmem:[#allocation2 + $0x1a8] sm:$0x3] %vm678_vm2, %v3784_v10 }
  0x68   : > { %3337 = vmatmul.msk.bf16.gmra.mxu0 %vm505_vm0, %v3581_v5 }
  0x78   : > { %3338 = vmatmul.msk.bf16.gmra.mxu0 %vm505_vm0, %v3582_v6 }
  0x88   : > { %3339 = vmatmul.msk.bf16.gmra.mxu0 %vm505_vm0, %v3583_v7 }
  0x98   : > { %3340 = vmatmul.msk.bf16.gmra.mxu0 %vm505_vm0, %v3584_v14 }
  0xa8   : > { %3341 = vmatmul.msk.bf16.gmra.mxu0 %vm505_vm0, %v3585_v18 }
  0xb5   : > { %v563_v27 = vpop.f32.mrf.mxu0 }
  0xb6   : > { %v564_v28 = vadd.f32 %v4040_v21, %v563_v27 }
  0xb8   : > { %3342 = vmatmul.msk.bf16.gmra.mxu0 %vm505_vm0, %v3586_v25  ;;  %v643_v29 = vmax.f32 %v564_v28, 0.0 }
  0xba   : > { %732 = vst.msk [vmem:[#allocation2 + $0x19] sm:$0xff] %vm675_vm1, %v643_v29 }
  0xbd   : > { %v565_v30 = vpop.f32.mrf.mxu0 }
  0xbe   : > { %v566_v31 = vadd.f32 %v4040_v21, %v565_v30 }
  0xc0   : > { %v644_v32 = vmax.f32 %v566_v31, 0.0 }
  0xc1   : > { %v816_v37 = vld [vmem:[#allocation2 + $0x19] sm:$0xff] }
  0xc2   : > { %733 = vst.msk [vmem:[#allocation2 + $0x21] sm:$0xff] %vm675_vm1, %v644_v32  ;;  %v766_v38 = vld [vmem:[#allocation2 + $0x18] sm:$0xff] }
  0xc5   : > { %v568_v34 = vpop.f32.mrf.mxu0 }
  0xc6   : > { %v569_v35 = vadd.f32 %v4040_v21, %v568_v34  ;;  %v3591_v34 = vld [vmem:[%s3918_s12 + $0x68] sm:$0xff] }
  0xc8   : > { %v645_v36 = vmax.f32 %v569_v35, 0.0  ;;  %3343 = vmatmul.msk.bf16.gmra.mxu0 %vm505_vm0, %v3587_v33 }
  0xc9   : > { %v817_v39 = vld [vmem:[#allocation2 + $0x21] sm:$0xff] }
  0xca   : > { %v767_v40 = vld [vmem:[#allocation2 + $0x20] sm:$0xff]  ;;  %734 = vst.msk [vmem:[#allocation2 + $0x31] sm:$0xff] %vm675_vm1, %v645_v36  ;;  %v4076_v42 = vpack.c.bf16 %v817_v39, %v816_v37 }
  0xcb   : > { %v1153_v41 = vld [vmem:[#allocation2 + $0x1a] sm:$0xff]  ;;  %v4078_v43 = vpack.c.bf16 %v767_v40, %v766_v38  ;;  %v1154_v44 = vld [vmem:[#allocation2 + $0x22] sm:$0xff] }
  0xcc   : > { %v4080_v45 = vpack.c.bf16 %v1154_v44, %v1153_v41  ;;  %3355 = vmatmul.msk.bf16.gmra.mxu1 %vm675_vm1, %v4076_v42 }
  0xcd   : > { %3375 = vmatmul.msk.bf16.gmra.mxu2 %vm675_vm1, %v4078_v43  ;;  %v570_v46 = vpop.f32.mrf.mxu0 }
  0xce   : > { %3395 = vmatmul.msk.bf16.gmra.mxu3 %vm675_vm1, %v4080_v45  ;;  %v571_v47 = vadd.f32 %v4040_v21, %v570_v46 }
  0xd0   : > { %v646_v48 = vmax.f32 %v571_v47, 0.0 }
  0xd1   : > { %v818_v53 = vld [vmem:[#allocation2 + $0x31] sm:$0xff] }
  0xd2   : > { %735 = vst.msk [vmem:[#allocation2 + $0x39] sm:$0xff] %vm675_vm1, %v646_v48  ;;  %v768_v54 = vld [vmem:[#allocation2 + $0x30] sm:$0xff] }
  0xd5   : > { %v573_v50 = vpop.f32.mrf.mxu0 }
  0xd6   : > { %v574_v51 = vadd.f32 %v4040_v21, %v573_v50 }
  0xd8   : > { %v647_v52 = vmax.f32 %v574_v51, 0.0  ;;  %3344 = vmatmul.msk.bf16.gmra.mxu0 %vm505_vm0, %v3588_v49 }
  0xd9   : > { %v819_v55 = vld [vmem:[#allocation2 + $0x39] sm:$0xff] }
  0xda   : > { %v769_v56 = vld [vmem:[#allocation2 + $0x38] sm:$0xff]  ;;  %736 = vst.msk [vmem:[#allocation2 + $0x49] sm:$0xff] %vm675_vm1, %v647_v52  ;;  %v4094_v58 = vpack.c.bf16 %v819_v55, %v818_v53  ;;  %v3592_v53 = vld [vmem:[%s3918_s12 + $0x70] sm:$0xff] }
  0xdb   : > { %v1155_v57 = vld [vmem:[#allocation2 + $0x32] sm:$0xff]  ;;  %v4096_v59 = vpack.c.bf16 %v769_v56, %v768_v54  ;;  %v1156_v60 = vld [vmem:[#allocation2 + $0x3a] sm:$0xff] }
  0xdc   : > { %v4098_v61 = vpack.c.bf16 %v1156_v60, %v1155_v57  ;;  %3356 = vmatmul.msk.bf16.gmra.mxu1 %vm675_vm1, %v4094_v58  ;;  %v3602_v56 = vld [vmem:[#allocation5 + $0x30] sm:$0xff] }
  0xdd   : > { %3376 = vmatmul.msk.bf16.gmra.mxu2 %vm675_vm1, %v4096_v59  ;;  %v575_v62 = vpop.f32.mrf.mxu0  ;;  %2168 = vmatpush.bf16.msrb.mxu0 %v3602_v56 }
  0xde   : > { %3396 = vmatmul.msk.bf16.gmra.mxu3 %vm675_vm1, %v4098_v61  ;;  %v576_v63 = vadd.f32 %v4040_v21, %v575_v62 }
  0xe0   : > { %v648_v0 = vmax.f32 %v576_v63, 0.0 }
  0xe1   : > { %v820_v5 = vld [vmem:[#allocation2 + $0x49] sm:$0xff] }
  0xe2   : > { %737 = vst.msk [vmem:[#allocation2 + $0x51] sm:$0xff] %vm675_vm1, %v648_v0  ;;  %v770_v6 = vld [vmem:[#allocation2 + $0x48] sm:$0xff] }
  0xe5   : > { %v578_v2 = vpop.f32.mrf.mxu0 }
  0xe6   : > { %v579_v3 = vadd.f32 %v4040_v21, %v578_v2 }
  0xe8   : > { %v649_v4 = vmax.f32 %v579_v3, 0.0  ;;  %3345 = vmatmul.msk.bf16.gmra.mxu0 %vm505_vm0, %v3589_v1 }
  0xe9   : > { %v821_v7 = vld [vmem:[#allocation2 + $0x51] sm:$0xff] }
  0xea   : > { %v771_v8 = vld [vmem:[#allocation2 + $0x50] sm:$0xff]  ;;  %738 = vst.msk [vmem:[#allocation2 + $0x61] sm:$0xff] %vm675_vm1, %v649_v4  ;;  %v4112_v10 = vpack.c.bf16 %v821_v7, %v820_v5 }
  0xeb   : > { %v1157_v9 = vld [vmem:[#allocation2 + $0x4a] sm:$0xff]  ;;  %v4114_v11 = vpack.c.bf16 %v771_v8, %v770_v6  ;;  %v1158_v12 = vld [vmem:[#allocation2 + $0x52] sm:$0xff] }
  0xec   : > { %v4116_v13 = vpack.c.bf16 %v1158_v12, %v1157_v9  ;;  %3357 = vmatmul.msk.bf16.gmra.mxu1 %vm675_vm1, %v4112_v10  ;;  %v3593_v9 = vld [vmem:[%s3918_s12 + $0x78] sm:$0xff] }
  0xed   : > { %3377 = vmatmul.msk.bf16.gmra.mxu2 %vm675_vm1, %v4114_v11  ;;  %v580_v14 = vpop.f32.mrf.mxu0 }
  0xee   : > { %3397 = vmatmul.msk.bf16.gmra.mxu3 %vm675_vm1, %v4116_v13  ;;  %v581_v15 = vadd.f32 %v4040_v21, %v580_v14 }
  0xf0   : > { %v650_v16 = vmax.f32 %v581_v15, 0.0 }
  0xf1   : > { %v822_v22 = vld [vmem:[#allocation2 + $0x61] sm:$0xff] }
  0xf2   : > { %739 = vst.msk [vmem:[#allocation2 + $0x69] sm:$0xff] %vm675_vm1, %v650_v16  ;;  %v772_v23 = vld [vmem:[#allocation2 + $0x60] sm:$0xff] }
  0xf5   : > { %v583_v18 = vpop.f32.mrf.mxu0 }
  0xf6   : > { %v584_v19 = vadd.f32 %v4040_v21, %v583_v18 }
  0xf8   : > { %v651_v20 = vmax.f32 %v584_v19, 0.0  ;;  %3346 = vmatmul.msk.bf16.gmra.mxu0 %vm505_vm0, %v3590_v17 }
  0xf9   : > { %v823_v24 = vld [vmem:[#allocation2 + $0x69] sm:$0xff] }
  0xfa   : > { %v773_v25 = vld [vmem:[#allocation2 + $0x68] sm:$0xff]  ;;  %740 = vst.msk [vmem:[#allocation2 + $0x79] sm:$0xff] %vm675_vm1, %v651_v20  ;;  %v4130_v27 = vpack.c.bf16 %v823_v24, %v822_v22 }
  0xfb   : > { %v1159_v26 = vld [vmem:[#allocation2 + $0x62] sm:$0xff]  ;;  %v4132_v28 = vpack.c.bf16 %v773_v25, %v772_v23  ;;  %v1160_v29 = vld [vmem:[#allocation2 + $0x6a] sm:$0xff] }
  0xfc   : > { %v4134_v30 = vpack.c.bf16 %v1160_v29, %v1159_v26  ;;  %3358 = vmatmul.msk.bf16.gmra.mxu1 %vm675_vm1, %v4130_v27 }
  0xfd   : > { %3378 = vmatmul.msk.bf16.gmra.mxu2 %vm675_vm1, %v4132_v28  ;;  %v585_v31 = vpop.f32.mrf.mxu0 }
  0xfe   : > { %3398 = vmatmul.msk.bf16.gmra.mxu3 %vm675_vm1, %v4134_v30  ;;  %v586_v32 = vadd.f32 %v4040_v21, %v585_v31  ;;  %v1071_v31 = vpop.f32.mrf.mxu2 }
 0x100   : > { %v652_v33 = vmax.f32 %v586_v32, 0.0 }
 0x101   : > { %v824_v38 = vld [vmem:[#allocation2 + $0x79] sm:$0xff] }
 0x102   : > { %741 = vst.msk [vmem:[#allocation2 + $0x81] sm:$0xff] %vm675_vm1, %v652_v33  ;;  %v774_v39 = vld [vmem:[#allocation2 + $0x78] sm:$0xff] }
 0x103   : > { %v3601_v33 = vld [vmem:[#allocation5 + $0x28] sm:$0xff] }
 0x104   : > { %1941 = vmatpush.bf16.msrb.mxu3 %v3601_v33 }
 0x105   : > { %v588_v35 = vpop.f32.mrf.mxu0 }
 0x106   : > { %v589_v36 = vadd.f32 %v4040_v21, %v588_v35 }
 0x108   : > { %v653_v37 = vmax.f32 %v589_v36, 0.0  ;;  %3347 = vmatmul.msk.bf16.gmra.mxu0 %vm505_vm0, %v3591_v34  ;;  %v928_v34 = vpop.f32.mrf.mxu1 }
 0x109   : > { %v825_v40 = vld [vmem:[#allocation2 + $0x81] sm:$0xff]  ;;  %v1072_v35 = vadd.f32 %v1071_v31, %v928_v34 }
 0x10a   : > { %v775_v41 = vld [vmem:[#allocation2 + $0x80] sm:$0xff]  ;;  %742 = vst.msk [vmem:[#allocation2 + $0x91] sm:$0xff] %vm675_vm1, %v653_v37  ;;  %v4148_v46 = vpack.c.bf16 %v825_v40, %v824_v38 }
 0x10b   : > { %v1161_v44 = vld [vmem:[#allocation2 + $0x7a] sm:$0xff]  ;;  %v4150_v47 = vpack.c.bf16 %v775_v41, %v774_v39  ;;  %v1162_v48 = vld [vmem:[#allocation2 + $0x82] sm:$0xff]  ;;  %v1265_v41 = vpop.f32.mrf.mxu3 }
 0x10c   : > { %v4152_v49 = vpack.c.bf16 %v1162_v48, %v1161_v44  ;;  %3359 = vmatmul.msk.bf16.gmra.mxu1 %vm675_vm1, %v4148_v46 }
 0x10d   : > { %3379 = vmatmul.msk.bf16.gmra.mxu2 %vm675_vm1, %v4150_v47  ;;  %v590_v50 = vpop.f32.mrf.mxu0 }
 0x10e   : > { %3399 = vmatmul.msk.bf16.gmra.mxu3 %vm675_vm1, %v4152_v49  ;;  %v591_v51 = vadd.f32 %v4040_v21, %v590_v50 }
 0x110   : > { %v654_v52 = vmax.f32 %v591_v51, 0.0  ;;  %v1073_v51 = vpop.f32.mrf.mxu2 }
 0x111   : > { %v826_v60 = vld [vmem:[#allocation2 + $0x91] sm:$0xff] }
 0x112   : > { %743 = vst.msk [vmem:[#allocation2 + $0x99] sm:$0xff] %vm675_vm1, %v654_v52  ;;  %v776_v62 = vld [vmem:[#allocation2 + $0x90] sm:$0xff]  ;;  %v4202_v52 = vadd.f32 %v1265_v41, %v1072_v35 }
 0x115   : > { %v593_v54 = vpop.f32.mrf.mxu0 }
 0x116   : > { %v594_v55 = vadd.f32 %v4040_v21, %v593_v54 }
 0x118   : > { %v655_v57 = vmax.f32 %v594_v55, 0.0  ;;  %3348 = vmatmul.msk.bf16.gmra.mxu0 %vm505_vm0, %v3592_v53 }
 0x119   : > { %v827_v63 = vld [vmem:[#allocation2 + $0x99] sm:$0xff] }
 0x11a   : > { %v777_v0 = vld [vmem:[#allocation2 + $0x98] sm:$0xff]  ;;  %744 = vst.msk [vmem:[#allocation2 + $0xa9] sm:$0xff] %vm675_vm1, %v655_v57  ;;  %v4166_v2 = vpack.c.bf16 %v827_v63, %v826_v60  ;;  %v930_v57 = vpop.f32.mrf.mxu1 }
 0x11b   : > { %v1163_v1 = vld [vmem:[#allocation2 + $0x92] sm:$0xff]  ;;  %v4168_v3 = vpack.c.bf16 %v777_v0, %v776_v62  ;;  %v1164_v4 = vld [vmem:[#allocation2 + $0x9a] sm:$0xff]  ;;  %v1074_v60 = vadd.f32 %v1073_v51, %v930_v57 }
 0x11c   : > { %v4170_v5 = vpack.c.bf16 %v1164_v4, %v1163_v1  ;;  %3360 = vmatmul.msk.bf16.gmra.mxu1 %vm675_vm1, %v4166_v2  ;;  %v1267_v1 = vpop.f32.mrf.mxu3 }
 0x11d   : > { %3380 = vmatmul.msk.bf16.gmra.mxu2 %vm675_vm1, %v4168_v3  ;;  %v595_v6 = vpop.f32.mrf.mxu0  ;;  %v4218_v4 = vadd.f32 %v1267_v1, %v1074_v60 }
 0x11e   : > { %3400 = vmatmul.msk.bf16.gmra.mxu3 %vm675_vm1, %v4170_v5  ;;  %v596_v7 = vadd.f32 %v4040_v21, %v595_v6 }
 0x120   : > { %v656_v8 = vmax.f32 %v596_v7, 0.0 }
 0x121   : > { %v828_v16 = vld [vmem:[#allocation2 + $0xa9] sm:$0xff] }
 0x122   : > { %745 = vst.msk [vmem:[#allocation2 + $0xb1] sm:$0xff] %vm675_vm1, %v656_v8  ;;  %v778_v17 = vld [vmem:[#allocation2 + $0xa8] sm:$0xff] }
 0x125   : > { %v598_v12 = vpop.f32.mrf.mxu0 }
 0x126   : > { %v599_v14 = vadd.f32 %v4040_v21, %v598_v12 }
 0x128   : > { %v657_v15 = vmax.f32 %v599_v14, 0.0  ;;  %3349 = vmatmul.msk.bf16.gmra.mxu0 %vm505_vm0, %v3593_v9 }
 0x129   : > { %v829_v18 = vld [vmem:[#allocation2 + $0xb1] sm:$0xff] }
 0x12a   : > { %v779_v19 = vld [vmem:[#allocation2 + $0xb0] sm:$0xff]  ;;  %746 = vst.msk [vmem:[#allocation2 + $0xc1] sm:$0xff] %vm675_vm1, %v657_v15  ;;  %v4184_v22 = vpack.c.bf16 %v829_v18, %v828_v16 }
 0x12b   : > { %v1165_v20 = vld [vmem:[#allocation2 + $0xaa] sm:$0xff]  ;;  %v4186_v23 = vpack.c.bf16 %v779_v19, %v778_v17  ;;  %v1166_v24 = vld [vmem:[#allocation2 + $0xb2] sm:$0xff] }
 0x12c   : > { %v4188_v25 = vpack.c.bf16 %v1166_v24, %v1165_v20  ;;  %3361 = vmatmul.msk.bf16.gmra.mxu1 %vm675_vm1, %v4184_v22 }
 0x12d   : > { %3381 = vmatmul.msk.bf16.gmra.mxu2 %vm675_vm1, %v4186_v23  ;;  %v600_v26 = vpop.f32.mrf.mxu0 }
 0x12e   : > { %3401 = vmatmul.msk.bf16.gmra.mxu3 %vm675_vm1, %v4188_v25  ;;  %v601_v29 = vadd.f32 %v4040_v21, %v600_v26 }
 0x130   : > { %v658_v32 = vmax.f32 %v601_v29, 0.0 }
 0x131   : > { %v830_v39 = vld [vmem:[#allocation2 + $0xc1] sm:$0xff] }
 0x132   : > { %747 = vst.msk [vmem:[#allocation2 + $0xc9] sm:$0xff] %vm675_vm1, %v658_v32  ;;  %v780_v40 = vld [vmem:[#allocation2 + $0xc0] sm:$0xff] }
 0x135   : > { %v603_v36 = vpop.f32.mrf.mxu0 }
 0x136   : > { %v604_v37 = vadd.f32 %v4040_v21, %v603_v36 }
 0x138   : > { %v659_v38 = vmax.f32 %v604_v37, 0.0  ;;  %3474 = vmatmul.msk.bf16.vlgmr.msrb.gmra.mxu0 %vm675_vm1, %v4096_v59 }
 0x139   : > { %v831_v44 = vld [vmem:[#allocation2 + $0xc9] sm:$0xff] }
 0x13a   : > { %v781_v48 = vld [vmem:[#allocation2 + $0xc8] sm:$0xff]  ;;  %748 = vst.msk [vmem:[#allocation2 + $0xd9] sm:$0xff] %vm675_vm1, %v659_v38  ;;  %v4204_v53 = vpack.c.bf16 %v831_v44, %v830_v39 }
 0x13b   : > { %v1167_v50 = vld [vmem:[#allocation2 + $0xc2] sm:$0xff]  ;;  %v4206_v54 = vpack.c.bf16 %v781_v48, %v780_v40  ;;  %v1168_v55 = vld [vmem:[#allocation2 + $0xca] sm:$0xff] }
 0x13c   : > { %v4208_v56 = vpack.c.bf16 %v1168_v55, %v1167_v50  ;;  %3362 = vmatmul.msk.bf16.gmra.mxu1 %vm675_vm1, %v4204_v53 }
 0x13d   : > { %3382 = vmatmul.msk.bf16.gmra.mxu2 %vm675_vm1, %v4206_v54  ;;  %v605_v62 = vpop.f32.mrf.mxu0 }
 0x13e   : > { %3402 = vmatmul.msk.bf16.gmra.mxu3 %vm675_vm1, %v4208_v56  ;;  %v606_v63 = vadd.f32 %v4040_v21, %v605_v62 }
 0x140   : > { %v660_v0 = vmax.f32 %v606_v63, 0.0 }
 0x141   : > { %v832_v9 = vld [vmem:[#allocation2 + $0xd9] sm:$0xff] }
 0x142   : > { %749 = vst.msk [vmem:[#allocation2 + $0xe1] sm:$0xff] %vm675_vm1, %v660_v0  ;;  %v782_v12 = vld [vmem:[#allocation2 + $0xd8] sm:$0xff] }
 0x145   : > { %v608_v6 = vpop.f32.mrf.mxu0 }
 0x146   : > { %v609_v7 = vadd.f32 %v4040_v21, %v608_v6 }
 0x148   : > { %v661_v8 = vmax.f32 %v609_v7, 0.0  ;;  %3475 = vmatmul.msk.bf16.gmra.mxu0 %vm675_vm1, %v4114_v11 }
 0x149   : > { %v933_v14 = vpop.f32.mrf.mxu1  ;;  %v833_v15 = vld [vmem:[#allocation2 + $0xe1] sm:$0xff] }
 0x14a   : > { %v783_v16 = vld [vmem:[#allocation2 + $0xe0] sm:$0xff]  ;;  %750 = vst.msk [vmem:[#allocation2 + $0xf1] sm:$0xff] %vm675_vm1, %v661_v8  ;;  %v4224_v18 = vpack.c.bf16 %v833_v15, %v832_v9 }
 0x14b   : > { %v1169_v17 = vld [vmem:[#allocation2 + $0xda] sm:$0xff]  ;;  %v4226_v19 = vpack.c.bf16 %v783_v16, %v782_v12  ;;  %v1170_v20 = vld [vmem:[#allocation2 + $0xe2] sm:$0xff] }
 0x14c   : > { %v4228_v24 = vpack.c.bf16 %v1170_v20, %v1169_v17  ;;  %3363 = vmatmul.msk.bf16.gmra.mxu1 %vm675_vm1, %v4224_v18 }
 0x14d   : > { %3383 = vmatmul.msk.bf16.gmra.mxu2 %vm675_vm1, %v4226_v19  ;;  %v610_v26 = vpop.f32.mrf.mxu0 }
 0x14e   : > { %3403 = vmatmul.msk.bf16.gmra.mxu3 %vm675_vm1, %v4228_v24  ;;  %v611_v29 = vadd.f32 %v4040_v21, %v610_v26 }
 0x150   : > { %v1076_v31 = vpop.f32.mrf.mxu2  ;;  %v662_v32 = vmax.f32 %v611_v29, 0.0 }
 0x151   : > { %v1077_v33 = vadd.f32 %v1076_v31, %v933_v14  ;;  %v1270_v34 = vpop.f32.mrf.mxu3  ;;  %v935_v35 = vpop.f32.mrf.mxu1  ;;  %v834_v48 = vld [vmem:[#allocation2 + $0xf1] sm:$0xff] }
 0x152   : > { %751 = vst.msk [vmem:[#allocation2 + $0xf9] sm:$0xff] %vm675_vm1, %v662_v32  ;;  %v784_v50 = vld [vmem:[#allocation2 + $0xf0] sm:$0xff] }
 0x153   : > { %v4238_v36 = vadd.f32 %v1270_v34, %v1077_v33 }
 0x155   : > { %v613_v37 = vpop.f32.mrf.mxu0 }
 0x156   : > { %v614_v38 = vadd.f32 %v4040_v21, %v613_v37 }
 0x158   : > { %v1078_v39 = vpop.f32.mrf.mxu2  ;;  %v663_v40 = vmax.f32 %v614_v38, 0.0  ;;  %3476 = vmatmul.msk.bf16.gmra.mxu0 %vm675_vm1, %v4132_v28 }
 0x159   : > { %v1079_v41 = vadd.f32 %v1078_v39, %v935_v35  ;;  %v1272_v44 = vpop.f32.mrf.mxu3  ;;  %v938_v51 = vpop.f32.mrf.mxu1  ;;  %v835_v55 = vld [vmem:[#allocation2 + $0xf9] sm:$0xff] }
 0x15a   : > { %v785_v57 = vld [vmem:[#allocation2 + $0xf8] sm:$0xff]  ;;  %752 = vst.msk [vmem:[#allocation2 + $0x109] sm:$0xff] %vm675_vm1, %v663_v40  ;;  %v4246_v63 = vpack.c.bf16 %v835_v55, %v834_v48 }
 0x15b   : > { %v1171_v60 = vld [vmem:[#allocation2 + $0xf2] sm:$0xff]  ;;  %v4244_v62 = vadd.f32 %v1272_v44, %v1079_v41  ;;  %v4248_v0 = vpack.c.bf16 %v785_v57, %v784_v50  ;;  %v1172_v1 = vld [vmem:[#allocation2 + $0xfa] sm:$0xff] }
 0x15c   : > { %v4250_v6 = vpack.c.bf16 %v1172_v1, %v1171_v60  ;;  %3364 = vmatmul.msk.bf16.gmra.mxu1 %vm675_vm1, %v4246_v63 }
 0x15d   : > { %3384 = vmatmul.msk.bf16.gmra.mxu2 %vm675_vm1, %v4248_v0  ;;  %v615_v7 = vpop.f32.mrf.mxu0 }
 0x15e   : > { %3404 = vmatmul.msk.bf16.gmra.mxu3 %vm675_vm1, %v4250_v6  ;;  %v616_v8 = vadd.f32 %v4040_v21, %v615_v7 }
 0x160   : > { %v1081_v9 = vpop.f32.mrf.mxu2  ;;  %v664_v12 = vmax.f32 %v616_v8, 0.0 }
 0x161   : > { %v1082_v14 = vadd.f32 %v1081_v9, %v938_v51  ;;  %v1275_v15 = vpop.f32.mrf.mxu3  ;;  %v940_v16 = vpop.f32.mrf.mxu1  ;;  %v836_v34 = vld [vmem:[#allocation2 + $0x109] sm:$0xff] }
 0x162   : > { %753 = vst.msk [vmem:[#allocation2 + $0x111] sm:$0xff] %vm675_vm1, %v664_v12  ;;  %v786_v35 = vld [vmem:[#allocation2 + $0x108] sm:$0xff] }
 0x163   : > { %v4260_v17 = vadd.f32 %v1275_v15, %v1082_v14 }
 0x165   : > { %v618_v20 = vpop.f32.mrf.mxu0 }
 0x166   : > { %v619_v26 = vadd.f32 %v4040_v21, %v618_v20 }
 0x168   : > { %v1083_v29 = vpop.f32.mrf.mxu2  ;;  %v665_v31 = vmax.f32 %v619_v26, 0.0  ;;  %3477 = vmatmul.msk.bf16.gmra.mxu0 %vm675_vm1, %v4150_v47 }
 0x169   : > { %v1084_v32 = vadd.f32 %v1083_v29, %v940_v16  ;;  %v1277_v33 = vpop.f32.mrf.mxu3  ;;  %v943_v37 = vpop.f32.mrf.mxu1  ;;  %v837_v38 = vld [vmem:[#allocation2 + $0x111] sm:$0xff] }
 0x16a   : > { %v787_v39 = vld [vmem:[#allocation2 + $0x110] sm:$0xff]  ;;  %754 = vst.msk [vmem:[#allocation2 + $0x121] sm:$0xff] %vm675_vm1, %v665_v31  ;;  %v4268_v44 = vpack.c.bf16 %v837_v38, %v836_v34 }
 0x16b   : > { %v1173_v40 = vld [vmem:[#allocation2 + $0x10a] sm:$0xff]  ;;  %v4266_v41 = vadd.f32 %v1277_v33, %v1084_v32  ;;  %v4270_v48 = vpack.c.bf16 %v787_v39, %v786_v35  ;;  %v1174_v50 = vld [vmem:[#allocation2 + $0x112] sm:$0xff] }
 0x16c   : > { %v4272_v51 = vpack.c.bf16 %v1174_v50, %v1173_v40  ;;  %3365 = vmatmul.msk.bf16.gmra.mxu1 %vm675_vm1, %v4268_v44 }
 0x16d   : > { %3385 = vmatmul.msk.bf16.gmra.mxu2 %vm675_vm1, %v4270_v48  ;;  %v620_v55 = vpop.f32.mrf.mxu0 }
 0x16e   : > { %3405 = vmatmul.msk.bf16.gmra.mxu3 %vm675_vm1, %v4272_v51  ;;  %v621_v57 = vadd.f32 %v4040_v21, %v620_v55 }
 0x170   : > { %v1086_v60 = vpop.f32.mrf.mxu2  ;;  %v666_v1 = vmax.f32 %v621_v57, 0.0 }
 0x171   : > { %v1087_v7 = vadd.f32 %v1086_v60, %v943_v37  ;;  %v1280_v8 = vpop.f32.mrf.mxu3  ;;  %v945_v9 = vpop.f32.mrf.mxu1  ;;  %v838_v31 = vld [vmem:[#allocation2 + $0x121] sm:$0xff] }
 0x172   : > { %755 = vst.msk [vmem:[#allocation2 + $0x129] sm:$0xff] %vm675_vm1, %v666_v1  ;;  %v788_v32 = vld [vmem:[#allocation2 + $0x120] sm:$0xff] }
 0x173   : > { %v4282_v12 = vadd.f32 %v1280_v8, %v1087_v7 }
 0x175   : > { %v623_v14 = vpop.f32.mrf.mxu0 }
 0x176   : > { %v624_v15 = vadd.f32 %v4040_v21, %v623_v14 }
 0x178   : > { %v1088_v16 = vpop.f32.mrf.mxu2  ;;  %v667_v20 = vmax.f32 %v624_v15, 0.0  ;;  %3478 = vmatmul.msk.bf16.gmra.mxu0 %vm675_vm1, %v4168_v3 }
 0x179   : > { %v1089_v26 = vadd.f32 %v1088_v16, %v945_v9  ;;  %v1282_v29 = vpop.f32.mrf.mxu3  ;;  %v948_v33 = vpop.f32.mrf.mxu1  ;;  %v839_v34 = vld [vmem:[#allocation2 + $0x129] sm:$0xff] }
 0x17a   : > { %v789_v35 = vld [vmem:[#allocation2 + $0x128] sm:$0xff]  ;;  %756 = vst.msk [vmem:[#allocation2 + $0x139] sm:$0xff] %vm675_vm1, %v667_v20  ;;  %v4290_v39 = vpack.c.bf16 %v839_v34, %v838_v31 }
 0x17b   : > { %v1175_v37 = vld [vmem:[#allocation2 + $0x122] sm:$0xff]  ;;  %v4288_v38 = vadd.f32 %v1282_v29, %v1089_v26  ;;  %v4292_v40 = vpack.c.bf16 %v789_v35, %v788_v32  ;;  %v1176_v50 = vld [vmem:[#allocation2 + $0x12a] sm:$0xff] }
 0x17c   : > { %v4294_v55 = vpack.c.bf16 %v1176_v50, %v1175_v37  ;;  %3366 = vmatmul.msk.bf16.gmra.mxu1 %vm675_vm1, %v4290_v39 }
 0x17d   : > { %3386 = vmatmul.msk.bf16.gmra.mxu2 %vm675_vm1, %v4292_v40  ;;  %v625_v57 = vpop.f32.mrf.mxu0 }
 0x17e   : > { %3406 = vmatmul.msk.bf16.gmra.mxu3 %vm675_vm1, %v4294_v55  ;;  %v626_v60 = vadd.f32 %v4040_v21, %v625_v57 }
 0x180   : > { %v1091_v1 = vpop.f32.mrf.mxu2  ;;  %v668_v7 = vmax.f32 %v626_v60, 0.0 }
 0x181   : > { %v1092_v8 = vadd.f32 %v1091_v1, %v948_v33  ;;  %v1285_v9 = vpop.f32.mrf.mxu3  ;;  %v950_v14 = vpop.f32.mrf.mxu1  ;;  %v840_v34 = vld [vmem:[#allocation2 + $0x139] sm:$0xff] }
 0x182   : > { %757 = vst.msk [vmem:[#allocation2 + $0x141] sm:$0xff] %vm675_vm1, %v668_v7  ;;  %v790_v35 = vld [vmem:[#allocation2 + $0x138] sm:$0xff] }
 0x183   : > { %v4304_v15 = vadd.f32 %v1285_v9, %v1092_v8 }
 0x185   : > { %5119 = vst [vmem:[#allocation9_spill] sm:$0xff] %v4304_v15  ;;  %v628_v16 = vpop.f32.mrf.mxu0 }
 0x186   : > { %v629_v20 = vadd.f32 %v4040_v21, %v628_v16 }
 0x188   : > { %v1093_v26 = vpop.f32.mrf.mxu2  ;;  %v669_v29 = vmax.f32 %v629_v20, 0.0  ;;  %3479 = vmatmul.msk.bf16.gmra.mxu0 %vm675_vm1, %v4186_v23 }
 0x189   : > { %v1094_v31 = vadd.f32 %v1093_v26, %v950_v14  ;;  %v1287_v32 = vpop.f32.mrf.mxu3  ;;  %v953_v37 = vpop.f32.mrf.mxu1  ;;  %v841_v33 = vld [vmem:[#allocation2 + $0x141] sm:$0xff] }
 0x18a   : > { %v791_v50 = vld [vmem:[#allocation2 + $0x140] sm:$0xff]  ;;  %758 = vst.msk [vmem:[#allocation2 + $0x151] sm:$0xff] %vm675_vm1, %v669_v29  ;;  %v4312_v1 = vpack.c.bf16 %v841_v33, %v840_v34 }
 0x18b   : > { %v1177_v57 = vld [vmem:[#allocation2 + $0x13a] sm:$0xff]  ;;  %v4310_v60 = vadd.f32 %v1287_v32, %v1094_v31  ;;  %v4314_v7 = vpack.c.bf16 %v791_v50, %v790_v35  ;;  %v1178_v8 = vld [vmem:[#allocation2 + $0x142] sm:$0xff] }
 0x18c   : > { %5121 = vst [vmem:[#allocation11_spill] sm:$0xff] %v4312_v1  ;;  %v4316_v9 = vpack.c.bf16 %v1178_v8, %v1177_v57  ;;  %3367 = vmatmul.msk.bf16.gmra.mxu1 %vm675_vm1, %v4312_v1 }
 0x18d   : > { %5120 = vst [vmem:[#allocation10_spill] sm:$0xff] %v4310_v60  ;;  %3387 = vmatmul.msk.bf16.gmra.mxu2 %vm675_vm1, %v4314_v7  ;;  %v630_v14 = vpop.f32.mrf.mxu0 }
 0x18e   : > { %5122 = vst [vmem:[#allocation12_spill] sm:$0xff] %v4316_v9  ;;  %3407 = vmatmul.msk.bf16.gmra.mxu3 %vm675_vm1, %v4316_v9  ;;  %v631_v16 = vadd.f32 %v4040_v21, %v630_v14 }
 0x190   : > { %v1096_v20 = vpop.f32.mrf.mxu2  ;;  %v670_v26 = vmax.f32 %v631_v16, 0.0 }
 0x191   : > { %v1097_v29 = vadd.f32 %v1096_v20, %v953_v37  ;;  %v1290_v31 = vpop.f32.mrf.mxu3  ;;  %v955_v32 = vpop.f32.mrf.mxu1  ;;  %v842_v14 = vld [vmem:[#allocation2 + $0x151] sm:$0xff] }
 0x192   : > { %759 = vst.msk [vmem:[#allocation2 + $0x159] sm:$0xff] %vm675_vm1, %v670_v26  ;;  %v792_v9 = vld [vmem:[#allocation2 + $0x150] sm:$0xff] }
 0x193   : > { %v4326_v34 = vadd.f32 %v1290_v31, %v1097_v29 }
 0x195   : > { %5123 = vst [vmem:[#allocation13_spill] sm:$0xff] %v4326_v34  ;;  %v633_v35 = vpop.f32.mrf.mxu0 }
 0x196   : > { %v634_v33 = vadd.f32 %v4040_v21, %v633_v35 }
 0x198   : > { %v1098_v50 = vpop.f32.mrf.mxu2  ;;  %v671_v57 = vmax.f32 %v634_v33, 0.0  ;;  %3480 = vmatmul.msk.bf16.gmra.mxu0 %vm675_vm1, %v4206_v54 }
 0x199   : > { %v1099_v8 = vadd.f32 %v1098_v50, %v955_v32  ;;  %v1292_v60 = vpop.f32.mrf.mxu3  ;;  %v958_v16 = vpop.f32.mrf.mxu1  ;;  %v843_v37 = vld [vmem:[#allocation2 + $0x159] sm:$0xff]  ;;  %v3604_v50 = vld [vmem:[#allocation5 + $0x40] sm:$0xff] }
 0x19a   : > { %v793_v20 = vld [vmem:[#allocation2 + $0x158] sm:$0xff]  ;;  %760 = vst.msk [vmem:[#allocation2 + $0x169] sm:$0xff] %vm675_vm1, %v671_v57  ;;  %v4334_v29 = vpack.c.bf16 %v843_v37, %v842_v14  ;;  %2620 = vmatpush.bf16.msra.mxu2 %v3604_v50 }
 0x19b   : > { %v1179_v1 = vld [vmem:[#allocation2 + $0x152] sm:$0xff]  ;;  %v4332_v26 = vadd.f32 %v1292_v60, %v1099_v8  ;;  %v4336_v31 = vpack.c.bf16 %v793_v20, %v792_v9  ;;  %v1180_v35 = vld [vmem:[#allocation2 + $0x15a] sm:$0xff]  ;;  %v3603_v20 = vld [vmem:[#allocation5 + $0x38] sm:$0xff] }
 0x19c   : > { %5125 = vst [vmem:[#allocation15_spill] sm:$0xff] %v4334_v29  ;;  %v4338_v32 = vpack.c.bf16 %v1180_v35, %v1179_v1  ;;  %3368 = vmatmul.msk.bf16.gmra.mxu1 %vm675_vm1, %v4334_v29 }
 0x19d   : > { %5124 = vst [vmem:[#allocation14_spill] sm:$0xff] %v4332_v26  ;;  %3388 = vmatmul.msk.bf16.gmra.mxu2 %vm675_vm1, %v4336_v31  ;;  %v635_v33 = vpop.f32.mrf.mxu0  ;;  %2394 = vmatpush.bf16.msra.mxu1 %v3603_v20 }
 0x19e   : > { %5126 = vst [vmem:[#allocation16_spill] sm:$0xff] %v4338_v32  ;;  %3408 = vmatmul.msk.bf16.gmra.mxu3 %vm675_vm1, %v4338_v32  ;;  %v636_v60 = vadd.f32 %v4040_v21, %v635_v33 }
 0x1a0   : > { %v1101_v57 = vpop.f32.mrf.mxu2  ;;  %v672_v9 = vmax.f32 %v636_v60, 0.0 }
 0x1a1   : > { %v1102_v8 = vadd.f32 %v1101_v57, %v958_v16  ;;  %v1295_v14 = vpop.f32.mrf.mxu3  ;;  %v960_v1 = vpop.f32.mrf.mxu1  ;;  %v844_v33 = vld [vmem:[#allocation2 + $0x169] sm:$0xff] }
 0x1a2   : > { %761 = vst.msk [vmem:[#allocation2 + $0x171] sm:$0xff] %vm675_vm1, %v672_v9  ;;  %v794_v16 = vld [vmem:[#allocation2 + $0x168] sm:$0xff] }
 0x1a3   : > { %v4348_v37 = vadd.f32 %v1295_v14, %v1102_v8 }
 0x1a5   : > { %v638_v35 = vpop.f32.mrf.mxu0 }
 0x1a6   : > { %v639_v26 = vadd.f32 %v4040_v21, %v638_v35 }
 0x1a8   : > { %v1103_v32 = vpop.f32.mrf.mxu2  ;;  %v673_v29 = vmax.f32 %v639_v26, 0.0  ;;  %3481 = vmatmul.msk.bf16.gmra.mxu0 %vm675_vm1, %v4226_v19 }
 0x1a9   : > { %v1104_v34 = vadd.f32 %v1103_v32, %v960_v1  ;;  %v1297_v15 = vpop.f32.mrf.mxu3  ;;  %v963_v50 = vpop.f32.mrf.mxu1  ;;  %v845_v60 = vld [vmem:[#allocation2 + $0x171] sm:$0xff] }
 0x1aa   : > { %v795_v57 = vld [vmem:[#allocation2 + $0x170] sm:$0xff]  ;;  %762 = vst.msk [vmem:[#allocation2 + $0x181] sm:$0xff] %vm675_vm1, %v673_v29  ;;  %v4356_v14 = vpack.c.bf16 %v845_v60, %v844_v33 }
 0x1ab   : > { %v1181_v9 = vld [vmem:[#allocation2 + $0x16a] sm:$0xff]  ;;  %v4354_v8 = vadd.f32 %v1297_v15, %v1104_v34  ;;  %v4358_v20 = vpack.c.bf16 %v795_v57, %v794_v16  ;;  %v1182_v26 = vld [vmem:[#allocation2 + $0x172] sm:$0xff] }
 0x1ac   : > { %v4360_v32 = vpack.c.bf16 %v1182_v26, %v1181_v9  ;;  %3369 = vmatmul.msk.bf16.gmra.mxu1 %vm675_vm1, %v4356_v14 }
 0x1ad   : > { %5127 = vst [vmem:[#allocation17_spill] sm:$0xff] %v4354_v8  ;;  %3389 = vmatmul.msk.bf16.gmra.mxu2 %vm675_vm1, %v4358_v20  ;;  %v640_v1 = vpop.f32.mrf.mxu0 }
 0x1ae   : > { %5128 = vst [vmem:[#allocation18_spill] sm:$0xff] %v4360_v32  ;;  %3409 = vmatmul.msk.bf16.gmra.mxu3 %vm675_vm1, %v4360_v32  ;;  %v641_v15 = vadd.f32 %v4040_v21, %v640_v1 }
 0x1b0   : > { %v1106_v34 = vpop.f32.mrf.mxu2  ;;  %v674_v29 = vmax.f32 %v641_v15, 0.0 }
 0x1b1   : > { %v1107_v35 = vadd.f32 %v1106_v34, %v963_v50  ;;  %v1300_v33 = vpop.f32.mrf.mxu3  ;;  %v965_v16 = vpop.f32.mrf.mxu1 }
 0x1b2   : > { %763 = vst.msk [vmem:[#allocation2 + $0x189] sm:$0xff] %vm675_vm1, %v674_v29 }
 0x1b3   : > { %v4370_v60 = vadd.f32 %v1300_v33, %v1107_v35 }
 0x1b8   : > { %v1108_v57 = vpop.f32.mrf.mxu2  ;;  %3482 = vmatmul.msk.bf16.gmra.mxu0 %vm675_vm1, %v4248_v0 }
 0x1b9   : > { %v1109_v9 = vadd.f32 %v1108_v57, %v965_v16  ;;  %v1302_v26 = vpop.f32.mrf.mxu3  ;;  %v968_v8 = vpop.f32.mrf.mxu1 }
 0x1bb   : > { %v4374_v32 = vadd.f32 %v1302_v26, %v1109_v9 }
 0x1bc   : > { %3414 = vmatmul.msk.bf16.vlgmr.msrb.gmra.mxu1 %vm675_vm1, %v4078_v43 }
 0x1bd   : > { %3434 = vmatmul.msk.bf16.vlgmr.msrb.gmra.mxu2 %vm675_vm1, %v4076_v42 }
 0x1be   : > { %3454 = vmatmul.msk.bf16.vlgmr.msrb.gmra.mxu3 %vm675_vm1, %v4080_v45 }
 0x1c0   : > { %v1111_v21 = vpop.f32.mrf.mxu2 }
 0x1c1   : > { %v1112_v50 = vadd.f32 %v1111_v21, %v968_v8  ;;  %v1305_v1 = vpop.f32.mrf.mxu3  ;;  %v970_v15 = vpop.f32.mrf.mxu1 }
 0x1c3   : > { %v4382_v34 = vadd.f32 %v1305_v1, %v1112_v50 }
 0x1c8   : > { %v1113_v29 = vpop.f32.mrf.mxu2  ;;  %3483 = vmatmul.msk.bf16.gmra.mxu0 %vm675_vm1, %v4270_v48 }
 0x1c9   : > { %v1114_v35 = vadd.f32 %v1113_v29, %v970_v15  ;;  %v1307_v33 = vpop.f32.mrf.mxu3  ;;  %v973_v16 = vpop.f32.mrf.mxu1 }
 0x1cb   : > { %v4386_v43 = vadd.f32 %v1307_v33, %v1114_v35 }
 0x1cc   : > { %3415 = vmatmul.msk.bf16.gmra.mxu1 %vm675_vm1, %v4096_v59 }
 0x1cd   : > { %3435 = vmatmul.msk.bf16.gmra.mxu2 %vm675_vm1, %v4094_v58 }
 0x1ce   : > { %3455 = vmatmul.msk.bf16.gmra.mxu3 %vm675_vm1, %v4098_v61 }
 0x1d0   : > { %v1116_v42 = vpop.f32.mrf.mxu2 }
 0x1d1   : > { %v1117_v45 = vadd.f32 %v1116_v42, %v973_v16  ;;  %v1310_v8 = vpop.f32.mrf.mxu3  ;;  %v975_v57 = vpop.f32.mrf.mxu1 }
 0x1d3   : > { %v4394_v9 = vadd.f32 %v1310_v8, %v1117_v45 }
 0x1d8   : > { %v1118_v26 = vpop.f32.mrf.mxu2  ;;  %3484 = vmatmul.msk.bf16.gmra.mxu0 %vm675_vm1, %v4292_v40 }
 0x1d9   : > { %v1119_v21 = vadd.f32 %v1118_v26, %v975_v57  ;;  %v1312_v50 = vpop.f32.mrf.mxu3  ;;  %v978_v1 = vpop.f32.mrf.mxu1 }
 0x1db   : > { %v4398_v59 = vadd.f32 %v1312_v50, %v1119_v21 }
 0x1dc   : > { %3416 = vmatmul.msk.bf16.gmra.mxu1 %vm675_vm1, %v4114_v11  ;;  %v4410_v11 = vpop.f32.mrf.mxu0 }
 0x1dd   : > { %3436 = vmatmul.msk.bf16.gmra.mxu2 %vm675_vm1, %v4112_v10 }
 0x1de   : > { %3456 = vmatmul.msk.bf16.gmra.mxu3 %vm675_vm1, %v4116_v13 }
 0x1e0   : > { %v1121_v58 = vpop.f32.mrf.mxu2 }
 0x1e1   : > { %v1122_v61 = vadd.f32 %v1121_v58, %v978_v1  ;;  %v1315_v15 = vpop.f32.mrf.mxu3  ;;  %v980_v29 = vpop.f32.mrf.mxu1 }
 0x1e3   : > { %v4406_v35 = vadd.f32 %v1315_v15, %v1122_v61 }
 0x1e4   : > { %v4422_v50 = vpop.f32.mrf.mxu0 }
 0x1e8   : > { %v1123_v33 = vpop.f32.mrf.mxu2  ;;  %3485 = vmatmul.msk.bf16.gmra.mxu0 %vm675_vm1, %v4314_v7 }
 0x1e9   : > { %v1124_v16 = vadd.f32 %v1123_v33, %v980_v29  ;;  %v1317_v42 = vpop.f32.mrf.mxu3  ;;  %v983_v45 = vpop.f32.mrf.mxu1 }
 0x1eb   : > { %v4412_v8 = vadd.f32 %v1317_v42, %v1124_v16 }
 0x1ec   : > { %3417 = vmatmul.msk.bf16.gmra.mxu1 %vm675_vm1, %v4132_v28 }
 0x1ed   : > { %3437 = vmatmul.msk.bf16.gmra.mxu2 %vm675_vm1, %v4130_v27  ;;  %v4434_v27 = vpop.f32.mrf.mxu0 }
 0x1ee   : > { %3457 = vmatmul.msk.bf16.gmra.mxu3 %vm675_vm1, %v4134_v30 }
 0x1f0   : > { %v1126_v10 = vpop.f32.mrf.mxu2 }
 0x1f1   : > { %v1127_v13 = vadd.f32 %v1126_v10, %v983_v45  ;;  %v1320_v57 = vpop.f32.mrf.mxu3  ;;  %v985_v26 = vpop.f32.mrf.mxu1 }
 0x1f3   : > { %v4420_v21 = vadd.f32 %v1320_v57, %v1127_v13 }
 0x1f5   : > { %v4438_v10 = vpop.f32.mrf.mxu0 }
 0x1f8   : > { %v1128_v1 = vpop.f32.mrf.mxu2  ;;  %3486 = vmatmul.msk.bf16.gmra.mxu0 %vm675_vm1, %v4336_v31 }
 0x1f9   : > { %v1129_v58 = vadd.f32 %v1128_v1, %v985_v26  ;;  %v1322_v61 = vpop.f32.mrf.mxu3  ;;  %v988_v28 = vpop.f32.mrf.mxu1 }
 0x1fb   : > { %v4426_v15 = vadd.f32 %v1322_v61, %v1129_v58 }
 0x1fc   : > { %3418 = vmatmul.msk.bf16.gmra.mxu1 %vm675_vm1, %v4150_v47 }
 0x1fd   : > { %3438 = vmatmul.msk.bf16.gmra.mxu2 %vm675_vm1, %v4148_v46 }
 0x1fe   : > { %3458 = vmatmul.msk.bf16.gmra.mxu3 %vm675_vm1, %v4152_v49 }
 0x200   : > { %v1131_v30 = vpop.f32.mrf.mxu2 }
 0x201   : > { %v1132_v29 = vadd.f32 %v1131_v30, %v988_v28  ;;  %v1325_v33 = vpop.f32.mrf.mxu3  ;;  %v990_v16 = vpop.f32.mrf.mxu1 }
 0x203   : > { %v4436_v42 = vadd.f32 %v1325_v33, %v1132_v29 }
 0x208   : > { %v1133_v45 = vpop.f32.mrf.mxu2  ;;  %3487 = vmatmul.msk.bf16.gmra.mxu0 %vm675_vm1, %v4358_v20 }
 0x209   : > { %v1134_v13 = vadd.f32 %v1133_v45, %v990_v16  ;;  %v1327_v57 = vpop.f32.mrf.mxu3  ;;  %v993_v46 = vpop.f32.mrf.mxu1 }
 0x20b   : > { %v4442_v47 = vadd.f32 %v1327_v57, %v1134_v13 }
 0x20c   : > { %3419 = vmatmul.msk.bf16.gmra.mxu1 %vm675_vm1, %v4168_v3 }
 0x20d   : > { %3439 = vmatmul.msk.bf16.gmra.mxu2 %vm675_vm1, %v4166_v2 }
 0x20e   : > { %3459 = vmatmul.msk.bf16.gmra.mxu3 %vm675_vm1, %v4170_v5 }
 0x210   : > { %v1136_v49 = vpop.f32.mrf.mxu2 }
 0x211   : > { %v1137_v26 = vadd.f32 %v1136_v49, %v993_v46  ;;  %v1330_v1 = vpop.f32.mrf.mxu3  ;;  %v995_v58 = vpop.f32.mrf.mxu1 }
 0x213   : > { %v4450_v61 = vadd.f32 %v1330_v1, %v1137_v26 }
 0x218   : > { %v1138_v28 = vpop.f32.mrf.mxu2 }
 0x219   : > { %v1139_v30 = vadd.f32 %v1138_v28, %v995_v58  ;;  %v1332_v29 = vpop.f32.mrf.mxu3  ;;  %v998_v33 = vpop.f32.mrf.mxu1 }
 0x21b   : > { %v4452_v16 = vadd.f32 %v1332_v29, %v1139_v30  ;;  %v3605_v29 = vld [vmem:[%s5103_s5] sm:$0xff] }
 0x21c   : > { %3420 = vmatmul.msk.bf16.gmra.mxu1 %vm675_vm1, %v4186_v23  ;;  %v4470_v23 = vpop.f32.mrf.mxu0  ;;  %2885 = vmatpush.bf16.msra.mxu3 %v3605_v29 }
 0x21d   : > { %3440 = vmatmul.msk.bf16.gmra.mxu2 %vm675_vm1, %v4184_v22 }
 0x21e   : > { %3460 = vmatmul.msk.bf16.gmra.mxu3 %vm675_vm1, %v4188_v25 }
 0x220   : > { %v1141_v2 = vpop.f32.mrf.mxu2 }
 0x221   : > { %v1142_v3 = vadd.f32 %v1141_v2, %v998_v33  ;;  %v1335_v5 = vpop.f32.mrf.mxu3  ;;  %v1000_v45 = vpop.f32.mrf.mxu1 }
 0x223   : > { %v4460_v13 = vadd.f32 %v1335_v5, %v1142_v3 }
 0x224   : > { %v4480_v3 = vpop.f32.mrf.mxu0 }
 0x228   : > { %v1143_v57 = vpop.f32.mrf.mxu2 }
 0x229   : > { %v1144_v46 = vadd.f32 %v1143_v57, %v1000_v45  ;;  %v1337_v49 = vpop.f32.mrf.mxu3  ;;  %v1003_v26 = vpop.f32.mrf.mxu1 }
 0x22b   : > { %v4462_v1 = vadd.f32 %v1337_v49, %v1144_v46 }
 0x22c   : > { %3421 = vmatmul.msk.bf16.gmra.mxu1 %vm675_vm1, %v4206_v54 }
 0x22d   : > { %3441 = vmatmul.msk.bf16.gmra.mxu2 %vm675_vm1, %v4204_v53  ;;  %v3607_v53 = vld [vmem:[%s5105_s7 + $0x8] sm:$0xff] }
 0x22e   : > { %3461 = vmatmul.msk.bf16.gmra.mxu3 %vm675_vm1, %v4208_v56  ;;  %2993 = vmatpush.bf16.msra.mxu0 %v3607_v53 }
 0x230   : > { %v1146_v22 = vpop.f32.mrf.mxu2 }
 0x231   : > { %v1147_v25 = vadd.f32 %v1146_v22, %v1003_v26  ;;  %v1340_v58 = vpop.f32.mrf.mxu3  ;;  %v1005_v28 = vpop.f32.mrf.mxu1 }
 0x233   : > { %v4472_v30 = vadd.f32 %v1340_v58, %v1147_v25  ;;  %v4494_v58 = vpop.f32.mrf.mxu0 }
 0x238   : > { %v1148_v54 = vpop.f32.mrf.mxu2 }
 0x239   : > { %v1149_v56 = vadd.f32 %v1148_v54, %v1005_v28  ;;  %v1342_v33 = vpop.f32.mrf.mxu3  ;;  %v1491_v2 = vpop.f32.mrf.mxu1 }
 0x23a   : > { %v1571_v45 = vadd.f32 %v1491_v2, %v4202_v52 }
 0x23b   : > { %v4482_v5 = vadd.f32 %v1342_v33, %v1149_v56 }
 0x23c   : > { %3422 = vmatmul.msk.bf16.gmra.mxu1 %vm675_vm1, %v4226_v19 }
 0x23d   : > { %3442 = vmatmul.msk.bf16.gmra.mxu2 %vm675_vm1, %v4224_v18 }
 0x23e   : > { %3462 = vmatmul.msk.bf16.gmra.mxu3 %vm675_vm1, %v4228_v24 }
 0x240   : > { %v1717_v57 = vpop.f32.mrf.mxu2 }
 0x241   : > { %v1797_v46 = vadd.f32 %v1717_v57, %v1571_v45  ;;  %v1943_v49 = vpop.f32.mrf.mxu3  ;;  %v1493_v26 = vpop.f32.mrf.mxu1 }
 0x242   : > { %v1572_v25 = vadd.f32 %v1493_v26, %v4218_v4  ;;  %v4505_v4 = vpop.f32.mrf.mxu0 }
 0x243   : > { %v4491_v22 = vadd.f32 %v1943_v49, %v1797_v46 }
 0x248   : > { %v1719_v52 = vpop.f32.mrf.mxu2 }
 0x249   : > { %v1798_v28 = vadd.f32 %v1719_v52, %v1572_v25  ;;  %v1945_v29 = vpop.f32.mrf.mxu3  ;;  %v1496_v19 = vpop.f32.mrf.mxu1 }
 0x24a   : > { %v1573_v18 = vadd.f32 %v1496_v19, %v4238_v36  ;;  %v4510_v57 = vpop.f32.mrf.mxu0 }
 0x24b   : > { %v4496_v53 = vadd.f32 %v1945_v29, %v1798_v28 }
 0x24c   : > { %3423 = vmatmul.msk.bf16.gmra.mxu1 %vm675_vm1, %v4248_v0 }
 0x24d   : > { %3443 = vmatmul.msk.bf16.gmra.mxu2 %vm675_vm1, %v4246_v63 }
 0x24e   : > { %3463 = vmatmul.msk.bf16.gmra.mxu3 %vm675_vm1, %v4250_v6 }
 0x250   : > { %v1722_v24 = vpop.f32.mrf.mxu2 }
 0x251   : > { %v1799_v54 = vadd.f32 %v1722_v24, %v1573_v18  ;;  %v1948_v56 = vpop.f32.mrf.mxu3  ;;  %v1498_v33 = vpop.f32.mrf.mxu1 }
 0x252   : > { %v1574_v45 = vadd.f32 %v1498_v33, %v4244_v62  ;;  %v4521_v28 = vpop.f32.mrf.mxu0 }
 0x253   : > { %v4507_v2 = vadd.f32 %v1948_v56, %v1799_v54 }
 0x258   : > { %v1724_v36 = vpop.f32.mrf.mxu2 }
 0x259   : > { %v1800_v0 = vadd.f32 %v1724_v36, %v1574_v45  ;;  %v1950_v46 = vpop.f32.mrf.mxu3  ;;  %v1501_v49 = vpop.f32.mrf.mxu1 }
 0x25a   : > { %v1575_v6 = vadd.f32 %v1501_v49, %v4260_v17  ;;  %v4529_v56 = vpop.f32.mrf.mxu0 }
 0x25b   : > { %v4512_v63 = vadd.f32 %v1950_v46, %v1800_v0 }
 0x25c   : > { %3424 = vmatmul.msk.bf16.gmra.mxu1 %vm675_vm1, %v4270_v48 }
 0x25d   : > { %3444 = vmatmul.msk.bf16.gmra.mxu2 %vm675_vm1, %v4268_v44 }
 0x25e   : > { %3464 = vmatmul.msk.bf16.gmra.mxu3 %vm675_vm1, %v4272_v51 }
 0x260   : > { %v1727_v62 = vpop.f32.mrf.mxu2 }
 0x261   : > { %v1801_v26 = vadd.f32 %v1727_v62, %v1575_v6  ;;  %v1953_v25 = vpop.f32.mrf.mxu3  ;;  %v1503_v52 = vpop.f32.mrf.mxu1 }
 0x262   : > { %v1576_v19 = vadd.f32 %v1503_v52, %v4266_v41  ;;  %v2085_v52 = vld [vmem:[#allocation2 + $0x188] sm:$0xff] }
 0x263   : > { %v4523_v29 = vadd.f32 %v1953_v25, %v1801_v26  ;;  %v5131_v25 = vld [vmem:[#allocation12_spill] sm:$0xff] }
 0x268   : > { %v1729_v17 = vpop.f32.mrf.mxu2 }
 0x269   : > { %v1802_v18 = vadd.f32 %v1729_v17, %v1576_v19  ;;  %v1955_v24 = vpop.f32.mrf.mxu3  ;;  %v1506_v48 = vpop.f32.mrf.mxu1 }
 0x26a   : > { %v1577_v44 = vadd.f32 %v1506_v48, %v4282_v12  ;;  %v4540_v12 = vpop.f32.mrf.mxu0 }
 0x26b   : > { %v4526_v54 = vadd.f32 %v1955_v24, %v1802_v18 }
 0x26c   : > { %3425 = vmatmul.msk.bf16.gmra.mxu1 %vm675_vm1, %v4292_v40 }
 0x26d   : > { %3445 = vmatmul.msk.bf16.gmra.mxu2 %vm675_vm1, %v4290_v39  ;;  %v5129_v39 = vld [vmem:[#allocation9_spill] sm:$0xff] }
 0x26e   : > { %3465 = vmatmul.msk.bf16.gmra.mxu3 %vm675_vm1, %v4294_v55  ;;  %v5130_v55 = vld [vmem:[#allocation11_spill] sm:$0xff] }
 0x270   : > { %v1732_v41 = vpop.f32.mrf.mxu2 }
 0x271   : > { %v1803_v51 = vadd.f32 %v1732_v41, %v1577_v44  ;;  %v1958_v33 = vpop.f32.mrf.mxu3  ;;  %v1508_v45 = vpop.f32.mrf.mxu1 }
 0x272   : > { %v1578_v0 = vadd.f32 %v1508_v45, %v4288_v38  ;;  %v2084_v38 = vld [vmem:[#allocation2 + $0x180] sm:$0xff]  ;;  %v4551_v18 = vpop.f32.mrf.mxu0 }
 0x273   : > { %v4537_v36 = vadd.f32 %v1958_v33, %v1803_v51  ;;  %v2102_v19 = vpack.c.bf16 %v2085_v52, %v2084_v38 }
 0x275   : > { %3488 = vmatmul.msk.bf16.gmra.mxu0 %vm675_vm1, %v2102_v19 }
 0x278   : > { %v1734_v46 = vpop.f32.mrf.mxu2 }
 0x279   : > { %v1804_v49 = vadd.f32 %v1734_v46, %v1578_v0  ;;  %v1960_v6 = vpop.f32.mrf.mxu3  ;;  %v1511_v40 = vpop.f32.mrf.mxu1 }
 0x27a   : > { %v1579_v26 = vadd.f32 %v1511_v40, %v5129_v39  ;;  %v5135_v39 = vld [vmem:[#allocation15_spill] sm:$0xff] }
 0x27b   : > { %v4542_v62 = vadd.f32 %v1960_v6, %v1804_v49  ;;  %v4561_v49 = vpop.f32.mrf.mxu0  ;;  %v5134_v6 = vld [vmem:[#allocation13_spill] sm:$0xff] }
 0x27c   : > { %3426 = vmatmul.msk.bf16.gmra.mxu1 %vm675_vm1, %v4314_v7  ;;  %v5132_v7 = vld [vmem:[#allocation10_spill] sm:$0xff]  ;;  %5133 = vst [vmem:[#allocation9_spill] sm:$0xff] %v4561_v49 }
 0x27d   : > { %3446 = vmatmul.msk.bf16.gmra.mxu2 %vm675_vm1, %v5130_v55 }
 0x27e   : > { %3466 = vmatmul.msk.bf16.gmra.mxu3 %vm675_vm1, %v5131_v25 }
 0x280   : > { %v1737_v17 = vpop.f32.mrf.mxu2 }
 0x281   : > { %v1805_v24 = vadd.f32 %v1737_v17, %v1579_v26  ;;  %v1963_v48 = vpop.f32.mrf.mxu3  ;;  %v1513_v44 = vpop.f32.mrf.mxu1  ;;  %v5136_v26 = vld [vmem:[#allocation16_spill] sm:$0xff] }
 0x282   : > { %v1580_v51 = vadd.f32 %v1513_v44, %v5132_v7  ;;  %v2086_v44 = vld [vmem:[#allocation2 + $0x198] sm:$0xff]  ;;  %v2087_v7 = vld [vmem:[#allocation2 + $0x1a0] sm:$0xff] }
 0x283   : > { %v4554_v41 = vadd.f32 %v1963_v48, %v1805_v24  ;;  %v5137_v24 = vld [vmem:[#allocation14_spill] sm:$0xff] }
 0x288   : > { %v1739_v33 = vpop.f32.mrf.mxu2 }
 0x289   : > { %v4557_v45 = vadd.f32 %v1739_v33, %v1580_v51  ;;  %v4559_v0 = vpop.f32.mrf.mxu3  ;;  %v1516_v46 = vpop.f32.mrf.mxu1  ;;  %v2103_v51 = vpack.c.bf16 %v2087_v7, %v2086_v44  ;;  %v5141_v44 = vld [vmem:[#allocation17_spill] sm:$0xff] }
 0x28a   : > { %v1581_v40 = vadd.f32 %v1516_v46, %v5134_v6  ;;  %v4573_v33 = vpop.f32.mrf.mxu0 }
 0x28b   : > { %5138 = vst [vmem:[#allocation11_spill] sm:$0xff] %v4573_v33  ;;  %3489 = vmatmul.msk.bf16.gmra.mxu0 %vm675_vm1, %v2103_v51  ;;  %v1633_v51 = vld [vmem:[#allocation2 + $0x181] sm:$0xff]  ;;  %v1860_v33 = vld [vmem:[#allocation2 + $0x18a] sm:$0xff] }
 0x28c   : > { %3427 = vmatmul.msk.bf16.gmra.mxu1 %vm675_vm1, %v4336_v31 }
 0x28d   : > { %3447 = vmatmul.msk.bf16.gmra.mxu2 %vm675_vm1, %v5135_v39 }
 0x28e   : > { %3467 = vmatmul.msk.bf16.gmra.mxu3 %vm675_vm1, %v5136_v26  ;;  %v5139_v26 = vld [vmem:[#allocation18_spill] sm:$0xff] }
 0x290   : > { %v1742_v55 = vpop.f32.mrf.mxu2 }
 0x291   : > { %v1807_v25 = vadd.f32 %v1742_v55, %v1581_v40  ;;  %v1968_v38 = vpop.f32.mrf.mxu3  ;;  %v1518_v52 = vpop.f32.mrf.mxu1 }
 0x292   : > { %v1582_v48 = vadd.f32 %v1518_v52, %v5137_v24  ;;  %v4587_v55 = vpop.f32.mrf.mxu0 }
 0x293   : > { %v4570_v17 = vadd.f32 %v1968_v38, %v1807_v25  ;;  %5140 = vst [vmem:[#allocation12_spill] sm:$0xff] %v4587_v55 }
 0x298   : > { %v1744_v31 = vpop.f32.mrf.mxu2 }
 0x299   : > { %v4576_v46 = vadd.f32 %v1744_v31, %v1582_v48  ;;  %v4578_v6 = vpop.f32.mrf.mxu3  ;;  %v1521_v39 = vpop.f32.mrf.mxu1  ;;  %v1634_v31 = vld [vmem:[#allocation2 + $0x189] sm:$0xff] }
 0x29a   : > { %v1583_v40 = vadd.f32 %v1521_v39, %v4348_v37 }
 0x29c   : > { %3428 = vmatmul.msk.bf16.gmra.mxu1 %vm675_vm1, %v4358_v20  ;;  %v4592_v20 = vpop.f32.mrf.mxu0 }
 0x29d   : > { %3448 = vmatmul.msk.bf16.gmra.mxu2 %vm675_vm1, %v4356_v14  ;;  %5142 = vst [vmem:[#allocation10_spill] sm:$0xff] %v4592_v20  ;;  %v3665_v20 = vld [vmem:[%s3918_s12] sm:$0xff] }
 0x29e   : > { %3468 = vmatmul.msk.bf16.gmra.mxu3 %vm675_vm1, %v5139_v26  ;;  %v1859_v26 = vld [vmem:[#allocation2 + $0x182] sm:$0xff] }
 0x2a0   : > { %v1747_v25 = vpop.f32.mrf.mxu2 }
 0x2a1   : > { %v1809_v38 = vadd.f32 %v1747_v25, %v1583_v40  ;;  %v1973_v52 = vpop.f32.mrf.mxu3  ;;  %v1523_v24 = vpop.f32.mrf.mxu1  ;;  %v4599_v25 = vpack.c.bf16 %v1634_v31, %v1633_v51  ;;  %v2283_v51 = vld [vmem:[#allocation2 + $0x39] sm:$0xff] }
 0x2a2   : > { %v1584_v7 = vadd.f32 %v1523_v24, %v5141_v44  ;;  %v2508_v31 = vld [vmem:[#allocation2 + $0x32] sm:$0xff] }
 0x2a3   : > { %v4589_v48 = vadd.f32 %v1973_v52, %v1809_v38  ;;  %v4601_v38 = vpack.c.bf16 %v1860_v33, %v1859_v26  ;;  %v2509_v26 = vld [vmem:[#allocation2 + $0x3a] sm:$0xff] }
 0x2a8   : > { %v1749_v37 = vpop.f32.mrf.mxu2 }
 0x2a9   : > { %v4594_v39 = vadd.f32 %v1749_v37, %v1584_v7  ;;  %v4596_v14 = vpop.f32.mrf.mxu3  ;;  %v1526_v55 = vpop.f32.mrf.mxu1 }
 0x2aa   : > { %v1585_v40 = vadd.f32 %v1526_v55, %v4370_v60  ;;  %v4608_v37 = vpop.f32.mrf.mxu0 }
 0x2ab   : > { %5143 = vst [vmem:[#allocation13_spill] sm:$0xff] %v4608_v37  ;;  %v2540_v37 = vpack.c.bf16 %v2509_v26, %v2508_v31  ;;  %v2511_v31 = vld [vmem:[#allocation2 + $0x52] sm:$0xff] }
 0x2ac   : > { %3429 = vmatmul.msk.bf16.gmra.mxu1 %vm675_vm1, %v2102_v19  ;;  %v3606_v19 = vld [vmem:[%s5105_s7] sm:$0xff]  ;;  %v3666_v26 = vld [vmem:[%s3918_s12 + $0x8] sm:$0xff] }
 0x2ad   : > { %3449 = vmatmul.msk.bf16.gmra.mxu2 %vm675_vm1, %v4599_v25  ;;  %2994 = vmatpush.bf16.msra.mxu0 %v3606_v19 }
 0x2ae   : > { %3469 = vmatmul.msk.bf16.gmra.mxu3 %vm675_vm1, %v4601_v38 }
 0x2b0   : > { %v1752_v52 = vpop.f32.mrf.mxu2  ;;  %3558 = vmatmul.msk.bf16.vlgmr.msra.gmra.mxu0 %vm505_vm0, %v3665_v20 }
 0x2b1   : > { %v1811_v24 = vadd.f32 %v1752_v52, %v1585_v40  ;;  %v1978_v44 = vpop.f32.mrf.mxu3  ;;  %v1528_v7 = vpop.f32.mrf.mxu1 }
 0x2b2   : > { %v1586_v33 = vadd.f32 %v1528_v7, %v4374_v32 }
 0x2b3   : > { %v4610_v60 = vadd.f32 %v1978_v44, %v1811_v24  ;;  %v2282_v44 = vld [vmem:[#allocation2 + $0x31] sm:$0xff] }
 0x2b4   : > { %v2314_v7 = vpack.c.bf16 %v2283_v51, %v2282_v44  ;;  %v2285_v51 = vld [vmem:[#allocation2 + $0x51] sm:$0xff] }
 0x2b5   : > { %5144 = vst [vmem:[#allocation15_spill] sm:$0xff] %v4610_v60  ;;  %v4623_v60 = vpop.f32.mrf.mxu0 }
 0x2b6   : > { %5147 = vst [vmem:[#allocation18_spill] sm:$0xff] %v4623_v60 }
 0x2b8   : > { %v1754_v55 = vpop.f32.mrf.mxu2 }
 0x2b9   : > { %v4618_v40 = vadd.f32 %v1754_v55, %v1586_v33  ;;  %v4620_v52 = vpop.f32.mrf.mxu3  ;;  %v1531_v24 = vpop.f32.mrf.mxu1 }
 0x2ba   : > { %5146 = vst [vmem:[#allocation14_spill] sm:$0xff] %v4620_v52  ;;  %v1587_v32 = vadd.f32 %v1531_v24, %v4382_v34  ;;  %v2510_v24 = vld [vmem:[#allocation2 + $0x4a] sm:$0xff] }
 0x2bb   : > { %5145 = vst [vmem:[#allocation16_spill] sm:$0xff] %v4618_v40 }
 0x2bc   : > { %3494 = vmatmul.msk.bf16.vlgmr.msra.gmra.mxu1 %vm675_vm1, %v2314_v7  ;;  %v2284_v7 = vld [vmem:[#allocation2 + $0x49] sm:$0xff] }
 0x2bd   : > { %3514 = vmatmul.msk.bf16.vlgmr.msra.gmra.mxu2 %vm675_vm1, %v2540_v37  ;;  %v4630_v40 = vpop.f32.mrf.mxu0 }
 0x2be   : > { %5149 = vst [vmem:[#allocation19_spill] sm:$0xff] %v4630_v40 }
 0x2c0   : > { %v1757_v19 = vpop.f32.mrf.mxu2  ;;  %3559 = vmatmul.msk.bf16.gmra.mxu0 %vm505_vm0, %v3666_v26 }
 0x2c1   : > { %v1813_v49 = vadd.f32 %v1757_v19, %v1587_v32  ;;  %v1983_v20 = vpop.f32.mrf.mxu3  ;;  %v1533_v33 = vpop.f32.mrf.mxu1  ;;  %v2315_v19 = vpack.c.bf16 %v2285_v51, %v2284_v7  ;;  %v3667_v51 = vld [vmem:[%s3918_s12 + $0x10] sm:$0xff] }
 0x2c2   : > { %v1588_v52 = vadd.f32 %v1533_v33, %v4386_v43  ;;  %v2541_v43 = vpack.c.bf16 %v2511_v31, %v2510_v24 }
 0x2c3   : > { %v4627_v55 = vadd.f32 %v1983_v20, %v1813_v49 }
 0x2c5   : > { %5148 = vst [vmem:[#allocation17_spill] sm:$0xff] %v4627_v55  ;;  %v4641_v33 = vpop.f32.mrf.mxu0 }
 0x2c6   : > { %5151 = vst [vmem:[#allocation21_spill] sm:$0xff] %v4641_v33 }
 0x2c8   : > { %v1759_v34 = vpop.f32.mrf.mxu2 }
 0x2c9   : > { %v4634_v44 = vadd.f32 %v1759_v34, %v1588_v52  ;;  %v4636_v37 = vpop.f32.mrf.mxu3  ;;  %v1536_v32 = vpop.f32.mrf.mxu1 }
 0x2ca   : > { %5150 = vst [vmem:[#allocation20_spill] sm:$0xff] %v4636_v37  ;;  %v1589_v49 = vadd.f32 %v1536_v32, %v4394_v9  ;;  %v2287_v37 = vld [vmem:[#allocation2 + $0x69] sm:$0xff] }
 0x2cb   : > { %v2512_v9 = vld [vmem:[#allocation2 + $0x62] sm:$0xff]  ;;  %v2513_v32 = vld [vmem:[#allocation2 + $0x6a] sm:$0xff] }
 0x2cc   : > { %3495 = vmatmul.msk.bf16.gmra.mxu1 %vm675_vm1, %v2315_v19  ;;  %v2286_v19 = vld [vmem:[#allocation2 + $0x61] sm:$0xff] }
 0x2cd   : > { %3515 = vmatmul.msk.bf16.gmra.mxu2 %vm675_vm1, %v2541_v43  ;;  %v2316_v43 = vpack.c.bf16 %v2287_v37, %v2286_v19  ;;  %v3668_v37 = vld [vmem:[%s3918_s12 + $0x18] sm:$0xff] }
 0x2d0   : > { %v1762_v20 = vpop.f32.mrf.mxu2  ;;  %3560 = vmatmul.msk.bf16.gmra.mxu0 %vm505_vm0, %v3667_v51 }
 0x2d1   : > { %v1815_v40 = vadd.f32 %v1762_v20, %v1589_v49  ;;  %v1988_v26 = vpop.f32.mrf.mxu3  ;;  %v1538_v52 = vpop.f32.mrf.mxu1 }
 0x2d2   : > { %v1590_v60 = vadd.f32 %v1538_v52, %v4398_v59  ;;  %v4652_v49 = vpop.f32.mrf.mxu0  ;;  %v2542_v59 = vpack.c.bf16 %v2513_v32, %v2512_v9 }
 0x2d3   : > { %v4643_v34 = vadd.f32 %v1988_v26, %v1815_v40  ;;  %5153 = vst [vmem:[#allocation23_spill] sm:$0xff] %v4652_v49 }
 0x2d5   : > { %5152 = vst [vmem:[#allocation22_spill] sm:$0xff] %v4643_v34  ;;  %v2289_v34 = vld [vmem:[#allocation2 + $0x81] sm:$0xff] }
 0x2d8   : > { %v1764_v55 = vpop.f32.mrf.mxu2 }
 0x2d9   : > { %v4648_v24 = vadd.f32 %v1764_v55, %v1590_v60  ;;  %v4650_v31 = vpop.f32.mrf.mxu3  ;;  %v1541_v7 = vpop.f32.mrf.mxu1 }
 0x2da   : > { %v1591_v40 = vadd.f32 %v1541_v7, %v4406_v35  ;;  %v4660_v33 = vpop.f32.mrf.mxu0  ;;  %v2514_v35 = vld [vmem:[#allocation2 + $0x7a] sm:$0xff]  ;;  %v2515_v7 = vld [vmem:[#allocation2 + $0x82] sm:$0xff] }
 0x2db   : > { %5155 = vst [vmem:[#allocation25_spill] sm:$0xff] %v4660_v33 }
 0x2dc   : > { %3496 = vmatmul.msk.bf16.gmra.mxu1 %vm675_vm1, %v2316_v43 }
 0x2dd   : > { %3516 = vmatmul.msk.bf16.gmra.mxu2 %vm675_vm1, %v2542_v59 }
 0x2e0   : > { %v1767_v20 = vpop.f32.mrf.mxu2  ;;  %3561 = vmatmul.msk.bf16.gmra.mxu0 %vm505_vm0, %v3668_v37 }
 0x2e1   : > { %v1817_v26 = vadd.f32 %v1767_v20, %v1591_v40  ;;  %v1993_v52 = vpop.f32.mrf.mxu3  ;;  %v1543_v60 = vpop.f32.mrf.mxu1  ;;  %v2288_v40 = vld [vmem:[#allocation2 + $0x79] sm:$0xff] }
 0x2e2   : > { %v1592_v51 = vadd.f32 %v1543_v60, %v4412_v8  ;;  %v2317_v59 = vpack.c.bf16 %v2289_v34, %v2288_v40  ;;  %v2543_v8 = vpack.c.bf16 %v2515_v7, %v2514_v35  ;;  %v4671_v20 = vpop.f32.mrf.mxu0  ;;  %v3669_v34 = vld [vmem:[%s3918_s12 + $0x20] sm:$0xff] }
 0x2e3   : > { %v4657_v55 = vadd.f32 %v1993_v52, %v1817_v26  ;;  %5156 = vst [vmem:[#allocation26_spill] sm:$0xff] %v4671_v20 }
 0x2e5   : > { %5154 = vst [vmem:[#allocation24_spill] sm:$0xff] %v4657_v55  ;;  %v2291_v55 = vld [vmem:[#allocation2 + $0x99] sm:$0xff] }
 0x2e8   : > { %v1769_v49 = vpop.f32.mrf.mxu2 }
 0x2e9   : > { %v4664_v9 = vadd.f32 %v1769_v49, %v1592_v51  ;;  %v4666_v32 = vpop.f32.mrf.mxu3  ;;  %v1546_v19 = vpop.f32.mrf.mxu1 }
 0x2ea   : > { %v1593_v43 = vadd.f32 %v1546_v19, %v4420_v21  ;;  %v2516_v21 = vld [vmem:[#allocation2 + $0x92] sm:$0xff]  ;;  %v2517_v19 = vld [vmem:[#allocation2 + $0x9a] sm:$0xff]  ;;  %v4678_v35 = vpop.f32.mrf.mxu0 }
 0x2eb   : > { %5158 = vst [vmem:[#allocation28_spill] sm:$0xff] %v4678_v35 }
 0x2ec   : > { %3497 = vmatmul.msk.bf16.gmra.mxu1 %vm675_vm1, %v2317_v59  ;;  %v2290_v59 = vld [vmem:[#allocation2 + $0x91] sm:$0xff] }
 0x2ed   : > { %3517 = vmatmul.msk.bf16.gmra.mxu2 %vm675_vm1, %v2543_v8 }
 0x2f0   : > { %v1772_v26 = vpop.f32.mrf.mxu2  ;;  %3562 = vmatmul.msk.bf16.gmra.mxu0 %vm505_vm0, %v3669_v34 }
 0x2f1   : > { %v1819_v52 = vadd.f32 %v1772_v26, %v1593_v43  ;;  %v1998_v60 = vpop.f32.mrf.mxu3  ;;  %v1548_v49 = vpop.f32.mrf.mxu1  ;;  %v2318_v26 = vpack.c.bf16 %v2291_v55, %v2290_v59  ;;  %v3670_v55 = vld [vmem:[%s3918_s12 + $0x28] sm:$0xff] }
 0x2f2   : > { %v1594_v37 = vadd.f32 %v1548_v49, %v4426_v15  ;;  %v2544_v15 = vpack.c.bf16 %v2517_v19, %v2516_v21  ;;  %v4687_v35 = vpop.f32.mrf.mxu0 }
 0x2f3   : > { %v4673_v51 = vadd.f32 %v1998_v60, %v1819_v52  ;;  %5159 = vst [vmem:[#allocation29_spill] sm:$0xff] %v4687_v35 }
 0x2f5   : > { %5157 = vst [vmem:[#allocation27_spill] sm:$0xff] %v4673_v51  ;;  %v2293_v51 = vld [vmem:[#allocation2 + $0xb1] sm:$0xff] }
 0x2f8   : > { %v1774_v33 = vpop.f32.mrf.mxu2 }
 0x2f9   : > { %v4680_v7 = vadd.f32 %v1774_v33, %v1594_v37  ;;  %v4682_v40 = vpop.f32.mrf.mxu3  ;;  %v1551_v43 = vpop.f32.mrf.mxu1 }
 0x2fa   : > { %v1595_v8 = vadd.f32 %v1551_v43, %v4436_v42  ;;  %v2518_v42 = vld [vmem:[#allocation2 + $0xaa] sm:$0xff]  ;;  %v2519_v43 = vld [vmem:[#allocation2 + $0xb2] sm:$0xff] }
 0x2fc   : > { %3498 = vmatmul.msk.bf16.gmra.mxu1 %vm675_vm1, %v2318_v26 }
 0x2fd   : > { %3518 = vmatmul.msk.bf16.gmra.mxu2 %vm675_vm1, %v2544_v15 }
 0x300   : > { %v1777_v52 = vpop.f32.mrf.mxu2  ;;  %3563 = vmatmul.msk.bf16.gmra.mxu0 %vm505_vm0, %v3670_v55 }
 0x301   : > { %v1821_v60 = vadd.f32 %v1777_v52, %v1595_v8  ;;  %v2003_v49 = vpop.f32.mrf.mxu3  ;;  %v1553_v34 = vpop.f32.mrf.mxu1  ;;  %v2292_v8 = vld [vmem:[#allocation2 + $0xa9] sm:$0xff]  ;;  %v2545_v52 = vpack.c.bf16 %v2519_v43, %v2518_v42  ;;  %v3671_v43 = vld [vmem:[%s3918_s12 + $0x30] sm:$0xff] }
 0x302   : > { %v1596_v37 = vadd.f32 %v1553_v34, %v4442_v47  ;;  %v2319_v15 = vpack.c.bf16 %v2293_v51, %v2292_v8  ;;  %v2295_v51 = vld [vmem:[#allocation2 + $0xc9] sm:$0xff] }
 0x303   : > { %v4689_v33 = vadd.f32 %v2003_v49, %v1821_v60  ;;  %v4699_v60 = vpop.f32.mrf.mxu0  ;;  %v2521_v42 = vld [vmem:[#allocation2 + $0xca] sm:$0xff] }
 0x304   : > { %5160 = vst [vmem:[#allocation30_spill] sm:$0xff] %v4699_v60 }
 0x308   : > { %v1779_v20 = vpop.f32.mrf.mxu2 }
 0x309   : > { %v4694_v21 = vadd.f32 %v1779_v20, %v1596_v37  ;;  %v4696_v19 = vpop.f32.mrf.mxu3  ;;  %v1556_v59 = vpop.f32.mrf.mxu1 }
 0x30a   : > { %v1597_v26 = vadd.f32 %v1556_v59, %v4450_v61  ;;  %v2520_v59 = vld [vmem:[#allocation2 + $0xc2] sm:$0xff] }
 0x30b   : > { %v4706_v35 = vpop.f32.mrf.mxu0 }
 0x30c   : > { %3499 = vmatmul.msk.bf16.gmra.mxu1 %vm675_vm1, %v2319_v15  ;;  %5162 = vst [vmem:[#allocation32_spill] sm:$0xff] %v4706_v35 }
 0x30d   : > { %3519 = vmatmul.msk.bf16.gmra.mxu2 %vm675_vm1, %v2545_v52  ;;  %v2294_v52 = vld [vmem:[#allocation2 + $0xc1] sm:$0xff] }
 0x310   : > { %v1782_v47 = vpop.f32.mrf.mxu2  ;;  %3564 = vmatmul.msk.bf16.gmra.mxu0 %vm505_vm0, %v3671_v43 }
 0x311   : > { %v1823_v49 = vadd.f32 %v1782_v47, %v1597_v26  ;;  %v2008_v34 = vpop.f32.mrf.mxu3  ;;  %v1558_v20 = vpop.f32.mrf.mxu1 }
 0x312   : > { %v1598_v55 = vadd.f32 %v1558_v20, %v4452_v16  ;;  %v2546_v16 = vpack.c.bf16 %v2521_v42, %v2520_v59 }
 0x313   : > { %v4703_v37 = vadd.f32 %v2008_v34, %v1823_v49  ;;  %v2320_v49 = vpack.c.bf16 %v2295_v51, %v2294_v52  ;;  %v2240_v34 = vpop.f32.mrf.mxu0  ;;  %v2523_v51 = vld [vmem:[#allocation2 + $0xe2] sm:$0xff] }
 0x315   : > { %5161 = vst [vmem:[#allocation31_spill] sm:$0xff] %v4703_v37 }
 0x318   : > { %v1784_v61 = vpop.f32.mrf.mxu2 }
 0x319   : > { %v4710_v8 = vadd.f32 %v1784_v61, %v1598_v55  ;;  %v4712_v15 = vpop.f32.mrf.mxu3  ;;  %v1561_v26 = vpop.f32.mrf.mxu1 }
 0x31a   : > { %5164 = vst [vmem:[#allocation34_spill] sm:$0xff] %v4712_v15  ;;  %v1599_v47 = vadd.f32 %v1561_v26, %v4460_v13  ;;  %v2522_v13 = vld [vmem:[#allocation2 + $0xda] sm:$0xff]  ;;  %v3672_v26 = vld [vmem:[%s3918_s12 + $0x38] sm:$0xff] }
 0x31b   : > { %5163 = vst [vmem:[#allocation33_spill] sm:$0xff] %v4710_v8  ;;  %v2297_v8 = vld [vmem:[#allocation2 + $0xe1] sm:$0xff]  ;;  %v4722_v59 = vpop.f32.mrf.mxu0 }
 0x31c   : > { %3500 = vmatmul.msk.bf16.gmra.mxu1 %vm675_vm1, %v2320_v49  ;;  %5166 = vst [vmem:[#allocation36_spill] sm:$0xff] %v4722_v59  ;;  %v2296_v49 = vld [vmem:[#allocation2 + $0xd9] sm:$0xff] }
 0x31d   : > { %3520 = vmatmul.msk.bf16.gmra.mxu2 %vm675_vm1, %v2546_v16 }
 0x320   : > { %v1787_v20 = vpop.f32.mrf.mxu2  ;;  %3565 = vmatmul.msk.bf16.gmra.mxu0 %vm505_vm0, %v3672_v26 }
 0x321   : > { %v1825_v35 = vadd.f32 %v1787_v20, %v1599_v47  ;;  %v2013_v60 = vpop.f32.mrf.mxu3  ;;  %v1563_v43 = vpop.f32.mrf.mxu1 }
 0x322   : > { %v1600_v61 = vadd.f32 %v1563_v43, %v4462_v1  ;;  %v2321_v1 = vpack.c.bf16 %v2297_v8, %v2296_v49  ;;  %v2525_v8 = vld [vmem:[#allocation2 + $0xfa] sm:$0xff]  ;;  %v2298_v49 = vld [vmem:[#allocation2 + $0xf1] sm:$0xff] }
 0x323   : > { %v2051_v55 = vadd.f32 %v2013_v60, %v1825_v35  ;;  %v2547_v60 = vpack.c.bf16 %v2523_v51, %v2522_v13  ;;  %v2245_v20 = vpop.f32.mrf.mxu0 }
 0x325   : > { %v4718_v37 = vadd.f32 %v2240_v34, %v2051_v55 }
 0x327   : > { %5165 = vst [vmem:[#allocation35_spill] sm:$0xff] %v4718_v37  ;;  %v2299_v37 = vld [vmem:[#allocation2 + $0xf9] sm:$0xff] }
 0x328   : > { %v1789_v15 = vpop.f32.mrf.mxu2 }
 0x329   : > { %v4724_v42 = vadd.f32 %v1789_v15, %v1600_v61  ;;  %v4726_v52 = vpop.f32.mrf.mxu3  ;;  %v1566_v47 = vpop.f32.mrf.mxu1 }
 0x32a   : > { %v1601_v35 = vadd.f32 %v1566_v47, %v4472_v30  ;;  %v2524_v30 = vld [vmem:[#allocation2 + $0xf2] sm:$0xff] }
 0x32b   : > { %v3673_v47 = vld [vmem:[%s3918_s12 + $0x40] sm:$0xff] }
 0x32c   : > { %3501 = vmatmul.msk.bf16.gmra.mxu1 %vm675_vm1, %v2321_v1  ;;  %v2548_v1 = vpack.c.bf16 %v2525_v8, %v2524_v30  ;;  %v2527_v30 = vld [vmem:[#allocation2 + $0x112] sm:$0xff] }
 0x32d   : > { %3521 = vmatmul.msk.bf16.gmra.mxu2 %vm675_vm1, %v2547_v60  ;;  %v2250_v60 = vadd.f32 %v4410_v11, %v4491_v22  ;;  %v3674_v8 = vld [vmem:[%s3918_s12 + $0x48] sm:$0xff] }
 0x330   : > { %v1792_v16 = vpop.f32.mrf.mxu2  ;;  %3566 = vmatmul.msk.bf16.gmra.mxu0 %vm505_vm0, %v3673_v47 }
 0x331   : > { %v1827_v34 = vadd.f32 %v1792_v16, %v1601_v35  ;;  %v2018_v43 = vpop.f32.mrf.mxu3  ;;  %v1568_v55 = vpop.f32.mrf.mxu1  ;;  %v2322_v35 = vpack.c.bf16 %v2299_v37, %v2298_v49  ;;  %v2251_v37 = vadd.f32 %v4422_v50, %v4496_v53 }
 0x332   : > { %v1602_v61 = vadd.f32 %v1568_v55, %v4482_v5 }
 0x333   : > { %v2053_v15 = vadd.f32 %v2018_v43, %v1827_v34 }
 0x335   : > { %v4732_v26 = vadd.f32 %v2245_v20, %v2053_v15  ;;  %v2301_v15 = vld [vmem:[#allocation2 + $0x111] sm:$0xff] }
 0x338   : > { %v1794_v59 = vpop.f32.mrf.mxu2 }
 0x339   : > { %v4736_v13 = vadd.f32 %v1794_v59, %v1602_v61  ;;  %v2396_v51 = vpop.f32.mrf.mxu1  ;;  %v4745_v59 = vld [vmem:[%s5102_s4] ss:$0 sm:$0xff]  ;;  %v2526_v61 = vld [vmem:[#allocation2 + $0x10a] sm:$0xff] }
 0x33a   : > { %v2476_v34 = vadd.f32 %v2396_v51, %v2250_v60  ;;  %v2300_v51 = vld [vmem:[#allocation2 + $0x109] sm:$0xff] }
 0x33c   : > { %3502 = vmatmul.msk.bf16.gmra.mxu1 %vm675_vm1, %v2322_v35  ;;  %v2323_v35 = vpack.c.bf16 %v2301_v15, %v2300_v51 }
 0x33d   : > { %3522 = vmatmul.msk.bf16.gmra.mxu2 %vm675_vm1, %v2548_v1  ;;  %v2549_v1 = vpack.c.bf16 %v2527_v30, %v2526_v61  ;;  %v2303_v61 = vld [vmem:[#allocation2 + $0x129] sm:$0xff] }
 0x33e   : > { %v2528_v30 = vld [vmem:[#allocation2 + $0x122] sm:$0xff] }
 0x340   : > { %v2622_v5 = vpop.f32.mrf.mxu2  ;;  %3567 = vmatmul.msk.bf16.gmra.mxu0 %vm505_vm0, %v3674_v8  ;;  %v2529_v8 = vld [vmem:[#allocation2 + $0x12a] sm:$0xff] }
 0x341   : > { %v2398_v16 = vpop.f32.mrf.mxu1  ;;  %v2702_v20 = vadd.f32 %v2622_v5, %v2476_v34 }
 0x342   : > { %v2477_v43 = vadd.f32 %v2398_v16, %v2251_v37  ;;  %v2252_v16 = vadd.f32 %v4434_v27, %v4507_v2  ;;  %v2302_v2 = vld [vmem:[#allocation2 + $0x121] sm:$0xff] }
 0x343   : > { %v2738_v11 = vadd.f32 %v4745_v59, %v2702_v20 }
 0x345   : > { %v2770_v5 = vmax.f32 %v2738_v11, 0.0  ;;  %v3675_v11 = vld [vmem:[%s3918_s12 + $0x50] sm:$0xff] }
 0x348   : > { %v2624_v55 = vpop.f32.mrf.mxu2 }
 0x349   : > { %v2703_v22 = vadd.f32 %v2624_v55, %v2477_v43  ;;  %v2401_v47 = vpop.f32.mrf.mxu1  ;;  %v2253_v43 = vadd.f32 %v4438_v10, %v4512_v63 }
 0x34a   : > { %v2478_v20 = vadd.f32 %v2401_v47, %v2252_v16  ;;  %v2324_v47 = vpack.c.bf16 %v2303_v61, %v2302_v2  ;;  %v2531_v61 = vld [vmem:[#allocation2 + $0x142] sm:$0xff] }
 0x34b   : > { %v2739_v49 = vadd.f32 %v4745_v59, %v2703_v22 }
 0x34c   : > { %3503 = vmatmul.msk.bf16.gmra.mxu1 %vm675_vm1, %v2323_v35  ;;  %v2550_v35 = vpack.c.bf16 %v2529_v8, %v2528_v30  ;;  %v3676_v30 = vld [vmem:[%s3918_s12 + $0x58] sm:$0xff] }
 0x34d   : > { %v2771_v60 = vmax.f32 %v2739_v49, 0.0  ;;  %3523 = vmatmul.msk.bf16.gmra.mxu2 %vm675_vm1, %v2549_v1 }
 0x34f   : > { %v2802_v50 = vpack.c.bf16 %v2771_v60, %v2770_v5  ;;  %v2254_v60 = vadd.f32 %v4470_v23, %v4523_v29 }
 0x350   : > { %v2627_v53 = vpop.f32.mrf.mxu2  ;;  %3568 = vmatmul.msk.bf16.gmra.mxu0 %vm505_vm0, %v3675_v11  ;;  %v2304_v11 = vld [vmem:[#allocation2 + $0x139] sm:$0xff] }
 0x351   : > { %3534 = vmatmul.msk.bf16.vlgmr.msra.gmra.mxu3 %vm675_vm1, %v2802_v50  ;;  %v2403_v34 = vpop.f32.mrf.mxu1  ;;  %v2704_v37 = vadd.f32 %v2627_v53, %v2478_v20 }
 0x352   : > { %v2479_v55 = vadd.f32 %v2403_v34, %v2253_v43  ;;  %v2255_v34 = vadd.f32 %v4480_v3, %v4526_v54 }
 0x353   : > { %v2740_v22 = vadd.f32 %v4745_v59, %v2704_v37  ;;  %v4771_v37 = vpop.f32.mrf.mxu0 }
 0x355   : > { %v2772_v1 = vmax.f32 %v2740_v22, 0.0 }
 0x358   : > { %v2629_v15 = vpop.f32.mrf.mxu2 }
 0x359   : > { %v2705_v51 = vadd.f32 %v2629_v15, %v2479_v55  ;;  %v2406_v27 = vpop.f32.mrf.mxu1  ;;  %v2305_v55 = vld [vmem:[#allocation2 + $0x141] sm:$0xff] }
 0x35a   : > { %v2480_v53 = vadd.f32 %v2406_v27, %v2254_v60  ;;  %v2530_v15 = vld [vmem:[#allocation2 + $0x13a] sm:$0xff] }
 0x35b   : > { %v2741_v49 = vadd.f32 %v4745_v59, %v2705_v51  ;;  %v2325_v51 = vpack.c.bf16 %v2305_v55, %v2304_v11  ;;  %v2551_v27 = vpack.c.bf16 %v2531_v61, %v2530_v15  ;;  %v2306_v55 = vld [vmem:[#allocation2 + $0x151] sm:$0xff] }
 0x35c   : > { %3504 = vmatmul.msk.bf16.gmra.mxu1 %vm675_vm1, %v2324_v47  ;;  %v2256_v47 = vadd.f32 %v4494_v58, %v4537_v36 }
 0x35d   : > { %v2773_v5 = vmax.f32 %v2741_v49, 0.0  ;;  %3524 = vmatmul.msk.bf16.gmra.mxu2 %vm675_vm1, %v2550_v35 }
 0x35f   : > { %v2803_v10 = vpack.c.bf16 %v2773_v5, %v2772_v1 }
 0x360   : > { %v2632_v63 = vpop.f32.mrf.mxu2  ;;  %3569 = vmatmul.msk.bf16.gmra.mxu0 %vm505_vm0, %v3676_v30 }
 0x361   : > { %3535 = vmatmul.msk.bf16.gmra.mxu3 %vm675_vm1, %v2803_v10  ;;  %v2408_v50 = vpop.f32.mrf.mxu1  ;;  %v2706_v16 = vadd.f32 %v2632_v63, %v2480_v53  ;;  %v2257_v10 = vadd.f32 %v4505_v4, %v4542_v62  ;;  %v2532_v53 = vld [vmem:[#allocation2 + $0x152] sm:$0xff] }
 0x362   : > { %v2481_v20 = vadd.f32 %v2408_v50, %v2255_v34  ;;  %v2307_v50 = vld [vmem:[#allocation2 + $0x159] sm:$0xff] }
 0x363   : > { %v2742_v23 = vadd.f32 %v4745_v59, %v2706_v16  ;;  %v2533_v16 = vld [vmem:[#allocation2 + $0x15a] sm:$0xff]  ;;  %v2326_v36 = vpack.c.bf16 %v2307_v50, %v2306_v55  ;;  %v2260_v50 = vadd.f32 %v4529_v56, %v4570_v17 }
 0x364   : > { %v2552_v15 = vpack.c.bf16 %v2533_v16, %v2532_v53 }
 0x365   : > { %v2774_v3 = vmax.f32 %v2742_v23, 0.0  ;;  %v2032_v23 = vadd.f32 %v4559_v0, %v4557_v45  ;;  %v2308_v45 = vld [vmem:[#allocation2 + $0x169] sm:$0xff] }
 0x368   : > { %v2634_v43 = vpop.f32.mrf.mxu2 }
 0x369   : > { %v2707_v29 = vadd.f32 %v2634_v43, %v2481_v20  ;;  %v2411_v8 = vpop.f32.mrf.mxu1 }
 0x36a   : > { %v2482_v1 = vadd.f32 %v2411_v8, %v2256_v47 }
 0x36b   : > { %v2743_v22 = vadd.f32 %v4745_v59, %v2707_v29  ;;  %v2258_v29 = vadd.f32 %v4510_v57, %v4554_v41 }
 0x36c   : > { %3505 = vmatmul.msk.bf16.gmra.mxu1 %vm675_vm1, %v2325_v51  ;;  %v2259_v51 = vadd.f32 %v4521_v28, %v2032_v23 }
 0x36d   : > { %v2775_v54 = vmax.f32 %v2743_v22, 0.0  ;;  %3525 = vmatmul.msk.bf16.gmra.mxu2 %vm675_vm1, %v2551_v27 }
 0x36f   : > { %v2804_v2 = vpack.c.bf16 %v2775_v54, %v2774_v3  ;;  %v2309_v54 = vld [vmem:[#allocation2 + $0x171] sm:$0xff] }
 0x370   : > { %v2637_v49 = vpop.f32.mrf.mxu2  ;;  %v2327_v57 = vpack.c.bf16 %v2309_v54, %v2308_v45  ;;  %v5168_v45 = vld [vmem:[#allocation16_spill] sm:$0xff] }
 0x371   : > { %3536 = vmatmul.msk.bf16.gmra.mxu3 %vm675_vm1, %v2804_v2  ;;  %v2413_v35 = vpop.f32.mrf.mxu1  ;;  %v2708_v5 = vadd.f32 %v2637_v49, %v2482_v1  ;;  %v2534_v2 = vld [vmem:[#allocation2 + $0x16a] sm:$0xff]  ;;  %v2535_v49 = vld [vmem:[#allocation2 + $0x172] sm:$0xff] }
 0x372   : > { %v2483_v63 = vadd.f32 %v2413_v35, %v2257_v10  ;;  %v2553_v41 = vpack.c.bf16 %v2535_v49, %v2534_v2 }
 0x373   : > { %v2744_v34 = vadd.f32 %v4745_v59, %v2708_v5 }
 0x375   : > { %v2776_v61 = vmax.f32 %v2744_v34, 0.0 }
 0x378   : > { %v2639_v60 = vpop.f32.mrf.mxu2 }
 0x379   : > { %v2709_v20 = vadd.f32 %v2639_v60, %v2483_v63  ;;  %v2416_v43 = vpop.f32.mrf.mxu1  ;;  %v2034_v60 = vadd.f32 %v4578_v6, %v4576_v46  ;;  %v2262_v6 = vadd.f32 %v4551_v18, %v4589_v48 }
 0x37a   : > { %v2484_v11 = vadd.f32 %v2416_v43, %v2258_v29  ;;  %v5167_v29 = vld [vmem:[#allocation9_spill] sm:$0xff] }
 0x37b   : > { %v2745_v58 = vadd.f32 %v4745_v59, %v2709_v20  ;;  %v2261_v20 = vadd.f32 %v4540_v12, %v2034_v60  ;;  %v2036_v12 = vadd.f32 %v4596_v14, %v4594_v39 }
 0x37c   : > { %3506 = vmatmul.msk.bf16.gmra.mxu1 %vm675_vm1, %v2326_v36 }
 0x37d   : > { %v2777_v30 = vmax.f32 %v2745_v58, 0.0  ;;  %3526 = vmatmul.msk.bf16.gmra.mxu2 %vm675_vm1, %v2552_v15 }
 0x37f   : > { %v2805_v4 = vpack.c.bf16 %v2777_v30, %v2776_v61 }
 0x380   : > { %v2642_v62 = vpop.f32.mrf.mxu2 }
 0x381   : > { %3537 = vmatmul.msk.bf16.gmra.mxu3 %vm675_vm1, %v2805_v4  ;;  %v2418_v8 = vpop.f32.mrf.mxu1  ;;  %v2710_v22 = vadd.f32 %v2642_v62, %v2484_v11  ;;  %v2312_v11 = vld [vmem:[#allocation2 + $0x199] sm:$0xff] }
 0x382   : > { %v2485_v27 = vadd.f32 %v2418_v8, %v2259_v51  ;;  %v2263_v8 = vadd.f32 %v5167_v29, %v2036_v12  ;;  %v2539_v51 = vld [vmem:[#allocation2 + $0x1a2] sm:$0xff]  ;;  %v5173_v12 = vld [vmem:[#allocation20_spill] sm:$0xff] }
 0x383   : > { %v2746_v47 = vadd.f32 %v4745_v59, %v2710_v22  ;;  %v2538_v22 = vld [vmem:[#allocation2 + $0x19a] sm:$0xff] }
 0x384   : > { %v2555_v14 = vpack.c.bf16 %v2539_v51, %v2538_v22 }
 0x385   : > { %v2778_v5 = vmax.f32 %v2746_v47, 0.0 }
 0x388   : > { %v2644_v3 = vpop.f32.mrf.mxu2 }
 0x389   : > { %v2711_v35 = vadd.f32 %v2644_v3, %v2485_v27  ;;  %v2421_v1 = vpop.f32.mrf.mxu1 }
 0x38a   : > { %v2486_v16 = vadd.f32 %v2421_v1, %v2260_v50  ;;  %v5172_v50 = vld [vmem:[#allocation12_spill] sm:$0xff] }
 0x38b   : > { %v2747_v0 = vadd.f32 %v4745_v59, %v2711_v35  ;;  %v2996_v35 = vpop.f32.mrf.mxu0 }
 0x38c   : > { %3507 = vmatmul.msk.bf16.gmra.mxu1 %vm675_vm1, %v2327_v57 }
 0x38d   : > { %v2779_v10 = vmax.f32 %v2747_v0, 0.0  ;;  %3527 = vmatmul.msk.bf16.gmra.mxu2 %vm675_vm1, %v2553_v41  ;;  %v5169_v0 = vld [vmem:[#allocation14_spill] sm:$0xff]  ;;  %v5170_v41 = vld [vmem:[#allocation15_spill] sm:$0xff] }
 0x38e   : > { %v2038_v57 = vadd.f32 %v5169_v0, %v5168_v45  ;;  %v2042_v0 = vadd.f32 %v4650_v31, %v4648_v24 }
 0x38f   : > { %v2806_v28 = vpack.c.bf16 %v2779_v10, %v2778_v5  ;;  %v5171_v5 = vld [vmem:[#allocation11_spill] sm:$0xff] }
 0x390   : > { %v2647_v63 = vpop.f32.mrf.mxu2  ;;  %v2264_v10 = vadd.f32 %v5171_v5, %v5170_v41  ;;  %v5178_v41 = vld [vmem:[#allocation18_spill] sm:$0xff] }
 0x391   : > { %3538 = vmatmul.msk.bf16.gmra.mxu3 %vm675_vm1, %v2806_v28  ;;  %v2423_v53 = vpop.f32.mrf.mxu1  ;;  %v2712_v34 = vadd.f32 %v2647_v63, %v2486_v16 }
 0x392   : > { %v2487_v43 = vadd.f32 %v2423_v53, %v2261_v20  ;;  %v2265_v53 = vadd.f32 %v5172_v50, %v2038_v57  ;;  %v5177_v57 = vld [vmem:[#allocation22_spill] sm:$0xff] }
 0x393   : > { %v2748_v58 = vadd.f32 %v4745_v59, %v2712_v34  ;;  %v4826_v20 = vpop.f32.mrf.mxu0  ;;  %v2268_v5 = vadd.f32 %v5178_v41, %v5177_v57  ;;  %v3680_v57 = vld [vmem:[%s3918_s12 + $0x78] sm:$0xff] }
 0x395   : > { %v2780_v30 = vmax.f32 %v2748_v58, 0.0 }
 0x398   : > { %v2649_v55 = vpop.f32.mrf.mxu2 }
 0x399   : > { %v2713_v36 = vadd.f32 %v2649_v55, %v2487_v43  ;;  %v2426_v15 = vpop.f32.mrf.mxu1  ;;  %v3677_v43 = vld [vmem:[%s3918_s12 + $0x60] sm:$0xff] }
 0x39a   : > { %v2488_v62 = vadd.f32 %v2426_v15, %v2262_v6  ;;  %3570 = vmatmul.msk.bf16.gmra.mxu0 %vm505_vm0, %v3677_v43  ;;  %v2040_v6 = vadd.f32 %v5173_v12, %v4634_v44 }
 0x39b   : > { %v2749_v61 = vadd.f32 %v4745_v59, %v2713_v36 }
 0x39c   : > { %3508 = vmatmul.msk.bf16.gmra.mxu1 %vm675_vm1, %v4599_v25  ;;  %v2313_v25 = vld [vmem:[#allocation2 + $0x1a1] sm:$0xff] }
 0x39d   : > { %v2781_v46 = vmax.f32 %v2749_v61, 0.0  ;;  %3528 = vmatmul.msk.bf16.gmra.mxu2 %vm675_vm1, %v4601_v38  ;;  %v2329_v39 = vpack.c.bf16 %v2313_v25, %v2312_v11  ;;  %v5176_v25 = vld [vmem:[#allocation13_spill] sm:$0xff] }
 0x39e   : > { %v2267_v22 = vadd.f32 %v5176_v25, %v2040_v6  ;;  %v2044_v25 = vadd.f32 %v4666_v32, %v4664_v9 }
 0x39f   : > { %v2807_v56 = vpack.c.bf16 %v2781_v46, %v2780_v30 }
 0x3a0   : > { %v2652_v17 = vpop.f32.mrf.mxu2 }
 0x3a1   : > { %3539 = vmatmul.msk.bf16.gmra.mxu3 %vm675_vm1, %v2807_v56  ;;  %v2428_v4 = vpop.f32.mrf.mxu1  ;;  %v2714_v23 = vadd.f32 %v2652_v17, %v2488_v62  ;;  %v4832_v17 = vpop.f32.mrf.mxu0  ;;  %v5175_v62 = vld [vmem:[#allocation10_spill] sm:$0xff] }
 0x3a2   : > { %v2489_v38 = vadd.f32 %v2428_v4, %v2263_v8  ;;  %v5174_v4 = vld [vmem:[#allocation17_spill] sm:$0xff] }
 0x3a3   : > { %v2750_v3 = vadd.f32 %v4745_v59, %v2714_v23  ;;  %v2266_v23 = vadd.f32 %v5175_v62, %v5174_v4 }
 0x3a5   : > { %v2782_v48 = vmax.f32 %v2750_v3, 0.0  ;;  %v3678_v3 = vld [vmem:[%s3918_s12 + $0x68] sm:$0xff] }
 0x3a8   : > { %v2654_v27 = vpop.f32.mrf.mxu2 }
 0x3a9   : > { %v2715_v54 = vadd.f32 %v2654_v27, %v2489_v38  ;;  %v2431_v2 = vpop.f32.mrf.mxu1  ;;  %v4840_v27 = vpop.f32.mrf.mxu0 }
 0x3aa   : > { %v2490_v63 = vadd.f32 %v2431_v2, %v2264_v10  ;;  %3571 = vmatmul.msk.bf16.gmra.mxu0 %vm505_vm0, %v3678_v3  ;;  %v4846_v2 = vpop.f32.mrf.mxu3  ;;  %v4865_v10 = vld [vmem:[%s5104_s6] ss:$0 sm:$0xff] }
 0x3ab   : > { %v2751_v18 = vadd.f32 %v4745_v59, %v2715_v54 }
 0x3ac   : > { %3509 = vmatmul.msk.bf16.gmra.mxu1 %vm675_vm1, %v2329_v39 }
 0x3ad   : > { %v2783_v49 = vmax.f32 %v2751_v18, 0.0  ;;  %3529 = vmatmul.msk.bf16.gmra.mxu2 %vm675_vm1, %v2555_v14 }
 0x3af   : > { %v2808_v47 = vpack.c.bf16 %v2783_v49, %v2782_v48 }
 0x3b0   : > { %v2657_v1 = vpop.f32.mrf.mxu2 }
 0x3b1   : > { %3540 = vmatmul.msk.bf16.gmra.mxu3 %vm675_vm1, %v2808_v47  ;;  %v2433_v28 = vpop.f32.mrf.mxu1  ;;  %v2716_v60 = vadd.f32 %v2657_v1, %v2490_v63  ;;  %v4852_v47 = vld [vmem:[%s5106_s8] ss:$0 sm:$0xff]  ;;  %v4854_v45 = vpop.f32.mrf.mxu0 }
 0x3b2   : > { %v2491_v16 = vadd.f32 %v2433_v28, %v2265_v53  ;;  %v2999_v6 = vadd.f32 %v4852_v47, %v4826_v20 }
 0x3b3   : > { %v2752_v55 = vadd.f32 %v4745_v59, %v2716_v60  ;;  %v2997_v60 = vadd.f32 %v4852_v47, %v2996_v35  ;;  %v3679_v35 = vld [vmem:[%s3918_s12 + $0x70] sm:$0xff] }
 0x3b5   : > { %v2784_v61 = vmax.f32 %v2752_v55, 0.0 }
 0x3b8   : > { %v2659_v34 = vpop.f32.mrf.mxu2 }
 0x3b9   : > { %v2717_v58 = vadd.f32 %v2659_v34, %v2491_v16  ;;  %v2436_v36 = vpop.f32.mrf.mxu1  ;;  %v5179_v16 = vld [vmem:[#allocation19_spill] sm:$0xff] }
 0x3ba   : > { %v2492_v8 = vadd.f32 %v2436_v36, %v2266_v23  ;;  %v2269_v24 = vadd.f32 %v5179_v16, %v2042_v0 }
 0x3bb   : > { %v2753_v15 = vadd.f32 %v4745_v59, %v2717_v58  ;;  %v4875_v58 = vpop.f32.mrf.mxu0  ;;  %3572 = vmatmul.msk.bf16.gmra.mxu0 %vm505_vm0, %v3679_v35  ;;  %v2046_v35 = vadd.f32 %v4682_v40, %v4680_v7 }
 0x3bd   : > { %v2785_v30 = vmax.f32 %v2753_v15, 0.0 }
 0x3bf   : > { %v2809_v46 = vpack.c.bf16 %v2785_v30, %v2784_v61 }
 0x3c0   : > { %v2662_v56 = vpop.f32.mrf.mxu2 }
 0x3c1   : > { %3541 = vmatmul.msk.bf16.gmra.mxu3 %vm675_vm1, %v2809_v46  ;;  %v2438_v29 = vpop.f32.mrf.mxu1  ;;  %v2718_v11 = vadd.f32 %v2662_v56, %v2492_v8 }
 0x3c2   : > { %v2493_v51 = vadd.f32 %v2438_v29, %v2267_v22  ;;  %v5181_v22 = vld [vmem:[#allocation24_spill] sm:$0xff] }
 0x3c3   : > { %v2754_v44 = vadd.f32 %v4745_v59, %v2718_v11  ;;  %v4886_v11 = vpop.f32.mrf.mxu0 }
 0x3c5   : > { %v2786_v18 = vmax.f32 %v2754_v44, 0.0 }
 0x3c8   : > { %v2664_v38 = vpop.f32.mrf.mxu2 }
 0x3c9   : > { %v2719_v54 = vadd.f32 %v2664_v38, %v2493_v51  ;;  %v2441_v39 = vpop.f32.mrf.mxu1  ;;  %v5182_v51 = vld [vmem:[#allocation21_spill] sm:$0xff] }
 0x3ca   : > { %v2494_v63 = vadd.f32 %v2441_v39, %v2268_v5  ;;  %v2270_v38 = vadd.f32 %v5182_v51, %v5181_v22 }
 0x3cb   : > { %v2755_v14 = vadd.f32 %v4745_v59, %v2719_v54  ;;  %v3002_v54 = vadd.f32 %v4852_v47, %v4832_v17  ;;  %v4899_v0 = vpop.f32.mrf.mxu0  ;;  %3573 = vmatmul.msk.bf16.gmra.mxu0 %vm505_vm0, %v3680_v57 }
 0x3cd   : > { %v2787_v48 = vmax.f32 %v2755_v14, 0.0 }
 0x3cf   : > { %v2810_v49 = vpack.c.bf16 %v2787_v48, %v2786_v18  ;;  %v5183_v18 = vld [vmem:[#allocation23_spill] sm:$0xff] }
 0x3d0   : > { %v2667_v1 = vpop.f32.mrf.mxu2  ;;  %v2271_v48 = vadd.f32 %v5183_v18, %v2044_v25 }
 0x3d1   : > { %3542 = vmatmul.msk.bf16.gmra.mxu3 %vm675_vm1, %v2810_v49  ;;  %v2443_v28 = vpop.f32.mrf.mxu1  ;;  %v2720_v53 = vadd.f32 %v2667_v1, %v2494_v63 }
 0x3d2   : > { %v2495_v34 = vadd.f32 %v2443_v28, %v2269_v24 }
 0x3d3   : > { %v2756_v36 = vadd.f32 %v4745_v59, %v2720_v53  ;;  %v3004_v53 = vadd.f32 %v4852_v47, %v4840_v27 }
 0x3d4   : > { %v2887_v50 = vpop.f32.mrf.mxu3 }
 0x3d5   : > { %v2888_v31 = vadd.f32 %v4865_v10, %v2887_v50  ;;  %v2788_v12 = vmax.f32 %v2756_v36, 0.0  ;;  %v5184_v36 = vld [vmem:[#allocation27_spill] sm:$0xff] }
 0x3d7   : > { %v3076_v43 = vadd.f32 %v2997_v60, %v2888_v31 }
 0x3d8   : > { %v2669_v55 = vpop.f32.mrf.mxu2 }
 0x3d9   : > { %v3108_v15 = vmax.f32 %v3076_v43, 0.0  ;;  %v2721_v61 = vadd.f32 %v2669_v55, %v2495_v34  ;;  %v2446_v30 = vpop.f32.mrf.mxu1  ;;  %v4910_v55 = vpop.f32.mrf.mxu0 }
 0x3da   : > { %v2496_v20 = vadd.f32 %v2446_v30, %v2270_v38 }
 0x3db   : > { %3141 = vst.msk [vmem:[%s4873_s23] sm:$0xff] %vm3140_vm3, %v3108_v15  ;;  %v2757_v46 = vadd.f32 %v4745_v59, %v2721_v61  ;;  %v5185_v15 = vld [vmem:[#allocation25_spill] sm:$0xff] }
 0x3dc   : > { %v2889_v56 = vpop.f32.mrf.mxu3  ;;  %v2272_v61 = vadd.f32 %v5185_v15, %v5184_v36  ;;  %v3014_v36 = vadd.f32 %v4852_v47, %v4899_v0 }
 0x3dd   : > { %v2789_v4 = vmax.f32 %v2757_v46, 0.0  ;;  %v2890_v62 = vadd.f32 %v4865_v10, %v2889_v56  ;;  %v3007_v56 = vadd.f32 %v4852_v47, %v4854_v45 }
 0x3df   : > { %v2811_v23 = vpack.c.bf16 %v2789_v4, %v2788_v12  ;;  %v3077_v29 = vadd.f32 %v2999_v6, %v2890_v62  ;;  %v5186_v4 = vld [vmem:[#allocation26_spill] sm:$0xff] }
 0x3e0   : > { %v2672_v8 = vpop.f32.mrf.mxu2  ;;  %v2273_v62 = vadd.f32 %v5186_v4, %v2046_v35 }
 0x3e1   : > { %v3109_v3 = vmax.f32 %v3077_v29, 0.0  ;;  %3543 = vmatmul.msk.bf16.gmra.mxu3 %vm675_vm1, %v2811_v23  ;;  %v2448_v44 = vpop.f32.mrf.mxu1  ;;  %v2722_v14 = vadd.f32 %v2672_v8, %v2496_v20  ;;  %v4923_v8 = vpop.f32.mrf.mxu0  ;;  %v3009_v20 = vadd.f32 %v4852_v47, %v4875_v58 }
 0x3e2   : > { %v2497_v32 = vadd.f32 %v2448_v44, %v2271_v48 }
 0x3e3   : > { %3142 = vst.msk [vmem:[%s4873_s23 + $0x8] sm:$0xff] %vm3140_vm3, %v3109_v3  ;;  %v2758_v41 = vadd.f32 %v4745_v59, %v2722_v14 }
 0x3e4   : > { %v2892_v39 = vpop.f32.mrf.mxu3 }
 0x3e5   : > { %v2893_v9 = vadd.f32 %v4865_v10, %v2892_v39  ;;  %v2790_v50 = vmax.f32 %v2758_v41, 0.0 }
 0x3e7   : > { %v3078_v49 = vadd.f32 %v3002_v54, %v2893_v9 }
 0x3e8   : > { %v2674_v1 = vpop.f32.mrf.mxu2 }
 0x3e9   : > { %v3110_v5 = vmax.f32 %v3078_v49, 0.0  ;;  %v2723_v28 = vadd.f32 %v2674_v1, %v2497_v32  ;;  %v2451_v63 = vpop.f32.mrf.mxu1  ;;  %v4932_v9 = vpop.f32.mrf.mxu0  ;;  %v2048_v32 = vadd.f32 %v4696_v19, %v4694_v21  ;;  %v5187_v49 = vld [vmem:[#allocation28_spill] sm:$0xff] }
 0x3ea   : > { %v2498_v27 = vadd.f32 %v2451_v63, %v2272_v61  ;;  %v2274_v1 = vadd.f32 %v5187_v49, %v4689_v33 }
 0x3eb   : > { %3143 = vst.msk [vmem:[%s4873_s23 + $0x10] sm:$0xff] %vm3140_vm3, %v3110_v5  ;;  %v2759_v17 = vadd.f32 %v4745_v59, %v2723_v28  ;;  %v3012_v5 = vadd.f32 %v4852_v47, %v4886_v11 }
 0x3ec   : > { %v2894_v60 = vpop.f32.mrf.mxu3 }
 0x3ed   : > { %v2791_v16 = vmax.f32 %v2759_v17, 0.0  ;;  %v2895_v24 = vadd.f32 %v4865_v10, %v2894_v60  ;;  %v5188_v17 = vld [vmem:[#allocation29_spill] sm:$0xff] }
 0x3ee   : > { %v2275_v60 = vadd.f32 %v5188_v17, %v2048_v32 }
 0x3ef   : > { %v2812_v31 = vpack.c.bf16 %v2791_v16, %v2790_v50  ;;  %v3079_v34 = vadd.f32 %v3004_v53, %v2895_v24 }
 0x3f0   : > { %v2677_v43 = vpop.f32.mrf.mxu2 }
 0x3f1   : > { %v3111_v30 = vmax.f32 %v3079_v34, 0.0  ;;  %3544 = vmatmul.msk.bf16.gmra.mxu3 %vm675_vm1, %v2812_v31  ;;  %v2453_v46 = vpop.f32.mrf.mxu1  ;;  %v2724_v6 = vadd.f32 %v2677_v43, %v2498_v27  ;;  %v4945_v53 = vpop.f32.mrf.mxu0 }
 0x3f2   : > { %v2499_v40 = vadd.f32 %v2453_v46, %v2273_v62  ;;  %v5191_v62 = vld [vmem:[#allocation31_spill] sm:$0xff] }
 0x3f3   : > { %3144 = vst.msk [vmem:[%s4873_s23 + $0x18] sm:$0xff] %vm3140_vm3, %v3111_v30  ;;  %v2760_v25 = vadd.f32 %v4745_v59, %v2724_v6  ;;  %v5190_v6 = vld [vmem:[#allocation34_spill] sm:$0xff] }
 0x3f4   : > { %v2897_v12 = vpop.f32.mrf.mxu3 }
 0x3f5   : > { %v2898_v7 = vadd.f32 %v4865_v10, %v2897_v12  ;;  %v2792_v44 = vmax.f32 %v2760_v25, 0.0  ;;  %v5189_v12 = vld [vmem:[#allocation33_spill] sm:$0xff]  ;;  %v3017_v25 = vadd.f32 %v4852_v47, %v4910_v55 }
 0x3f6   : > { %v2050_v4 = vadd.f32 %v5190_v6, %v5189_v12  ;;  %v3024_v12 = vadd.f32 %v4852_v47, %v4945_v53 }
 0x3f7   : > { %v3080_v23 = vadd.f32 %v3007_v56, %v2898_v7  ;;  %v5192_v7 = vld [vmem:[#allocation30_spill] sm:$0xff] }
 0x3f8   : > { %v2679_v29 = vpop.f32.mrf.mxu2 }
 0x3f9   : > { %v3112_v22 = vmax.f32 %v3080_v23, 0.0  ;;  %v2725_v51 = vadd.f32 %v2679_v29, %v2499_v40  ;;  %v2456_v38 = vpop.f32.mrf.mxu1  ;;  %v4954_v56 = vpop.f32.mrf.mxu0  ;;  %v2276_v40 = vadd.f32 %v5192_v7, %v5191_v62 }
 0x3fa   : > { %v2500_v58 = vadd.f32 %v2456_v38, %v2274_v1  ;;  %v5193_v38 = vld [vmem:[#allocation32_spill] sm:$0xff]  ;;  %v3027_v53 = vadd.f32 %v4852_v47, %v4954_v56 }
 0x3fb   : > { %3145 = vst.msk [vmem:[%s4873_s23 + $0x20] sm:$0xff] %vm3140_vm3, %v3112_v22  ;;  %v2761_v45 = vadd.f32 %v4745_v59, %v2725_v51 }
 0x3fc   : > { %v2899_v3 = vpop.f32.mrf.mxu3 }
 0x3fd   : > { %v2793_v54 = vmax.f32 %v2761_v45, 0.0  ;;  %v2900_v39 = vadd.f32 %v4865_v10, %v2899_v3  ;;  %v2277_v45 = vadd.f32 %v5193_v38, %v2050_v4 }
 0x3ff   : > { %v2813_v14 = vpack.c.bf16 %v2793_v54, %v2792_v44  ;;  %v3081_v18 = vadd.f32 %v3009_v20, %v2900_v39 }
 0x400   : > { %v2682_v48 = vpop.f32.mrf.mxu2 }
 0x401   : > { %v3113_v57 = vmax.f32 %v3081_v18, 0.0  ;;  %3545 = vmatmul.msk.bf16.gmra.mxu3 %vm675_vm1, %v2813_v14  ;;  %v2458_v41 = vpop.f32.mrf.mxu1  ;;  %v2726_v63 = vadd.f32 %v2682_v48, %v2500_v58  ;;  %v4967_v39 = vpop.f32.mrf.mxu0 }
 0x402   : > { %v2501_v19 = vadd.f32 %v2458_v41, %v2275_v60  ;;  %v2052_v60 = vadd.f32 %v4726_v52, %v4724_v42 }
 0x403   : > { %3146 = vst.msk [vmem:[%s4873_s23 + $0x28] sm:$0xff] %vm3140_vm3, %v3113_v57  ;;  %v2762_v16 = vadd.f32 %v4745_v59, %v2726_v63  ;;  %v3019_v57 = vadd.f32 %v4852_v47, %v4923_v8  ;;  %v3022_v8 = vadd.f32 %v4852_v47, %v4932_v9 }
 0x404   : > { %v2902_v28 = vpop.f32.mrf.mxu3 }
 0x405   : > { %v2903_v21 = vadd.f32 %v4865_v10, %v2902_v28  ;;  %v2794_v35 = vmax.f32 %v2762_v16, 0.0 }
 0x407   : > { %v3082_v50 = vadd.f32 %v3012_v5, %v2903_v21 }
 0x408   : > { %v2684_v33 = vpop.f32.mrf.mxu2 }
 0x409   : > { %v3114_v24 = vmax.f32 %v3082_v50, 0.0  ;;  %v2727_v31 = vadd.f32 %v2684_v33, %v2501_v19  ;;  %v2461_v34 = vpop.f32.mrf.mxu1  ;;  %v3031_v17 = vpop.f32.mrf.mxu0  ;;  %v5194_v50 = vld [vmem:[#allocation35_spill] sm:$0xff] }
 0x40a   : > { %v2502_v0 = vadd.f32 %v2461_v34, %v2276_v40 }
 0x40b   : > { %3147 = vst.msk [vmem:[%s4873_s23 + $0x30] sm:$0xff] %vm3140_vm3, %v3114_v24  ;;  %v2763_v11 = vadd.f32 %v4745_v59, %v2727_v31  ;;  %v5195_v31 = vld [vmem:[#allocation36_spill] sm:$0xff] }
 0x40c   : > { %v2904_v43 = vpop.f32.mrf.mxu3  ;;  %v2279_v34 = vadd.f32 %v5195_v31, %v2052_v60 }
 0x40d   : > { %v2795_v15 = vmax.f32 %v2763_v11, 0.0  ;;  %v2905_v61 = vadd.f32 %v4865_v10, %v2904_v43 }
 0x40f   : > { %v2814_v30 = vpack.c.bf16 %v2795_v15, %v2794_v35  ;;  %v3083_v46 = vadd.f32 %v3014_v36, %v2905_v61 }
 0x410   : > { %v2687_v27 = vpop.f32.mrf.mxu2 }
 0x411   : > { %v3115_v23 = vmax.f32 %v3083_v46, 0.0  ;;  %3546 = vmatmul.msk.bf16.gmra.mxu3 %vm675_vm1, %v2814_v30  ;;  %v2463_v29 = vpop.f32.mrf.mxu1  ;;  %v2728_v51 = vadd.f32 %v2687_v27, %v2502_v0  ;;  %v3033_v61 = vpop.f32.mrf.mxu0 }
 0x412   : > { %v2503_v44 = vadd.f32 %v2463_v29, %v2277_v45  ;;  %v3034_v60 = vadd.f32 %v4852_v47, %v3033_v61 }
 0x413   : > { %3148 = vst.msk [vmem:[%s4873_s23 + $0x38] sm:$0xff] %vm3140_vm3, %v3115_v23  ;;  %v2764_v14 = vadd.f32 %v4745_v59, %v2728_v51  ;;  %v2054_v23 = vadd.f32 %v4846_v2, %v4736_v13 }
 0x414   : > { %v2907_v22 = vpop.f32.mrf.mxu3 }
 0x415   : > { %v2908_v3 = vadd.f32 %v4865_v10, %v2907_v22  ;;  %v2796_v1 = vmax.f32 %v2764_v14, 0.0  ;;  %v2281_v38 = vadd.f32 %v4771_v37, %v2054_v23  ;;  %v3029_v37 = vadd.f32 %v4852_v47, %v4967_v39 }
 0x417   : > { %v3084_v20 = vadd.f32 %v3017_v25, %v2908_v3 }
 0x418   : > { %v2689_v54 = vpop.f32.mrf.mxu2 }
 0x419   : > { %v3116_v18 = vmax.f32 %v3084_v20, 0.0  ;;  %v2729_v48 = vadd.f32 %v2689_v54, %v2503_v44  ;;  %v2466_v32 = vpop.f32.mrf.mxu1  ;;  %v3036_v25 = vpop.f32.mrf.mxu0 }
 0x41a   : > { %v2504_v33 = vadd.f32 %v2466_v32, %v5194_v50 }
 0x41b   : > { %3149 = vst.msk [vmem:[%s4873_s23 + $0x40] sm:$0xff] %vm3140_vm3, %v3116_v18  ;;  %v2765_v55 = vadd.f32 %v4745_v59, %v2729_v48 }
 0x41c   : > { %v2909_v49 = vpop.f32.mrf.mxu3 }
 0x41d   : > { %v2797_v41 = vmax.f32 %v2765_v55, 0.0  ;;  %v2910_v58 = vadd.f32 %v4865_v10, %v2909_v49 }
 0x41f   : > { %v2815_v5 = vpack.c.bf16 %v2797_v41, %v2796_v1  ;;  %v3085_v28 = vadd.f32 %v3019_v57, %v2910_v58 }
 0x420   : > { %v2692_v63 = vpop.f32.mrf.mxu2 }
 0x421   : > { %v3117_v21 = vmax.f32 %v3085_v28, 0.0  ;;  %3547 = vmatmul.msk.bf16.gmra.mxu3 %vm675_vm1, %v2815_v5  ;;  %v2468_v19 = vpop.f32.mrf.mxu1  ;;  %v2730_v24 = vadd.f32 %v2692_v63, %v2504_v33  ;;  %v3038_v55 = vpop.f32.mrf.mxu0 }
 0x422   : > { %v2505_v43 = vadd.f32 %v2468_v19, %v2279_v34 }
 0x423   : > { %3150 = vst.msk [vmem:[%s4873_s23 + $0x48] sm:$0xff] %vm3140_vm3, %v3117_v21  ;;  %v2766_v35 = vadd.f32 %v4745_v59, %v2730_v24 }
 0x424   : > { %v2912_v16 = vpop.f32.mrf.mxu3 }
 0x425   : > { %v2913_v11 = vadd.f32 %v4865_v10, %v2912_v16  ;;  %v2798_v27 = vmax.f32 %v2766_v35, 0.0 }
 0x427   : > { %v3086_v42 = vadd.f32 %v3022_v8, %v2913_v11 }
 0x428   : > { %v2694_v52 = vpop.f32.mrf.mxu2 }
 0x429   : > { %v3118_v36 = vmax.f32 %v3086_v42, 0.0  ;;  %v2731_v15 = vadd.f32 %v2694_v52, %v2505_v43  ;;  %v2471_v30 = vpop.f32.mrf.mxu1  ;;  %v3041_v39 = vpop.f32.mrf.mxu0  ;;  %v3039_v43 = vadd.f32 %v4852_v47, %v3038_v55 }
 0x42a   : > { %v2506_v0 = vadd.f32 %v2471_v30, %v4732_v26 }
 0x42b   : > { %3151 = vst.msk [vmem:[%s4873_s23 + $0x50] sm:$0xff] %vm3140_vm3, %v3118_v36  ;;  %v2767_v9 = vadd.f32 %v4745_v59, %v2731_v15  ;;  %v3042_v36 = vadd.f32 %v4852_v47, %v3041_v39 }
 0x42c   : > { %v2914_v46 = vpop.f32.mrf.mxu3 }
 0x42d   : > { %v2799_v6 = vmax.f32 %v2767_v9, 0.0  ;;  %v2915_v4 = vadd.f32 %v4865_v10, %v2914_v46 }
 0x42f   : > { %v2816_v62 = vpack.c.bf16 %v2799_v6, %v2798_v27  ;;  %v3087_v7 = vadd.f32 %v3024_v12, %v2915_v4 }
 0x430   : > { %v2697_v40 = vpop.f32.mrf.mxu2 }
 0x431   : > { %v3119_v29 = vmax.f32 %v3087_v7, 0.0  ;;  %3548 = vmatmul.msk.bf16.gmra.mxu3 %vm675_vm1, %v2816_v62  ;;  %v2473_v22 = vpop.f32.mrf.mxu1  ;;  %v2732_v45 = vadd.f32 %v2697_v40, %v2506_v0  ;;  %v3043_v33 = vpop.f32.mrf.mxu0 }
 0x432   : > { %v2507_v13 = vadd.f32 %v2473_v22, %v2281_v38  ;;  %v3044_v12 = vadd.f32 %v4852_v47, %v3043_v33 }
 0x433   : > { %3152 = vst.msk [vmem:[%s4873_s23 + $0x58] sm:$0xff] %vm3140_vm3, %v3119_v29  ;;  %v2768_v20 = vadd.f32 %v4745_v59, %v2732_v45 }
 0x434   : > { %v2917_v51 = vpop.f32.mrf.mxu3 }
 0x435   : > { %v2918_v3 = vadd.f32 %v4865_v10, %v2917_v51  ;;  %v2800_v18 = vmax.f32 %v2768_v20, 0.0 }
 0x437   : > { %v3088_v2 = vadd.f32 %v3027_v53, %v2918_v3 }
 0x438   : > { %v2699_v44 = vpop.f32.mrf.mxu2 }
 0x439   : > { %v3120_v26 = vmax.f32 %v3088_v2, 0.0  ;;  %v2733_v54 = vadd.f32 %v2699_v44, %v2507_v13  ;;  %v3046_v11 = vpop.f32.mrf.mxu0 }
 0x43a   : > { %v3047_v40 = vadd.f32 %v4852_v47, %v3046_v11 }
 0x43b   : > { %3153 = vst.msk [vmem:[%s4873_s23 + $0x60] sm:$0xff] %vm3140_vm3, %v3120_v26  ;;  %v2769_v56 = vadd.f32 %v4745_v59, %v2733_v54  ;;  %v3032_v59 = vadd.f32 %v4852_v47, %v3031_v17  ;;  %v3037_v17 = vadd.f32 %v4852_v47, %v3036_v25 }
 0x43c   : > { %v2919_v14 = vpop.f32.mrf.mxu3 }
 0x43d   : > { %v2801_v48 = vmax.f32 %v2769_v56, 0.0  ;;  %v2920_v32 = vadd.f32 %v4865_v10, %v2919_v14 }
 0x43f   : > { %v2817_v49 = vpack.c.bf16 %v2801_v48, %v2800_v18  ;;  %v3089_v1 = vadd.f32 %v3029_v37, %v2920_v32 }
 0x441   : > { %v3121_v57 = vmax.f32 %v3089_v1, 0.0  ;;  %3549 = vmatmul.msk.bf16.gmra.mxu3 %vm675_vm1, %v2817_v49  ;;  %v3048_v30 = vpop.f32.mrf.mxu0 }
 0x442   : > { %v3049_v51 = vadd.f32 %v4852_v47, %v3048_v30 }
 0x443   : > { %3154 = vst.msk [vmem:[%s4873_s23 + $0x68] sm:$0xff] %vm3140_vm3, %v3121_v57 }
 0x444   : > { %v2922_v41 = vpop.f32.mrf.mxu3 }
 0x445   : > { %v2923_v58 = vadd.f32 %v4865_v10, %v2922_v41 }
 0x447   : > { %v3090_v5 = vadd.f32 %v3032_v59, %v2923_v58 }
 0x449   : > { %v3122_v28 = vmax.f32 %v3090_v5, 0.0  ;;  %v3051_v62 = vpop.f32.mrf.mxu0 }
 0x44a   : > { %v3052_v13 = vadd.f32 %v4852_v47, %v3051_v62 }
 0x44b   : > { %3155 = vst.msk [vmem:[%s4873_s23 + $0x70] sm:$0xff] %vm3140_vm3, %v3122_v28 }
 0x44c   : > { %v2924_v63 = vpop.f32.mrf.mxu3 }
 0x44d   : > { %v2925_v21 = vadd.f32 %v4865_v10, %v2924_v63 }
 0x44f   : > { %v3091_v19 = vadd.f32 %v3034_v60, %v2925_v21 }
 0x451   : > { %v3123_v50 = vmax.f32 %v3091_v19, 0.0  ;;  %v3053_v25 = vpop.f32.mrf.mxu0 }
 0x452   : > { %v3054_v14 = vadd.f32 %v4852_v47, %v3053_v25 }
 0x453   : > { %3156 = vst.msk [vmem:[%s4873_s23 + $0x78] sm:$0xff] %vm3140_vm3, %v3123_v50 }
 0x454   : > { %v2927_v8 = vpop.f32.mrf.mxu3 }
 0x455   : > { %v2928_v16 = vadd.f32 %v4865_v10, %v2927_v8 }
 0x457   : > { %v3092_v24 = vadd.f32 %v3037_v17, %v2928_v16 }
 0x459   : > { %v3124_v31 = vmax.f32 %v3092_v24, 0.0  ;;  %v3056_v44 = vpop.f32.mrf.mxu0 }
 0x45a   : > { %v3057_v55 = vadd.f32 %v4852_v47, %v3056_v44 }
 0x45b   : > { %3157 = vst.msk [vmem:[%s4873_s23 + $0x80] sm:$0xff] %vm3140_vm3, %v3124_v31 }
 0x45c   : > { %v2929_v34 = vpop.f32.mrf.mxu3 }
 0x45d   : > { %v2930_v42 = vadd.f32 %v4865_v10, %v2929_v34 }
 0x45f   : > { %v3093_v52 = vadd.f32 %v3039_v43, %v2930_v42 }
 0x461   : > { %v3125_v35 = vmax.f32 %v3093_v52, 0.0  ;;  %v3058_v37 = vpop.f32.mrf.mxu0 }
 0x462   : > { %v3059_v5 = vadd.f32 %v4852_v47, %v3058_v37 }
 0x463   : > { %3158 = vst.msk [vmem:[%s4873_s23 + $0x88] sm:$0xff] %vm3140_vm3, %v3125_v35 }
 0x464   : > { %v2932_v15 = vpop.f32.mrf.mxu3 }
 0x465   : > { %v2933_v61 = vadd.f32 %v4865_v10, %v2932_v15 }
 0x467   : > { %v3094_v9 = vadd.f32 %v3042_v36, %v2933_v61 }
 0x469   : > { %v3126_v46 = vmax.f32 %v3094_v9, 0.0  ;;  %v3061_v59 = vpop.f32.mrf.mxu0 }
 0x46a   : > { %v3062_v21 = vadd.f32 %v4852_v47, %v3061_v59 }
 0x46b   : > { %3159 = vst.msk [vmem:[%s4873_s23 + $0x90] sm:$0xff] %vm3140_vm3, %v3126_v46 }
 0x46c   : > { %v2934_v27 = vpop.f32.mrf.mxu3 }
 0x46d   : > { %v2935_v6 = vadd.f32 %v4865_v10, %v2934_v27 }
 0x46f   : > { %v3095_v4 = vadd.f32 %v3044_v12, %v2935_v6 }
 0x471   : > { %v3127_v7 = vmax.f32 %v3095_v4, 0.0  ;;  %v3063_v60 = vpop.f32.mrf.mxu0 }
 0x472   : > { %v3064_v24 = vadd.f32 %v4852_v47, %v3063_v60 }
 0x473   : > { %3160 = vst.msk [vmem:[%s4873_s23 + $0x98] sm:$0xff] %vm3140_vm3, %v3127_v7 }
 0x474   : > { %v2937_v23 = vpop.f32.mrf.mxu3 }
 0x475   : > { %v2938_v29 = vadd.f32 %v4865_v10, %v2937_v23 }
 0x477   : > { %v3096_v0 = vadd.f32 %v3047_v40, %v2938_v29 }
 0x479   : > { %v3128_v53 = vmax.f32 %v3096_v0, 0.0  ;;  %v3066_v16 = vpop.f32.mrf.mxu0 }
 0x47a   : > { %v3067_v43 = vadd.f32 %v4852_v47, %v3066_v16 }
 0x47b   : > { %3161 = vst.msk [vmem:[%s4873_s23 + $0xa0] sm:$0xff] %vm3140_vm3, %v3128_v53 }
 0x47c   : > { %v2939_v22 = vpop.f32.mrf.mxu3 }
 0x47d   : > { %v2940_v38 = vadd.f32 %v4865_v10, %v2939_v22 }
 0x47f   : > { %v3097_v45 = vadd.f32 %v3049_v51, %v2940_v38 }
 0x481   : > { %v3129_v3 = vmax.f32 %v3097_v45, 0.0  ;;  %v3068_v35 = vpop.f32.mrf.mxu0 }
 0x482   : > { %v3069_v30 = vadd.f32 %v4852_v47, %v3068_v35 }
 0x483   : > { %3162 = vst.msk [vmem:[%s4873_s23 + $0xa8] sm:$0xff] %vm3140_vm3, %v3129_v3 }
 0x484   : > { %v2942_v2 = vpop.f32.mrf.mxu3 }
 0x485   : > { %v2943_v20 = vadd.f32 %v4865_v10, %v2942_v2 }
 0x487   : > { %v3098_v26 = vadd.f32 %v3052_v13, %v2943_v20 }
 0x489   : > { %v3130_v54 = vmax.f32 %v3098_v26, 0.0  ;;  %v3071_v27 = vpop.f32.mrf.mxu0 }
 0x48a   : > { %v3072_v6 = vadd.f32 %v4852_v47, %v3071_v27 }
 0x48b   : > { %3163 = vst.msk [vmem:[%s4873_s23 + $0xb0] sm:$0xff] %vm3140_vm3, %v3130_v54 }
 0x48c   : > { %v2944_v56 = vpop.f32.mrf.mxu3 }
 0x48d   : > { %v2945_v18 = vadd.f32 %v4865_v10, %v2944_v56 }
 0x48f   : > { %v3099_v48 = vadd.f32 %v3054_v14, %v2945_v18 }
 0x491   : > { %v3131_v32 = vmax.f32 %v3099_v48, 0.0  ;;  %v3073_v23 = vpop.f32.mrf.mxu0 }
 0x492   : > { %v3074_v0 = vadd.f32 %v4852_v47, %v3073_v23 }
 0x493   : > { %3164 = vst.msk [vmem:[%s4873_s23 + $0xb8] sm:$0xff] %vm3140_vm3, %v3131_v32 }
 0x494   : > { %v2947_v49 = vpop.f32.mrf.mxu3 }
 0x495   : > { %v2948_v1 = vadd.f32 %v4865_v10, %v2947_v49 }
 0x497   : > { %v3100_v57 = vadd.f32 %v3057_v55, %v2948_v1 }
 0x499   : > { %v3132_v41 = vmax.f32 %v3100_v57, 0.0 }
 0x49b   : > { %3165 = vst.msk [vmem:[%s4873_s23 + $0xc0] sm:$0xff] %vm3140_vm3, %v3132_v41 }
 0x49c   : > { %v2949_v58 = vpop.f32.mrf.mxu3 }
 0x49d   : > { %v2950_v39 = vadd.f32 %v4865_v10, %v2949_v58 }
 0x49f   : > { %v3101_v28 = vadd.f32 %v3059_v5, %v2950_v39 }
 0x4a1   : > { %v3133_v63 = vmax.f32 %v3101_v28, 0.0 }
 0x4a3   : > { %3166 = vst.msk [vmem:[%s4873_s23 + $0xc8] sm:$0xff] %vm3140_vm3, %v3133_v63 }
 0x4a4   : > { %v2952_v19 = vpop.f32.mrf.mxu3 }
 0x4a5   : > { %v2953_v50 = vadd.f32 %v4865_v10, %v2952_v19 }
 0x4a7   : > { %v3102_v33 = vadd.f32 %v3062_v21, %v2953_v50 }
 0x4a9   : > { %v3134_v17 = vmax.f32 %v3102_v33, 0.0 }
 0x4ab   : > { %3167 = vst.msk [vmem:[%s4873_s23 + $0xd0] sm:$0xff] %vm3140_vm3, %v3134_v17 }
 0x4ac   : > { %v2954_v8 = vpop.f32.mrf.mxu3 }
 0x4ad   : > { %v2955_v31 = vadd.f32 %v4865_v10, %v2954_v8 }
 0x4af   : > { %v3103_v34 = vadd.f32 %v3064_v24, %v2955_v31 }
 0x4b1   : > { %v3135_v11 = vmax.f32 %v3103_v34, 0.0 }
 0x4b3   : > { %3168 = vst.msk [vmem:[%s4873_s23 + $0xd8] sm:$0xff] %vm3140_vm3, %v3135_v11 }
 0x4b4   : > { %v2957_v42 = vpop.f32.mrf.mxu3 }
 0x4b5   : > { %v2958_v52 = vadd.f32 %v4865_v10, %v2957_v42 }
 0x4b7   : > { %v3104_v36 = vadd.f32 %v3067_v43, %v2958_v52 }
 0x4b9   : > { %v3136_v15 = vmax.f32 %v3104_v36, 0.0 }
 0x4bb   : > { %3169 = vst.msk [vmem:[%s4873_s23 + $0xe0] sm:$0xff] %vm3140_vm3, %v3136_v15 }
 0x4bc   : > { %v2959_v61 = vpop.f32.mrf.mxu3 }
 0x4bd   : > { %v2960_v9 = vadd.f32 %v4865_v10, %v2959_v61 }
 0x4bf   : > { %v3105_v46 = vadd.f32 %v3069_v30, %v2960_v9 }
 0x4c1   : > { %v3137_v12 = vmax.f32 %v3105_v46, 0.0 }
 0x4c3   : > { %3170 = vst.msk [vmem:[%s4873_s23 + $0xe8] sm:$0xff] %vm3140_vm3, %v3137_v12 }
 0x4c4   : > { %v2962_v4 = vpop.f32.mrf.mxu3 }
 0x4c5   : > { %v2963_v62 = vadd.f32 %v4865_v10, %v2962_v4 }
 0x4c7   : > { %v3106_v7 = vadd.f32 %v3072_v6, %v2963_v62 }
 0x4c9   : > { %v3138_v40 = vmax.f32 %v3106_v7, 0.0 }
 0x4cb   : > { %3171 = vst.msk [vmem:[%s4873_s23 + $0xf0] sm:$0xff] %vm3140_vm3, %v3138_v40 }
 0x4cc   : > { %v2964_v29 = vpop.f32.mrf.mxu3 }
 0x4cd   : > { %v2965_v53 = vadd.f32 %v4865_v10, %v2964_v29 }
 0x4cf   : > { %v3107_v25 = vadd.f32 %v3074_v0, %v2965_v53 }
 0x4d1   : > { %v3139_v22 = vmax.f32 %v3107_v25, 0.0 }
 0x4d3   : > { %3172 = vst.msk [vmem:[%s4873_s23 + $0xf8] sm:$0xff] %vm3140_vm3, %v3139_v22 }
 0x4d4 PF: > { %p20_p4 = scmp.ge.s32.totalorder %s3878_s21, 4   ;;  %s5196_s30 = smov %s3771_s10 }
 0x4d5   : > { %s5197_s10 = smov %s3775_s11  ;;  %s5198_s11 = smov %s3891_s26 }
 0x4d6   : > { %s5199_s12 = smov %s3878_s21  ;;  %22 = sbr.rel (!%p20_p4) target bundleno = 7 (0x7), region = 110 }
 0x4db   :  { %3194 = vsyncpa [#allocation4], 1 }
 0x4dc   :  { %3196 = vsyncpa [#allocation4 + $0x1], 1 }
 0x4dd   :  { %3197 = vsyncpa [#allocation6], 1 }

</bundles_post_ra>
